<compile_context>
chip_gen: v7x
topology: tpu7x:2x2x1
jax: 0.10.0
libtpu: 0.0.40
codegen_flags: <defaults>
</compile_context>

<pallas_src>
import jax
import jax.numpy as jnp
import numpy as np
from jax import lax
from jax.experimental import pallas as pl
from jax.experimental.pallas import tpu as pltpu

H = 64     # LSTM hidden size
I_IN = 28  # LSTM input size
FEAT = 32
NCLS = 3


# ------------------------------ kernel ------------------------------

def _make_eeglstm_kernel(T, B):
    """Kernel specialized to static (T, B); all time loops fully unrolled."""

    def gate_math(gates, c):
        # gate order (i, f, o, g): one sigmoid slab (B, 3H) + one tanh slab (B, H)
        sg = jax.nn.sigmoid(gates[:, :3 * H])
        g = jnp.tanh(gates[:, 3 * H:])
        i = sg[:, :H]
        f = sg[:, H:2 * H]
        o = sg[:, 2 * H:3 * H]
        c_new = f * c + i * g
        h_new = o * jnp.tanh(c_new)
        return h_new, c_new

    def kernel(
        x_ref,                              # (T*B, I_IN)
        wih1_ref, b1_ref,                   # (I, 8H), (1, 8H)   layer-1 fwd||bwd
        whh1f_ref, whh1b_ref,               # (H, 4H) each
        wih2f_ref, whh2f_ref, b2f_ref,      # (2H, 4H), (H, 4H), (1, 4H)
        wih2b_ref, b2b_ref,                 # (2H, 4H), (1, 4H)  (h0 == 0 -> no W_hh)
        wl1_ref, bl1_ref, wl2_ref, bl2_ref, wo_ref, bo_ref,
        out_ref, feat_ref,                  # (B, 3), (B, 32)
        g1_scr,                             # (T*B, 8H) hoisted layer-1 input gates
        seq1_scr,                           # (T*B, 2H) layer-1 outputs (fwd | bwd)
        g2_scr,                             # (T*B, 4H) hoisted layer-2-fwd input gates
    ):
        f32 = jnp.float32

        # ---- hoisted input projection, layer 1 fwd+bwd, bias folded once ----
        g1_scr[...] = (
            jnp.dot(x_ref[...], wih1_ref[...], preferred_element_type=f32)
            + b1_ref[...]
        )

        whh1f = whh1f_ref[...]
        whh1b = whh1b_ref[...]

        zeros = jnp.zeros((B, H), f32)
        hf, cf = zeros, zeros
        hb, cb = zeros, zeros

        # ---- fused layer-1 forward + backward recurrence (fully unrolled) ----
        for s in range(T):
            tf = s
            tb = T - 1 - s
            gf = g1_scr[tf * B:(tf + 1) * B, 0:4 * H] + jnp.dot(
                hf, whh1f, preferred_element_type=f32)
            gb = g1_scr[tb * B:(tb + 1) * B, 4 * H:8 * H] + jnp.dot(
                hb, whh1b, preferred_element_type=f32)
            hf, cf = gate_math(gf, cf)
            hb, cb = gate_math(gb, cb)
            seq1_scr[tf * B:(tf + 1) * B, 0:H] = hf
            seq1_scr[tb * B:(tb + 1) * B, H:2 * H] = hb

        # ---- hoisted input projection, layer-2 forward ----
        g2_scr[...] = (
            jnp.dot(seq1_scr[...], wih2f_ref[...], preferred_element_type=f32)
            + b2f_ref[...]
        )

        whh2f = whh2f_ref[...]
        h2, c2 = zeros, zeros
        for t in range(T):
            g = g2_scr[t * B:(t + 1) * B, :] + jnp.dot(
                h2, whh2f, preferred_element_type=f32)
            h2, c2 = gate_math(g, c2)

        # ---- layer-2 backward: r_out[:, -1, 64:] is the backward state after its
        #      first reverse step (input at t = T-1, zero init -> h@W_hh term is 0) ----
        x_last = seq1_scr[(T - 1) * B:T * B, :]
        gb2 = (jnp.dot(x_last, wih2b_ref[...], preferred_element_type=f32)
               + b2b_ref[...])
        h2b, _ = gate_math(gb2, zeros)

        last = jnp.concatenate([h2, h2b], axis=-1)          # == r_out[:, -1, :]  (B, 2H)

        # ---- MLP head: Linear(128,64) -> Dropout(identity) -> ReLU
        #               -> Linear(64,32) -> ReLU -> Linear(32,3) ----
        z1 = jnp.maximum(
            jnp.dot(last, wl1_ref[...], preferred_element_type=f32) + bl1_ref[...], 0.0)
        feat = jnp.maximum(
            jnp.dot(z1, wl2_ref[...], preferred_element_type=f32) + bl2_ref[...], 0.0)
        out = jnp.dot(feat, wo_ref[...], preferred_element_type=f32) + bo_ref[...]

        feat_ref[...] = feat
        out_ref[...] = out

    return kernel


# ------------------------------ parameters ------------------------------

def init_raw_params(key):
    """Synthetic params in raw PyTorch layout: W_ih (4H,in), W_hh (4H,H), gate order (i,f,g,o)."""
    keys = iter(jax.random.split(key, 64))
    kscale = 1.0 / np.sqrt(H)

    def u(shape, scale):
        return jax.random.uniform(next(keys), shape, jnp.float32, -scale, scale)

    p = {}
    for tag, in_dim in (("1f", I_IN), ("1b", I_IN), ("2f", 2 * H), ("2b", 2 * H)):
        p["w_ih_" + tag] = u((4 * H, in_dim), kscale)
        p["w_hh_" + tag] = u((4 * H, H), kscale)
        p["b_ih_" + tag] = u((4 * H,), kscale)
        p["b_hh_" + tag] = u((4 * H,), kscale)

    def linear(in_dim, out_dim):
        s = 1.0 / np.sqrt(in_dim)
        return u((out_dim, in_dim), s), u((out_dim,), s)

    p["w_l1"], p["b_l1"] = linear(2 * H, 64)
    p["w_l2"], p["b_l2"] = linear(64, FEAT)
    p["w_o"], p["b_o"] = linear(FEAT, NCLS)
    return p


# PyTorch gate order (i, f, g, o) -> kernel gate order (i, f, o, g)
_GATE_PERM = np.concatenate([np.arange(0, H), np.arange(H, 2 * H),
                             np.arange(3 * H, 4 * H), np.arange(2 * H, 3 * H)])


def prep_kernel_params(p):
    """Pre-transpose / reorder / fold-bias the raw PyTorch params into kernel layout."""
    def gates(tag):
        w_ih = jnp.transpose(p["w_ih_" + tag][_GATE_PERM])       # (in, 4H), (i,f,o,g)
        w_hh = jnp.transpose(p["w_hh_" + tag][_GATE_PERM])       # (H, 4H)
        b = (p["b_ih_" + tag] + p["b_hh_" + tag])[_GATE_PERM].reshape(1, 4 * H)
        return w_ih, w_hh, b

    wih1f, whh1f, b1f = gates("1f")
    wih1b, whh1b, b1b = gates("1b")
    wih2f, whh2f, b2f = gates("2f")
    wih2b, _, b2b = gates("2b")

    return {
        "wih1": jnp.concatenate([wih1f, wih1b], axis=1),          # (I, 8H)
        "b1": jnp.concatenate([b1f, b1b], axis=1),                # (1, 8H)
        "whh1f": whh1f, "whh1b": whh1b,
        "wih2f": wih2f, "whh2f": whh2f, "b2f": b2f,
        "wih2b": wih2b, "b2b": b2b,
        "wl1": jnp.transpose(p["w_l1"]), "bl1": p["b_l1"].reshape(1, -1),
        "wl2": jnp.transpose(p["w_l2"]), "bl2": p["b_l2"].reshape(1, -1),
        "wo": jnp.transpose(p["w_o"]), "bo": p["b_o"].reshape(1, -1),
    }


# ------------------------------ wrapper ------------------------------

def eeglstm_forward(x, kp):
    B, T, _ = x.shape
    # time-major, then flatten (T, B) so the kernel's hoisted projections are
    # single M = T*B matmuls (layout plumbing done in XLA, outside the kernel).
    x2d = jnp.transpose(x, (1, 0, 2)).reshape(T * B, I_IN).astype(jnp.float32)

    inputs = (
        x2d,
        kp["wih1"], kp["b1"], kp["whh1f"], kp["whh1b"],
        kp["wih2f"], kp["whh2f"], kp["b2f"],
        kp["wih2b"], kp["b2b"],
        kp["wl1"], kp["bl1"], kp["wl2"], kp["bl2"], kp["wo"], kp["bo"],
    )
    vmem = pl.BlockSpec(memory_space=pltpu.MemorySpace.VMEM)
    out, feat = pl.pallas_call(
        _make_eeglstm_kernel(T, B),
        out_shape=(jax.ShapeDtypeStruct((B, NCLS), jnp.float32),
                   jax.ShapeDtypeStruct((B, FEAT), jnp.float32)),
        in_specs=[vmem] * len(inputs),
        out_specs=(vmem, vmem),
        scratch_shapes=[pltpu.VMEM((T * B, 8 * H), jnp.float32),   # layer-1 input gates
                        pltpu.VMEM((T * B, 2 * H), jnp.float32),   # layer-1 outputs
                        pltpu.VMEM((T * B, 4 * H), jnp.float32)],  # layer-2 fwd gates
    )(*inputs)
    return out, feat


# ------------------------------ pure-JAX reference (PyTorch semantics) ------------------------------

def ref_forward(x, p):
    B, T, _ = x.shape
    x_tbi = jnp.transpose(x, (1, 0, 2)).astype(jnp.float32)

    def run_dir(xs, tag, reverse):
        wih = jnp.transpose(p["w_ih_" + tag])
        whh = jnp.transpose(p["w_hh_" + tag])
        b = p["b_ih_" + tag] + p["b_hh_" + tag]

        def step(carry, x_t):
            h, c = carry
            g = x_t @ wih + h @ whh + b
            i = jax.nn.sigmoid(g[:, :H])
            f = jax.nn.sigmoid(g[:, H:2 * H])
            gg = jnp.tanh(g[:, 2 * H:3 * H])
            o = jax.nn.sigmoid(g[:, 3 * H:])
            c = f * c + i * gg
            h = o * jnp.tanh(c)
            return (h, c), h

        seq = xs[::-1] if reverse else xs
        _, hs = lax.scan(step, (jnp.zeros((B, H)), jnp.zeros((B, H))), seq)
        return hs[::-1] if reverse else hs

    f1 = run_dir(x_tbi, "1f", False)
    b1 = run_dir(x_tbi, "1b", True)
    l1 = jnp.concatenate([f1, b1], axis=-1)
    f2 = run_dir(l1, "2f", False)
    b2 = run_dir(l1, "2b", True)
    last = jnp.concatenate([f2[-1], b2[-1]], axis=-1)
    z1 = jnp.maximum(last @ jnp.transpose(p["w_l1"]) + p["b_l1"], 0.0)  # dropout = identity
    feat = jnp.maximum(z1 @ jnp.transpose(p["w_l2"]) + p["b_l2"], 0.0)
    out = feat @ jnp.transpose(p["w_o"]) + p["b_o"]
    return out, feat


if __name__ == "__main__":
    key = jax.random.PRNGKey(0)
    kx, kparams = jax.random.split(key)

    B, T = 2, 8
    x = jax.random.normal(kx, (B, T, I_IN), jnp.float32)
    raw = init_raw_params(kparams)
    kp = prep_kernel_params(raw)

    out, feat = jax.jit(eeglstm_forward)(x, kp)
    jax.block_until_ready((out, feat))

    out_ref, feat_ref = ref_forward(x, raw)
    np.testing.assert_allclose(np.asarray(out), np.asarray(out_ref),
                               rtol=1e-4, atol=1e-5)
    np.testing.assert_allclose(np.asarray(feat), np.asarray(feat_ref),
                               rtol=1e-4, atol=1e-5)

    # TODO(synk): nn.Dropout(p=0.25) is treated as identity (inference mode);
    # h_n / h_c returned by the PyTorch LSTM are unused by forward and not emitted.
    print("KERNEL_OK")
</pallas_src>

<mosaic_0001>
module attributes {stable_mosaic.version = 11 : i64} {
  func.func @kernel(%arg0: memref<16x28xf32, #tpu.memory_space<vmem>>, %arg1: memref<28x512xf32, #tpu.memory_space<vmem>>, %arg2: memref<1x512xf32, #tpu.memory_space<vmem>>, %arg3: memref<64x256xf32, #tpu.memory_space<vmem>>, %arg4: memref<64x256xf32, #tpu.memory_space<vmem>>, %arg5: memref<128x256xf32, #tpu.memory_space<vmem>>, %arg6: memref<64x256xf32, #tpu.memory_space<vmem>>, %arg7: memref<1x256xf32, #tpu.memory_space<vmem>>, %arg8: memref<128x256xf32, #tpu.memory_space<vmem>>, %arg9: memref<1x256xf32, #tpu.memory_space<vmem>>, %arg10: memref<128x64xf32, #tpu.memory_space<vmem>>, %arg11: memref<1x64xf32, #tpu.memory_space<vmem>>, %arg12: memref<64x32xf32, #tpu.memory_space<vmem>>, %arg13: memref<1x32xf32, #tpu.memory_space<vmem>>, %arg14: memref<32x3xf32, #tpu.memory_space<vmem>>, %arg15: memref<1x3xf32, #tpu.memory_space<vmem>>, %arg16: memref<2x3xf32, #tpu.memory_space<vmem>>, %arg17: memref<2x32xf32, #tpu.memory_space<vmem>>, %arg18: memref<16x512xf32, #tpu.memory_space<vmem>>, %arg19: memref<16x128xf32, #tpu.memory_space<vmem>>, %arg20: memref<16x256xf32, #tpu.memory_space<vmem>>) attributes {dimension_semantics = [], scalar_prefetch = 0 : i64, scratch_operands = 3 : i64, tpu.core_type = #tpu.core_type<tc>} {
    %c0 = arith.constant 0 : index
    %c0_0 = arith.constant 0 : index
    %0 = vector.load %arg0[%c0, %c0_0] : memref<16x28xf32, #tpu.memory_space<vmem>>, vector<16x28xf32>
    %c0_1 = arith.constant 0 : index
    %c0_2 = arith.constant 0 : index
    %1 = vector.load %arg1[%c0_1, %c0_2] : memref<28x512xf32, #tpu.memory_space<vmem>>, vector<28x512xf32>
    %cst = arith.constant dense<0.000000e+00> : vector<16x512xf32>
    %2 = tpu.matmul %0, %1, %cst {dimension_numbers = #tpu.dot_dimension_numbers<[1], [0], [0], [1], [0, 0, 1, 1], [], []>} : vector<16x28xf32>, vector<28x512xf32>, vector<16x512xf32> -> vector<16x512xf32>
    %c0_3 = arith.constant 0 : index
    %c0_4 = arith.constant 0 : index
    %3 = vector.load %arg2[%c0_3, %c0_4] : memref<1x512xf32, #tpu.memory_space<vmem>>, vector<1x512xf32>
    %4 = vector.broadcast %3 : vector<1x512xf32> to vector<16x512xf32>
    %5 = arith.addf %2, %4 : vector<16x512xf32>
    %c0_5 = arith.constant 0 : index
    %c0_6 = arith.constant 0 : index
    %6 = vector.load %arg18[%c0_5, %c0_6] : memref<16x512xf32, #tpu.memory_space<vmem>>, vector<16x512xf32>
    tpu.vector_store %arg18[%c0_5, %c0_6], %5 {strides = array<i32>} : memref<16x512xf32, #tpu.memory_space<vmem>>, vector<16x512xf32>,
    %c0_7 = arith.constant 0 : index
    %c0_8 = arith.constant 0 : index
    %7 = vector.load %arg3[%c0_7, %c0_8] : memref<64x256xf32, #tpu.memory_space<vmem>>, vector<64x256xf32>
    %c0_9 = arith.constant 0 : index
    %c0_10 = arith.constant 0 : index
    %8 = vector.load %arg4[%c0_9, %c0_10] : memref<64x256xf32, #tpu.memory_space<vmem>>, vector<64x256xf32>
    %cst_11 = arith.constant 0.000000e+00 : f32
    %9 = vector.broadcast %cst_11 : f32 to vector<2x64xf32>
    %c0_12 = arith.constant 0 : index
    %c0_13 = arith.constant 0 : index
    %10 = vector.load %arg18[%c0_12, %c0_13] : memref<16x512xf32, #tpu.memory_space<vmem>>, vector<2x256xf32>
    %cst_14 = arith.constant dense<0.000000e+00> : vector<2x256xf32>
    %11 = tpu.matmul %9, %7, %cst_14 {dimension_numbers = #tpu.dot_dimension_numbers<[1], [0], [0], [1], [0, 0, 1, 1], [], []>} : vector<2x64xf32>, vector<64x256xf32>, vector<2x256xf32> -> vector<2x256xf32>
    %12 = arith.addf %10, %11 : vector<2x256xf32>
    %c14 = arith.constant 14 : index
    %c256 = arith.constant 256 : index
    %13 = vector.load %arg18[%c14, %c256] : memref<16x512xf32, #tpu.memory_space<vmem>>, vector<2x256xf32>
    %cst_15 = arith.constant dense<0.000000e+00> : vector<2x256xf32>
    %14 = tpu.matmul %9, %8, %cst_15 {dimension_numbers = #tpu.dot_dimension_numbers<[1], [0], [0], [1], [0, 0, 1, 1], [], []>} : vector<2x64xf32>, vector<64x256xf32>, vector<2x256xf32> -> vector<2x256xf32>
    %15 = arith.addf %13, %14 : vector<2x256xf32>
    %16 = vector.extract_strided_slice %12 {offsets = [0, 0], sizes = [2, 192], strides = [1, 1]} : vector<2x256xf32> to vector<2x192xf32>
    %17 = arith.negf %16 : vector<2x192xf32>
    %18 = math.exp %17 : vector<2x192xf32>
    %cst_16 = arith.constant 1.000000e+00 : f32
    %19 = vector.broadcast %cst_16 : f32 to vector<2x192xf32>
    %20 = arith.addf %19, %18 : vector<2x192xf32>
    %21 = arith.divf %19, %20 : vector<2x192xf32>
    %22 = vector.extract_strided_slice %12 {offsets = [0, 192], sizes = [2, 64], strides = [1, 1]} : vector<2x256xf32> to vector<2x64xf32>
    %23 = math.tanh %22 : vector<2x64xf32>
    %24 = vector.extract_strided_slice %21 {offsets = [0, 0], sizes = [2, 64], strides = [1, 1]} : vector<2x192xf32> to vector<2x64xf32>
    %25 = vector.extract_strided_slice %21 {offsets = [0, 64], sizes = [2, 64], strides = [1, 1]} : vector<2x192xf32> to vector<2x64xf32>
    %26 = vector.extract_strided_slice %21 {offsets = [0, 128], sizes = [2, 64], strides = [1, 1]} : vector<2x192xf32> to vector<2x64xf32>
    %27 = arith.mulf %25, %9 : vector<2x64xf32>
    %28 = arith.mulf %24, %23 : vector<2x64xf32>
    %29 = arith.addf %27, %28 : vector<2x64xf32>
    %30 = math.tanh %29 : vector<2x64xf32>
    %31 = arith.mulf %26, %30 : vector<2x64xf32>
    %32 = vector.extract_strided_slice %15 {offsets = [0, 0], sizes = [2, 192], strides = [1, 1]} : vector<2x256xf32> to vector<2x192xf32>
    %33 = arith.negf %32 : vector<2x192xf32>
    %34 = math.exp %33 : vector<2x192xf32>
    %cst_17 = arith.constant 1.000000e+00 : f32
    %35 = vector.broadcast %cst_17 : f32 to vector<2x192xf32>
    %36 = arith.addf %35, %34 : vector<2x192xf32>
    %37 = arith.divf %35, %36 : vector<2x192xf32>
    %38 = vector.extract_strided_slice %15 {offsets = [0, 192], sizes = [2, 64], strides = [1, 1]} : vector<2x256xf32> to vector<2x64xf32>
    %39 = math.tanh %38 : vector<2x64xf32>
    %40 = vector.extract_strided_slice %37 {offsets = [0, 0], sizes = [2, 64], strides = [1, 1]} : vector<2x192xf32> to vector<2x64xf32>
    %41 = vector.extract_strided_slice %37 {offsets = [0, 64], sizes = [2, 64], strides = [1, 1]} : vector<2x192xf32> to vector<2x64xf32>
    %42 = vector.extract_strided_slice %37 {offsets = [0, 128], sizes = [2, 64], strides = [1, 1]} : vector<2x192xf32> to vector<2x64xf32>
    %43 = arith.mulf %41, %9 : vector<2x64xf32>
    %44 = arith.mulf %40, %39 : vector<2x64xf32>
    %45 = arith.addf %43, %44 : vector<2x64xf32>
    %46 = math.tanh %45 : vector<2x64xf32>
    %47 = arith.mulf %42, %46 : vector<2x64xf32>
    %c0_18 = arith.constant 0 : index
    %c0_19 = arith.constant 0 : index
    %48 = vector.load %arg19[%c0_18, %c0_19] : memref<16x128xf32, #tpu.memory_space<vmem>>, vector<2x64xf32>
    tpu.vector_store %arg19[%c0_18, %c0_19], %31 {strides = array<i32>} : memref<16x128xf32, #tpu.memory_space<vmem>>, vector<2x64xf32>,
    %c14_20 = arith.constant 14 : index
    %c64 = arith.constant 64 : index
    %49 = vector.load %arg19[%c14_20, %c64] : memref<16x128xf32, #tpu.memory_space<vmem>>, vector<2x64xf32>
    tpu.vector_store %arg19[%c14_20, %c64], %47 {strides = array<i32>} : memref<16x128xf32, #tpu.memory_space<vmem>>, vector<2x64xf32>,
    %c2 = arith.constant 2 : index
    %c0_21 = arith.constant 0 : index
    %50 = vector.load %arg18[%c2, %c0_21] : memref<16x512xf32, #tpu.memory_space<vmem>>, vector<2x256xf32>
    %cst_22 = arith.constant dense<0.000000e+00> : vector<2x256xf32>
    %51 = tpu.matmul %31, %7, %cst_22 {dimension_numbers = #tpu.dot_dimension_numbers<[1], [0], [0], [1], [0, 0, 1, 1], [], []>} : vector<2x64xf32>, vector<64x256xf32>, vector<2x256xf32> -> vector<2x256xf32>
    %52 = arith.addf %50, %51 : vector<2x256xf32>
    %c12 = arith.constant 12 : index
    %c256_23 = arith.constant 256 : index
    %53 = vector.load %arg18[%c12, %c256_23] : memref<16x512xf32, #tpu.memory_space<vmem>>, vector<2x256xf32>
    %cst_24 = arith.constant dense<0.000000e+00> : vector<2x256xf32>
    %54 = tpu.matmul %47, %8, %cst_24 {dimension_numbers = #tpu.dot_dimension_numbers<[1], [0], [0], [1], [0, 0, 1, 1], [], []>} : vector<2x64xf32>, vector<64x256xf32>, vector<2x256xf32> -> vector<2x256xf32>
    %55 = arith.addf %53, %54 : vector<2x256xf32>
    %56 = vector.extract_strided_slice %52 {offsets = [0, 0], sizes = [2, 192], strides = [1, 1]} : vector<2x256xf32> to vector<2x192xf32>
    %57 = arith.negf %56 : vector<2x192xf32>
    %58 = math.exp %57 : vector<2x192xf32>
    %cst_25 = arith.constant 1.000000e+00 : f32
    %59 = vector.broadcast %cst_25 : f32 to vector<2x192xf32>
    %60 = arith.addf %59, %58 : vector<2x192xf32>
    %61 = arith.divf %59, %60 : vector<2x192xf32>
    %62 = vector.extract_strided_slice %52 {offsets = [0, 192], sizes = [2, 64], strides = [1, 1]} : vector<2x256xf32> to vector<2x64xf32>
    %63 = math.tanh %62 : vector<2x64xf32>
    %64 = vector.extract_strided_slice %61 {offsets = [0, 0], sizes = [2, 64], strides = [1, 1]} : vector<2x192xf32> to vector<2x64xf32>
    %65 = vector.extract_strided_slice %61 {offsets = [0, 64], sizes = [2, 64], strides = [1, 1]} : vector<2x192xf32> to vector<2x64xf32>
    %66 = vector.extract_strided_slice %61 {offsets = [0, 128], sizes = [2, 64], strides = [1, 1]} : vector<2x192xf32> to vector<2x64xf32>
    %67 = arith.mulf %65, %29 : vector<2x64xf32>
    %68 = arith.mulf %64, %63 : vector<2x64xf32>
    %69 = arith.addf %67, %68 : vector<2x64xf32>
    %70 = math.tanh %69 : vector<2x64xf32>
    %71 = arith.mulf %66, %70 : vector<2x64xf32>
    %72 = vector.extract_strided_slice %55 {offsets = [0, 0], sizes = [2, 192], strides = [1, 1]} : vector<2x256xf32> to vector<2x192xf32>
    %73 = arith.negf %72 : vector<2x192xf32>
    %74 = math.exp %73 : vector<2x192xf32>
    %cst_26 = arith.constant 1.000000e+00 : f32
    %75 = vector.broadcast %cst_26 : f32 to vector<2x192xf32>
    %76 = arith.addf %75, %74 : vector<2x192xf32>
    %77 = arith.divf %75, %76 : vector<2x192xf32>
    %78 = vector.extract_strided_slice %55 {offsets = [0, 192], sizes = [2, 64], strides = [1, 1]} : vector<2x256xf32> to vector<2x64xf32>
    %79 = math.tanh %78 : vector<2x64xf32>
    %80 = vector.extract_strided_slice %77 {offsets = [0, 0], sizes = [2, 64], strides = [1, 1]} : vector<2x192xf32> to vector<2x64xf32>
    %81 = vector.extract_strided_slice %77 {offsets = [0, 64], sizes = [2, 64], strides = [1, 1]} : vector<2x192xf32> to vector<2x64xf32>
    %82 = vector.extract_strided_slice %77 {offsets = [0, 128], sizes = [2, 64], strides = [1, 1]} : vector<2x192xf32> to vector<2x64xf32>
    %83 = arith.mulf %81, %45 : vector<2x64xf32>
    %84 = arith.mulf %80, %79 : vector<2x64xf32>
    %85 = arith.addf %83, %84 : vector<2x64xf32>
    %86 = math.tanh %85 : vector<2x64xf32>
    %87 = arith.mulf %82, %86 : vector<2x64xf32>
    %c2_27 = arith.constant 2 : index
    %c0_28 = arith.constant 0 : index
    %88 = vector.load %arg19[%c2_27, %c0_28] : memref<16x128xf32, #tpu.memory_space<vmem>>, vector<2x64xf32>
    tpu.vector_store %arg19[%c2_27, %c0_28], %71 {strides = array<i32>} : memref<16x128xf32, #tpu.memory_space<vmem>>, vector<2x64xf32>,
    %c12_29 = arith.constant 12 : index
    %c64_30 = arith.constant 64 : index
    %89 = vector.load %arg19[%c12_29, %c64_30] : memref<16x128xf32, #tpu.memory_space<vmem>>, vector<2x64xf32>
    tpu.vector_store %arg19[%c12_29, %c64_30], %87 {strides = array<i32>} : memref<16x128xf32, #tpu.memory_space<vmem>>, vector<2x64xf32>,
    %c4 = arith.constant 4 : index
    %c0_31 = arith.constant 0 : index
    %90 = vector.load %arg18[%c4, %c0_31] : memref<16x512xf32, #tpu.memory_space<vmem>>, vector<2x256xf32>
    %cst_32 = arith.constant dense<0.000000e+00> : vector<2x256xf32>
    %91 = tpu.matmul %71, %7, %cst_32 {dimension_numbers = #tpu.dot_dimension_numbers<[1], [0], [0], [1], [0, 0, 1, 1], [], []>} : vector<2x64xf32>, vector<64x256xf32>, vector<2x256xf32> -> vector<2x256xf32>
    %92 = arith.addf %90, %91 : vector<2x256xf32>
    %c10 = arith.constant 10 : index
    %c256_33 = arith.constant 256 : index
    %93 = vector.load %arg18[%c10, %c256_33] : memref<16x512xf32, #tpu.memory_space<vmem>>, vector<2x256xf32>
    %cst_34 = arith.constant dense<0.000000e+00> : vector<2x256xf32>
    %94 = tpu.matmul %87, %8, %cst_34 {dimension_numbers = #tpu.dot_dimension_numbers<[1], [0], [0], [1], [0, 0, 1, 1], [], []>} : vector<2x64xf32>, vector<64x256xf32>, vector<2x256xf32> -> vector<2x256xf32>
    %95 = arith.addf %93, %94 : vector<2x256xf32>
    %96 = vector.extract_strided_slice %92 {offsets = [0, 0], sizes = [2, 192], strides = [1, 1]} : vector<2x256xf32> to vector<2x192xf32>
    %97 = arith.negf %96 : vector<2x192xf32>
    %98 = math.exp %97 : vector<2x192xf32>
    %cst_35 = arith.constant 1.000000e+00 : f32
    %99 = vector.broadcast %cst_35 : f32 to vector<2x192xf32>
    %100 = arith.addf %99, %98 : vector<2x192xf32>
    %101 = arith.divf %99, %100 : vector<2x192xf32>
    %102 = vector.extract_strided_slice %92 {offsets = [0, 192], sizes = [2, 64], strides = [1, 1]} : vector<2x256xf32> to vector<2x64xf32>
    %103 = math.tanh %102 : vector<2x64xf32>
    %104 = vector.extract_strided_slice %101 {offsets = [0, 0], sizes = [2, 64], strides = [1, 1]} : vector<2x192xf32> to vector<2x64xf32>
    %105 = vector.extract_strided_slice %101 {offsets = [0, 64], sizes = [2, 64], strides = [1, 1]} : vector<2x192xf32> to vector<2x64xf32>
    %106 = vector.extract_strided_slice %101 {offsets = [0, 128], sizes = [2, 64], strides = [1, 1]} : vector<2x192xf32> to vector<2x64xf32>
    %107 = arith.mulf %105, %69 : vector<2x64xf32>
    %108 = arith.mulf %104, %103 : vector<2x64xf32>
    %109 = arith.addf %107, %108 : vector<2x64xf32>
    %110 = math.tanh %109 : vector<2x64xf32>
    %111 = arith.mulf %106, %110 : vector<2x64xf32>
    %112 = vector.extract_strided_slice %95 {offsets = [0, 0], sizes = [2, 192], strides = [1, 1]} : vector<2x256xf32> to vector<2x192xf32>
    %113 = arith.negf %112 : vector<2x192xf32>
    %114 = math.exp %113 : vector<2x192xf32>
    %cst_36 = arith.constant 1.000000e+00 : f32
    %115 = vector.broadcast %cst_36 : f32 to vector<2x192xf32>
    %116 = arith.addf %115, %114 : vector<2x192xf32>
    %117 = arith.divf %115, %116 : vector<2x192xf32>
    %118 = vector.extract_strided_slice %95 {offsets = [0, 192], sizes = [2, 64], strides = [1, 1]} : vector<2x256xf32> to vector<2x64xf32>
    %119 = math.tanh %118 : vector<2x64xf32>
    %120 = vector.extract_strided_slice %117 {offsets = [0, 0], sizes = [2, 64], strides = [1, 1]} : vector<2x192xf32> to vector<2x64xf32>
    %121 = vector.extract_strided_slice %117 {offsets = [0, 64], sizes = [2, 64], strides = [1, 1]} : vector<2x192xf32> to vector<2x64xf32>
    %122 = vector.extract_strided_slice %117 {offsets = [0, 128], sizes = [2, 64], strides = [1, 1]} : vector<2x192xf32> to vector<2x64xf32>
    %123 = arith.mulf %121, %85 : vector<2x64xf32>
    %124 = arith.mulf %120, %119 : vector<2x64xf32>
    %125 = arith.addf %123, %124 : vector<2x64xf32>
    %126 = math.tanh %125 : vector<2x64xf32>
    %127 = arith.mulf %122, %126 : vector<2x64xf32>
    %c4_37 = arith.constant 4 : index
    %c0_38 = arith.constant 0 : index
    %128 = vector.load %arg19[%c4_37, %c0_38] : memref<16x128xf32, #tpu.memory_space<vmem>>, vector<2x64xf32>
    tpu.vector_store %arg19[%c4_37, %c0_38], %111 {strides = array<i32>} : memref<16x128xf32, #tpu.memory_space<vmem>>, vector<2x64xf32>,
    %c10_39 = arith.constant 10 : index
    %c64_40 = arith.constant 64 : index
    %129 = vector.load %arg19[%c10_39, %c64_40] : memref<16x128xf32, #tpu.memory_space<vmem>>, vector<2x64xf32>
    tpu.vector_store %arg19[%c10_39, %c64_40], %127 {strides = array<i32>} : memref<16x128xf32, #tpu.memory_space<vmem>>, vector<2x64xf32>,
    %c6 = arith.constant 6 : index
    %c0_41 = arith.constant 0 : index
    %130 = vector.load %arg18[%c6, %c0_41] : memref<16x512xf32, #tpu.memory_space<vmem>>, vector<2x256xf32>
    %cst_42 = arith.constant dense<0.000000e+00> : vector<2x256xf32>
    %131 = tpu.matmul %111, %7, %cst_42 {dimension_numbers = #tpu.dot_dimension_numbers<[1], [0], [0], [1], [0, 0, 1, 1], [], []>} : vector<2x64xf32>, vector<64x256xf32>, vector<2x256xf32> -> vector<2x256xf32>
    %132 = arith.addf %130, %131 : vector<2x256xf32>
    %c8 = arith.constant 8 : index
    %c256_43 = arith.constant 256 : index
    %133 = vector.load %arg18[%c8, %c256_43] : memref<16x512xf32, #tpu.memory_space<vmem>>, vector<2x256xf32>
    %cst_44 = arith.constant dense<0.000000e+00> : vector<2x256xf32>
    %134 = tpu.matmul %127, %8, %cst_44 {dimension_numbers = #tpu.dot_dimension_numbers<[1], [0], [0], [1], [0, 0, 1, 1], [], []>} : vector<2x64xf32>, vector<64x256xf32>, vector<2x256xf32> -> vector<2x256xf32>
    %135 = arith.addf %133, %134 : vector<2x256xf32>
    %136 = vector.extract_strided_slice %132 {offsets = [0, 0], sizes = [2, 192], strides = [1, 1]} : vector<2x256xf32> to vector<2x192xf32>
    %137 = arith.negf %136 : vector<2x192xf32>
    %138 = math.exp %137 : vector<2x192xf32>
    %cst_45 = arith.constant 1.000000e+00 : f32
    %139 = vector.broadcast %cst_45 : f32 to vector<2x192xf32>
    %140 = arith.addf %139, %138 : vector<2x192xf32>
    %141 = arith.divf %139, %140 : vector<2x192xf32>
    %142 = vector.extract_strided_slice %132 {offsets = [0, 192], sizes = [2, 64], strides = [1, 1]} : vector<2x256xf32> to vector<2x64xf32>
    %143 = math.tanh %142 : vector<2x64xf32>
    %144 = vector.extract_strided_slice %141 {offsets = [0, 0], sizes = [2, 64], strides = [1, 1]} : vector<2x192xf32> to vector<2x64xf32>
    %145 = vector.extract_strided_slice %141 {offsets = [0, 64], sizes = [2, 64], strides = [1, 1]} : vector<2x192xf32> to vector<2x64xf32>
    %146 = vector.extract_strided_slice %141 {offsets = [0, 128], sizes = [2, 64], strides = [1, 1]} : vector<2x192xf32> to vector<2x64xf32>
    %147 = arith.mulf %145, %109 : vector<2x64xf32>
    %148 = arith.mulf %144, %143 : vector<2x64xf32>
    %149 = arith.addf %147, %148 : vector<2x64xf32>
    %150 = math.tanh %149 : vector<2x64xf32>
    %151 = arith.mulf %146, %150 : vector<2x64xf32>
    %152 = vector.extract_strided_slice %135 {offsets = [0, 0], sizes = [2, 192], strides = [1, 1]} : vector<2x256xf32> to vector<2x192xf32>
    %153 = arith.negf %152 : vector<2x192xf32>
    %154 = math.exp %153 : vector<2x192xf32>
    %cst_46 = arith.constant 1.000000e+00 : f32
    %155 = vector.broadcast %cst_46 : f32 to vector<2x192xf32>
    %156 = arith.addf %155, %154 : vector<2x192xf32>
    %157 = arith.divf %155, %156 : vector<2x192xf32>
    %158 = vector.extract_strided_slice %135 {offsets = [0, 192], sizes = [2, 64], strides = [1, 1]} : vector<2x256xf32> to vector<2x64xf32>
    %159 = math.tanh %158 : vector<2x64xf32>
    %160 = vector.extract_strided_slice %157 {offsets = [0, 0], sizes = [2, 64], strides = [1, 1]} : vector<2x192xf32> to vector<2x64xf32>
    %161 = vector.extract_strided_slice %157 {offsets = [0, 64], sizes = [2, 64], strides = [1, 1]} : vector<2x192xf32> to vector<2x64xf32>
    %162 = vector.extract_strided_slice %157 {offsets = [0, 128], sizes = [2, 64], strides = [1, 1]} : vector<2x192xf32> to vector<2x64xf32>
    %163 = arith.mulf %161, %125 : vector<2x64xf32>
    %164 = arith.mulf %160, %159 : vector<2x64xf32>
    %165 = arith.addf %163, %164 : vector<2x64xf32>
    %166 = math.tanh %165 : vector<2x64xf32>
    %167 = arith.mulf %162, %166 : vector<2x64xf32>
    %c6_47 = arith.constant 6 : index
    %c0_48 = arith.constant 0 : index
    %168 = vector.load %arg19[%c6_47, %c0_48] : memref<16x128xf32, #tpu.memory_space<vmem>>, vector<2x64xf32>
    tpu.vector_store %arg19[%c6_47, %c0_48], %151 {strides = array<i32>} : memref<16x128xf32, #tpu.memory_space<vmem>>, vector<2x64xf32>,
    %c8_49 = arith.constant 8 : index
    %c64_50 = arith.constant 64 : index
    %169 = vector.load %arg19[%c8_49, %c64_50] : memref<16x128xf32, #tpu.memory_space<vmem>>, vector<2x64xf32>
    tpu.vector_store %arg19[%c8_49, %c64_50], %167 {strides = array<i32>} : memref<16x128xf32, #tpu.memory_space<vmem>>, vector<2x64xf32>,
    %c8_51 = arith.constant 8 : index
    %c0_52 = arith.constant 0 : index
    %170 = vector.load %arg18[%c8_51, %c0_52] : memref<16x512xf32, #tpu.memory_space<vmem>>, vector<2x256xf32>
    %cst_53 = arith.constant dense<0.000000e+00> : vector<2x256xf32>
    %171 = tpu.matmul %151, %7, %cst_53 {dimension_numbers = #tpu.dot_dimension_numbers<[1], [0], [0], [1], [0, 0, 1, 1], [], []>} : vector<2x64xf32>, vector<64x256xf32>, vector<2x256xf32> -> vector<2x256xf32>
    %172 = arith.addf %170, %171 : vector<2x256xf32>
    %c6_54 = arith.constant 6 : index
    %c256_55 = arith.constant 256 : index
    %173 = vector.load %arg18[%c6_54, %c256_55] : memref<16x512xf32, #tpu.memory_space<vmem>>, vector<2x256xf32>
    %cst_56 = arith.constant dense<0.000000e+00> : vector<2x256xf32>
    %174 = tpu.matmul %167, %8, %cst_56 {dimension_numbers = #tpu.dot_dimension_numbers<[1], [0], [0], [1], [0, 0, 1, 1], [], []>} : vector<2x64xf32>, vector<64x256xf32>, vector<2x256xf32> -> vector<2x256xf32>
    %175 = arith.addf %173, %174 : vector<2x256xf32>
    %176 = vector.extract_strided_slice %172 {offsets = [0, 0], sizes = [2, 192], strides = [1, 1]} : vector<2x256xf32> to vector<2x192xf32>
    %177 = arith.negf %176 : vector<2x192xf32>
    %178 = math.exp %177 : vector<2x192xf32>
    %cst_57 = arith.constant 1.000000e+00 : f32
    %179 = vector.broadcast %cst_57 : f32 to vector<2x192xf32>
    %180 = arith.addf %179, %178 : vector<2x192xf32>
    %181 = arith.divf %179, %180 : vector<2x192xf32>
    %182 = vector.extract_strided_slice %172 {offsets = [0, 192], sizes = [2, 64], strides = [1, 1]} : vector<2x256xf32> to vector<2x64xf32>
    %183 = math.tanh %182 : vector<2x64xf32>
    %184 = vector.extract_strided_slice %181 {offsets = [0, 0], sizes = [2, 64], strides = [1, 1]} : vector<2x192xf32> to vector<2x64xf32>
    %185 = vector.extract_strided_slice %181 {offsets = [0, 64], sizes = [2, 64], strides = [1, 1]} : vector<2x192xf32> to vector<2x64xf32>
    %186 = vector.extract_strided_slice %181 {offsets = [0, 128], sizes = [2, 64], strides = [1, 1]} : vector<2x192xf32> to vector<2x64xf32>
    %187 = arith.mulf %185, %149 : vector<2x64xf32>
    %188 = arith.mulf %184, %183 : vector<2x64xf32>
    %189 = arith.addf %187, %188 : vector<2x64xf32>
    %190 = math.tanh %189 : vector<2x64xf32>
    %191 = arith.mulf %186, %190 : vector<2x64xf32>
    %192 = vector.extract_strided_slice %175 {offsets = [0, 0], sizes = [2, 192], strides = [1, 1]} : vector<2x256xf32> to vector<2x192xf32>
    %193 = arith.negf %192 : vector<2x192xf32>
    %194 = math.exp %193 : vector<2x192xf32>
    %cst_58 = arith.constant 1.000000e+00 : f32
    %195 = vector.broadcast %cst_58 : f32 to vector<2x192xf32>
    %196 = arith.addf %195, %194 : vector<2x192xf32>
    %197 = arith.divf %195, %196 : vector<2x192xf32>
    %198 = vector.extract_strided_slice %175 {offsets = [0, 192], sizes = [2, 64], strides = [1, 1]} : vector<2x256xf32> to vector<2x64xf32>
    %199 = math.tanh %198 : vector<2x64xf32>
    %200 = vector.extract_strided_slice %197 {offsets = [0, 0], sizes = [2, 64], strides = [1, 1]} : vector<2x192xf32> to vector<2x64xf32>
    %201 = vector.extract_strided_slice %197 {offsets = [0, 64], sizes = [2, 64], strides = [1, 1]} : vector<2x192xf32> to vector<2x64xf32>
    %202 = vector.extract_strided_slice %197 {offsets = [0, 128], sizes = [2, 64], strides = [1, 1]} : vector<2x192xf32> to vector<2x64xf32>
    %203 = arith.mulf %201, %165 : vector<2x64xf32>
    %204 = arith.mulf %200, %199 : vector<2x64xf32>
    %205 = arith.addf %203, %204 : vector<2x64xf32>
    %206 = math.tanh %205 : vector<2x64xf32>
    %207 = arith.mulf %202, %206 : vector<2x64xf32>
    %c8_59 = arith.constant 8 : index
    %c0_60 = arith.constant 0 : index
    %208 = vector.load %arg19[%c8_59, %c0_60] : memref<16x128xf32, #tpu.memory_space<vmem>>, vector<2x64xf32>
    tpu.vector_store %arg19[%c8_59, %c0_60], %191 {strides = array<i32>} : memref<16x128xf32, #tpu.memory_space<vmem>>, vector<2x64xf32>,
    %c6_61 = arith.constant 6 : index
    %c64_62 = arith.constant 64 : index
    %209 = vector.load %arg19[%c6_61, %c64_62] : memref<16x128xf32, #tpu.memory_space<vmem>>, vector<2x64xf32>
    tpu.vector_store %arg19[%c6_61, %c64_62], %207 {strides = array<i32>} : memref<16x128xf32, #tpu.memory_space<vmem>>, vector<2x64xf32>,
    %c10_63 = arith.constant 10 : index
    %c0_64 = arith.constant 0 : index
    %210 = vector.load %arg18[%c10_63, %c0_64] : memref<16x512xf32, #tpu.memory_space<vmem>>, vector<2x256xf32>
    %cst_65 = arith.constant dense<0.000000e+00> : vector<2x256xf32>
    %211 = tpu.matmul %191, %7, %cst_65 {dimension_numbers = #tpu.dot_dimension_numbers<[1], [0], [0], [1], [0, 0, 1, 1], [], []>} : vector<2x64xf32>, vector<64x256xf32>, vector<2x256xf32> -> vector<2x256xf32>
    %212 = arith.addf %210, %211 : vector<2x256xf32>
    %c4_66 = arith.constant 4 : index
    %c256_67 = arith.constant 256 : index
    %213 = vector.load %arg18[%c4_66, %c256_67] : memref<16x512xf32, #tpu.memory_space<vmem>>, vector<2x256xf32>
    %cst_68 = arith.constant dense<0.000000e+00> : vector<2x256xf32>
    %214 = tpu.matmul %207, %8, %cst_68 {dimension_numbers = #tpu.dot_dimension_numbers<[1], [0], [0], [1], [0, 0, 1, 1], [], []>} : vector<2x64xf32>, vector<64x256xf32>, vector<2x256xf32> -> vector<2x256xf32>
    %215 = arith.addf %213, %214 : vector<2x256xf32>
    %216 = vector.extract_strided_slice %212 {offsets = [0, 0], sizes = [2, 192], strides = [1, 1]} : vector<2x256xf32> to vector<2x192xf32>
    %217 = arith.negf %216 : vector<2x192xf32>
    %218 = math.exp %217 : vector<2x192xf32>
    %cst_69 = arith.constant 1.000000e+00 : f32
    %219 = vector.broadcast %cst_69 : f32 to vector<2x192xf32>
    %220 = arith.addf %219, %218 : vector<2x192xf32>
    %221 = arith.divf %219, %220 : vector<2x192xf32>
    %222 = vector.extract_strided_slice %212 {offsets = [0, 192], sizes = [2, 64], strides = [1, 1]} : vector<2x256xf32> to vector<2x64xf32>
    %223 = math.tanh %222 : vector<2x64xf32>
    %224 = vector.extract_strided_slice %221 {offsets = [0, 0], sizes = [2, 64], strides = [1, 1]} : vector<2x192xf32> to vector<2x64xf32>
    %225 = vector.extract_strided_slice %221 {offsets = [0, 64], sizes = [2, 64], strides = [1, 1]} : vector<2x192xf32> to vector<2x64xf32>
    %226 = vector.extract_strided_slice %221 {offsets = [0, 128], sizes = [2, 64], strides = [1, 1]} : vector<2x192xf32> to vector<2x64xf32>
    %227 = arith.mulf %225, %189 : vector<2x64xf32>
    %228 = arith.mulf %224, %223 : vector<2x64xf32>
    %229 = arith.addf %227, %228 : vector<2x64xf32>
    %230 = math.tanh %229 : vector<2x64xf32>
    %231 = arith.mulf %226, %230 : vector<2x64xf32>
    %232 = vector.extract_strided_slice %215 {offsets = [0, 0], sizes = [2, 192], strides = [1, 1]} : vector<2x256xf32> to vector<2x192xf32>
    %233 = arith.negf %232 : vector<2x192xf32>
    %234 = math.exp %233 : vector<2x192xf32>
    %cst_70 = arith.constant 1.000000e+00 : f32
    %235 = vector.broadcast %cst_70 : f32 to vector<2x192xf32>
    %236 = arith.addf %235, %234 : vector<2x192xf32>
    %237 = arith.divf %235, %236 : vector<2x192xf32>
    %238 = vector.extract_strided_slice %215 {offsets = [0, 192], sizes = [2, 64], strides = [1, 1]} : vector<2x256xf32> to vector<2x64xf32>
    %239 = math.tanh %238 : vector<2x64xf32>
    %240 = vector.extract_strided_slice %237 {offsets = [0, 0], sizes = [2, 64], strides = [1, 1]} : vector<2x192xf32> to vector<2x64xf32>
    %241 = vector.extract_strided_slice %237 {offsets = [0, 64], sizes = [2, 64], strides = [1, 1]} : vector<2x192xf32> to vector<2x64xf32>
    %242 = vector.extract_strided_slice %237 {offsets = [0, 128], sizes = [2, 64], strides = [1, 1]} : vector<2x192xf32> to vector<2x64xf32>
    %243 = arith.mulf %241, %205 : vector<2x64xf32>
    %244 = arith.mulf %240, %239 : vector<2x64xf32>
    %245 = arith.addf %243, %244 : vector<2x64xf32>
    %246 = math.tanh %245 : vector<2x64xf32>
    %247 = arith.mulf %242, %246 : vector<2x64xf32>
    %c10_71 = arith.constant 10 : index
    %c0_72 = arith.constant 0 : index
    %248 = vector.load %arg19[%c10_71, %c0_72] : memref<16x128xf32, #tpu.memory_space<vmem>>, vector<2x64xf32>
    tpu.vector_store %arg19[%c10_71, %c0_72], %231 {strides = array<i32>} : memref<16x128xf32, #tpu.memory_space<vmem>>, vector<2x64xf32>,
    %c4_73 = arith.constant 4 : index
    %c64_74 = arith.constant 64 : index
    %249 = vector.load %arg19[%c4_73, %c64_74] : memref<16x128xf32, #tpu.memory_space<vmem>>, vector<2x64xf32>
    tpu.vector_store %arg19[%c4_73, %c64_74], %247 {strides = array<i32>} : memref<16x128xf32, #tpu.memory_space<vmem>>, vector<2x64xf32>,
    %c12_75 = arith.constant 12 : index
    %c0_76 = arith.constant 0 : index
    %250 = vector.load %arg18[%c12_75, %c0_76] : memref<16x512xf32, #tpu.memory_space<vmem>>, vector<2x256xf32>
    %cst_77 = arith.constant dense<0.000000e+00> : vector<2x256xf32>
    %251 = tpu.matmul %231, %7, %cst_77 {dimension_numbers = #tpu.dot_dimension_numbers<[1], [0], [0], [1], [0, 0, 1, 1], [], []>} : vector<2x64xf32>, vector<64x256xf32>, vector<2x256xf32> -> vector<2x256xf32>
    %252 = arith.addf %250, %251 : vector<2x256xf32>
    %c2_78 = arith.constant 2 : index
    %c256_79 = arith.constant 256 : index
    %253 = vector.load %arg18[%c2_78, %c256_79] : memref<16x512xf32, #tpu.memory_space<vmem>>, vector<2x256xf32>
    %cst_80 = arith.constant dense<0.000000e+00> : vector<2x256xf32>
    %254 = tpu.matmul %247, %8, %cst_80 {dimension_numbers = #tpu.dot_dimension_numbers<[1], [0], [0], [1], [0, 0, 1, 1], [], []>} : vector<2x64xf32>, vector<64x256xf32>, vector<2x256xf32> -> vector<2x256xf32>
    %255 = arith.addf %253, %254 : vector<2x256xf32>
    %256 = vector.extract_strided_slice %252 {offsets = [0, 0], sizes = [2, 192], strides = [1, 1]} : vector<2x256xf32> to vector<2x192xf32>
    %257 = arith.negf %256 : vector<2x192xf32>
    %258 = math.exp %257 : vector<2x192xf32>
    %cst_81 = arith.constant 1.000000e+00 : f32
    %259 = vector.broadcast %cst_81 : f32 to vector<2x192xf32>
    %260 = arith.addf %259, %258 : vector<2x192xf32>
    %261 = arith.divf %259, %260 : vector<2x192xf32>
    %262 = vector.extract_strided_slice %252 {offsets = [0, 192], sizes = [2, 64], strides = [1, 1]} : vector<2x256xf32> to vector<2x64xf32>
    %263 = math.tanh %262 : vector<2x64xf32>
    %264 = vector.extract_strided_slice %261 {offsets = [0, 0], sizes = [2, 64], strides = [1, 1]} : vector<2x192xf32> to vector<2x64xf32>
    %265 = vector.extract_strided_slice %261 {offsets = [0, 64], sizes = [2, 64], strides = [1, 1]} : vector<2x192xf32> to vector<2x64xf32>
    %266 = vector.extract_strided_slice %261 {offsets = [0, 128], sizes = [2, 64], strides = [1, 1]} : vector<2x192xf32> to vector<2x64xf32>
    %267 = arith.mulf %265, %229 : vector<2x64xf32>
    %268 = arith.mulf %264, %263 : vector<2x64xf32>
    %269 = arith.addf %267, %268 : vector<2x64xf32>
    %270 = math.tanh %269 : vector<2x64xf32>
    %271 = arith.mulf %266, %270 : vector<2x64xf32>
    %272 = vector.extract_strided_slice %255 {offsets = [0, 0], sizes = [2, 192], strides = [1, 1]} : vector<2x256xf32> to vector<2x192xf32>
    %273 = arith.negf %272 : vector<2x192xf32>
    %274 = math.exp %273 : vector<2x192xf32>
    %cst_82 = arith.constant 1.000000e+00 : f32
    %275 = vector.broadcast %cst_82 : f32 to vector<2x192xf32>
    %276 = arith.addf %275, %274 : vector<2x192xf32>
    %277 = arith.divf %275, %276 : vector<2x192xf32>
    %278 = vector.extract_strided_slice %255 {offsets = [0, 192], sizes = [2, 64], strides = [1, 1]} : vector<2x256xf32> to vector<2x64xf32>
    %279 = math.tanh %278 : vector<2x64xf32>
    %280 = vector.extract_strided_slice %277 {offsets = [0, 0], sizes = [2, 64], strides = [1, 1]} : vector<2x192xf32> to vector<2x64xf32>
    %281 = vector.extract_strided_slice %277 {offsets = [0, 64], sizes = [2, 64], strides = [1, 1]} : vector<2x192xf32> to vector<2x64xf32>
    %282 = vector.extract_strided_slice %277 {offsets = [0, 128], sizes = [2, 64], strides = [1, 1]} : vector<2x192xf32> to vector<2x64xf32>
    %283 = arith.mulf %281, %245 : vector<2x64xf32>
    %284 = arith.mulf %280, %279 : vector<2x64xf32>
    %285 = arith.addf %283, %284 : vector<2x64xf32>
    %286 = math.tanh %285 : vector<2x64xf32>
    %287 = arith.mulf %282, %286 : vector<2x64xf32>
    %c12_83 = arith.constant 12 : index
    %c0_84 = arith.constant 0 : index
    %288 = vector.load %arg19[%c12_83, %c0_84] : memref<16x128xf32, #tpu.memory_space<vmem>>, vector<2x64xf32>
    tpu.vector_store %arg19[%c12_83, %c0_84], %271 {strides = array<i32>} : memref<16x128xf32, #tpu.memory_space<vmem>>, vector<2x64xf32>,
    %c2_85 = arith.constant 2 : index
    %c64_86 = arith.constant 64 : index
    %289 = vector.load %arg19[%c2_85, %c64_86] : memref<16x128xf32, #tpu.memory_space<vmem>>, vector<2x64xf32>
    tpu.vector_store %arg19[%c2_85, %c64_86], %287 {strides = array<i32>} : memref<16x128xf32, #tpu.memory_space<vmem>>, vector<2x64xf32>,
    %c14_87 = arith.constant 14 : index
    %c0_88 = arith.constant 0 : index
    %290 = vector.load %arg18[%c14_87, %c0_88] : memref<16x512xf32, #tpu.memory_space<vmem>>, vector<2x256xf32>
    %cst_89 = arith.constant dense<0.000000e+00> : vector<2x256xf32>
    %291 = tpu.matmul %271, %7, %cst_89 {dimension_numbers = #tpu.dot_dimension_numbers<[1], [0], [0], [1], [0, 0, 1, 1], [], []>} : vector<2x64xf32>, vector<64x256xf32>, vector<2x256xf32> -> vector<2x256xf32>
    %292 = arith.addf %290, %291 : vector<2x256xf32>
    %c0_90 = arith.constant 0 : index
    %c256_91 = arith.constant 256 : index
    %293 = vector.load %arg18[%c0_90, %c256_91] : memref<16x512xf32, #tpu.memory_space<vmem>>, vector<2x256xf32>
    %cst_92 = arith.constant dense<0.000000e+00> : vector<2x256xf32>
    %294 = tpu.matmul %287, %8, %cst_92 {dimension_numbers = #tpu.dot_dimension_numbers<[1], [0], [0], [1], [0, 0, 1, 1], [], []>} : vector<2x64xf32>, vector<64x256xf32>, vector<2x256xf32> -> vector<2x256xf32>
    %295 = arith.addf %293, %294 : vector<2x256xf32>
    %296 = vector.extract_strided_slice %292 {offsets = [0, 0], sizes = [2, 192], strides = [1, 1]} : vector<2x256xf32> to vector<2x192xf32>
    %297 = arith.negf %296 : vector<2x192xf32>
    %298 = math.exp %297 : vector<2x192xf32>
    %cst_93 = arith.constant 1.000000e+00 : f32
    %299 = vector.broadcast %cst_93 : f32 to vector<2x192xf32>
    %300 = arith.addf %299, %298 : vector<2x192xf32>
    %301 = arith.divf %299, %300 : vector<2x192xf32>
    %302 = vector.extract_strided_slice %292 {offsets = [0, 192], sizes = [2, 64], strides = [1, 1]} : vector<2x256xf32> to vector<2x64xf32>
    %303 = math.tanh %302 : vector<2x64xf32>
    %304 = vector.extract_strided_slice %301 {offsets = [0, 0], sizes = [2, 64], strides = [1, 1]} : vector<2x192xf32> to vector<2x64xf32>
    %305 = vector.extract_strided_slice %301 {offsets = [0, 64], sizes = [2, 64], strides = [1, 1]} : vector<2x192xf32> to vector<2x64xf32>
    %306 = vector.extract_strided_slice %301 {offsets = [0, 128], sizes = [2, 64], strides = [1, 1]} : vector<2x192xf32> to vector<2x64xf32>
    %307 = arith.mulf %305, %269 : vector<2x64xf32>
    %308 = arith.mulf %304, %303 : vector<2x64xf32>
    %309 = arith.addf %307, %308 : vector<2x64xf32>
    %310 = math.tanh %309 : vector<2x64xf32>
    %311 = arith.mulf %306, %310 : vector<2x64xf32>
    %312 = vector.extract_strided_slice %295 {offsets = [0, 0], sizes = [2, 192], strides = [1, 1]} : vector<2x256xf32> to vector<2x192xf32>
    %313 = arith.negf %312 : vector<2x192xf32>
    %314 = math.exp %313 : vector<2x192xf32>
    %cst_94 = arith.constant 1.000000e+00 : f32
    %315 = vector.broadcast %cst_94 : f32 to vector<2x192xf32>
    %316 = arith.addf %315, %314 : vector<2x192xf32>
    %317 = arith.divf %315, %316 : vector<2x192xf32>
    %318 = vector.extract_strided_slice %295 {offsets = [0, 192], sizes = [2, 64], strides = [1, 1]} : vector<2x256xf32> to vector<2x64xf32>
    %319 = math.tanh %318 : vector<2x64xf32>
    %320 = vector.extract_strided_slice %317 {offsets = [0, 0], sizes = [2, 64], strides = [1, 1]} : vector<2x192xf32> to vector<2x64xf32>
    %321 = vector.extract_strided_slice %317 {offsets = [0, 64], sizes = [2, 64], strides = [1, 1]} : vector<2x192xf32> to vector<2x64xf32>
    %322 = vector.extract_strided_slice %317 {offsets = [0, 128], sizes = [2, 64], strides = [1, 1]} : vector<2x192xf32> to vector<2x64xf32>
    %323 = arith.mulf %321, %285 : vector<2x64xf32>
    %324 = arith.mulf %320, %319 : vector<2x64xf32>
    %325 = arith.addf %323, %324 : vector<2x64xf32>
    %326 = math.tanh %325 : vector<2x64xf32>
    %327 = arith.mulf %322, %326 : vector<2x64xf32>
    %c14_95 = arith.constant 14 : index
    %c0_96 = arith.constant 0 : index
    %328 = vector.load %arg19[%c14_95, %c0_96] : memref<16x128xf32, #tpu.memory_space<vmem>>, vector<2x64xf32>
    tpu.vector_store %arg19[%c14_95, %c0_96], %311 {strides = array<i32>} : memref<16x128xf32, #tpu.memory_space<vmem>>, vector<2x64xf32>,
    %c0_97 = arith.constant 0 : index
    %c64_98 = arith.constant 64 : index
    %329 = vector.load %arg19[%c0_97, %c64_98] : memref<16x128xf32, #tpu.memory_space<vmem>>, vector<2x64xf32>
    tpu.vector_store %arg19[%c0_97, %c64_98], %327 {strides = array<i32>} : memref<16x128xf32, #tpu.memory_space<vmem>>, vector<2x64xf32>,
    %c0_99 = arith.constant 0 : index
    %c0_100 = arith.constant 0 : index
    %330 = vector.load %arg19[%c0_99, %c0_100] : memref<16x128xf32, #tpu.memory_space<vmem>>, vector<16x128xf32>
    %c0_101 = arith.constant 0 : index
    %c0_102 = arith.constant 0 : index
    %331 = vector.load %arg5[%c0_101, %c0_102] : memref<128x256xf32, #tpu.memory_space<vmem>>, vector<128x256xf32>
    %cst_103 = arith.constant dense<0.000000e+00> : vector<16x256xf32>
    %332 = tpu.matmul %330, %331, %cst_103 {dimension_numbers = #tpu.dot_dimension_numbers<[1], [0], [0], [1], [0, 0, 1, 1], [], []>} : vector<16x128xf32>, vector<128x256xf32>, vector<16x256xf32> -> vector<16x256xf32>
    %c0_104 = arith.constant 0 : index
    %c0_105 = arith.constant 0 : index
    %333 = vector.load %arg7[%c0_104, %c0_105] : memref<1x256xf32, #tpu.memory_space<vmem>>, vector<1x256xf32>
    %334 = vector.broadcast %333 : vector<1x256xf32> to vector<16x256xf32>
    %335 = arith.addf %332, %334 : vector<16x256xf32>
    %c0_106 = arith.constant 0 : index
    %c0_107 = arith.constant 0 : index
    %336 = vector.load %arg20[%c0_106, %c0_107] : memref<16x256xf32, #tpu.memory_space<vmem>>, vector<16x256xf32>
    tpu.vector_store %arg20[%c0_106, %c0_107], %335 {strides = array<i32>} : memref<16x256xf32, #tpu.memory_space<vmem>>, vector<16x256xf32>,
    %c0_108 = arith.constant 0 : index
    %c0_109 = arith.constant 0 : index
    %337 = vector.load %arg6[%c0_108, %c0_109] : memref<64x256xf32, #tpu.memory_space<vmem>>, vector<64x256xf32>
    %c0_110 = arith.constant 0 : index
    %c0_111 = arith.constant 0 : index
    %338 = vector.load %arg20[%c0_110, %c0_111] : memref<16x256xf32, #tpu.memory_space<vmem>>, vector<2x256xf32>
    %cst_112 = arith.constant dense<0.000000e+00> : vector<2x256xf32>
    %339 = tpu.matmul %9, %337, %cst_112 {dimension_numbers = #tpu.dot_dimension_numbers<[1], [0], [0], [1], [0, 0, 1, 1], [], []>} : vector<2x64xf32>, vector<64x256xf32>, vector<2x256xf32> -> vector<2x256xf32>
    %340 = arith.addf %338, %339 : vector<2x256xf32>
    %341 = vector.extract_strided_slice %340 {offsets = [0, 0], sizes = [2, 192], strides = [1, 1]} : vector<2x256xf32> to vector<2x192xf32>
    %342 = arith.negf %341 : vector<2x192xf32>
    %343 = math.exp %342 : vector<2x192xf32>
    %cst_113 = arith.constant 1.000000e+00 : f32
    %344 = vector.broadcast %cst_113 : f32 to vector<2x192xf32>
    %345 = arith.addf %344, %343 : vector<2x192xf32>
    %346 = arith.divf %344, %345 : vector<2x192xf32>
    %347 = vector.extract_strided_slice %340 {offsets = [0, 192], sizes = [2, 64], strides = [1, 1]} : vector<2x256xf32> to vector<2x64xf32>
    %348 = math.tanh %347 : vector<2x64xf32>
    %349 = vector.extract_strided_slice %346 {offsets = [0, 0], sizes = [2, 64], strides = [1, 1]} : vector<2x192xf32> to vector<2x64xf32>
    %350 = vector.extract_strided_slice %346 {offsets = [0, 64], sizes = [2, 64], strides = [1, 1]} : vector<2x192xf32> to vector<2x64xf32>
    %351 = vector.extract_strided_slice %346 {offsets = [0, 128], sizes = [2, 64], strides = [1, 1]} : vector<2x192xf32> to vector<2x64xf32>
    %352 = arith.mulf %350, %9 : vector<2x64xf32>
    %353 = arith.mulf %349, %348 : vector<2x64xf32>
    %354 = arith.addf %352, %353 : vector<2x64xf32>
    %355 = math.tanh %354 : vector<2x64xf32>
    %356 = arith.mulf %351, %355 : vector<2x64xf32>
    %c2_114 = arith.constant 2 : index
    %c0_115 = arith.constant 0 : index
    %357 = vector.load %arg20[%c2_114, %c0_115] : memref<16x256xf32, #tpu.memory_space<vmem>>, vector<2x256xf32>
    %cst_116 = arith.constant dense<0.000000e+00> : vector<2x256xf32>
    %358 = tpu.matmul %356, %337, %cst_116 {dimension_numbers = #tpu.dot_dimension_numbers<[1], [0], [0], [1], [0, 0, 1, 1], [], []>} : vector<2x64xf32>, vector<64x256xf32>, vector<2x256xf32> -> vector<2x256xf32>
    %359 = arith.addf %357, %358 : vector<2x256xf32>
    %360 = vector.extract_strided_slice %359 {offsets = [0, 0], sizes = [2, 192], strides = [1, 1]} : vector<2x256xf32> to vector<2x192xf32>
    %361 = arith.negf %360 : vector<2x192xf32>
    %362 = math.exp %361 : vector<2x192xf32>
    %cst_117 = arith.constant 1.000000e+00 : f32
    %363 = vector.broadcast %cst_117 : f32 to vector<2x192xf32>
    %364 = arith.addf %363, %362 : vector<2x192xf32>
    %365 = arith.divf %363, %364 : vector<2x192xf32>
    %366 = vector.extract_strided_slice %359 {offsets = [0, 192], sizes = [2, 64], strides = [1, 1]} : vector<2x256xf32> to vector<2x64xf32>
    %367 = math.tanh %366 : vector<2x64xf32>
    %368 = vector.extract_strided_slice %365 {offsets = [0, 0], sizes = [2, 64], strides = [1, 1]} : vector<2x192xf32> to vector<2x64xf32>
    %369 = vector.extract_strided_slice %365 {offsets = [0, 64], sizes = [2, 64], strides = [1, 1]} : vector<2x192xf32> to vector<2x64xf32>
    %370 = vector.extract_strided_slice %365 {offsets = [0, 128], sizes = [2, 64], strides = [1, 1]} : vector<2x192xf32> to vector<2x64xf32>
    %371 = arith.mulf %369, %354 : vector<2x64xf32>
    %372 = arith.mulf %368, %367 : vector<2x64xf32>
    %373 = arith.addf %371, %372 : vector<2x64xf32>
    %374 = math.tanh %373 : vector<2x64xf32>
    %375 = arith.mulf %370, %374 : vector<2x64xf32>
    %c4_118 = arith.constant 4 : index
    %c0_119 = arith.constant 0 : index
    %376 = vector.load %arg20[%c4_118, %c0_119] : memref<16x256xf32, #tpu.memory_space<vmem>>, vector<2x256xf32>
    %cst_120 = arith.constant dense<0.000000e+00> : vector<2x256xf32>
    %377 = tpu.matmul %375, %337, %cst_120 {dimension_numbers = #tpu.dot_dimension_numbers<[1], [0], [0], [1], [0, 0, 1, 1], [], []>} : vector<2x64xf32>, vector<64x256xf32>, vector<2x256xf32> -> vector<2x256xf32>
    %378 = arith.addf %376, %377 : vector<2x256xf32>
    %379 = vector.extract_strided_slice %378 {offsets = [0, 0], sizes = [2, 192], strides = [1, 1]} : vector<2x256xf32> to vector<2x192xf32>
    %380 = arith.negf %379 : vector<2x192xf32>
    %381 = math.exp %380 : vector<2x192xf32>
    %cst_121 = arith.constant 1.000000e+00 : f32
    %382 = vector.broadcast %cst_121 : f32 to vector<2x192xf32>
    %383 = arith.addf %382, %381 : vector<2x192xf32>
    %384 = arith.divf %382, %383 : vector<2x192xf32>
    %385 = vector.extract_strided_slice %378 {offsets = [0, 192], sizes = [2, 64], strides = [1, 1]} : vector<2x256xf32> to vector<2x64xf32>
    %386 = math.tanh %385 : vector<2x64xf32>
    %387 = vector.extract_strided_slice %384 {offsets = [0, 0], sizes = [2, 64], strides = [1, 1]} : vector<2x192xf32> to vector<2x64xf32>
    %388 = vector.extract_strided_slice %384 {offsets = [0, 64], sizes = [2, 64], strides = [1, 1]} : vector<2x192xf32> to vector<2x64xf32>
    %389 = vector.extract_strided_slice %384 {offsets = [0, 128], sizes = [2, 64], strides = [1, 1]} : vector<2x192xf32> to vector<2x64xf32>
    %390 = arith.mulf %388, %373 : vector<2x64xf32>
    %391 = arith.mulf %387, %386 : vector<2x64xf32>
    %392 = arith.addf %390, %391 : vector<2x64xf32>
    %393 = math.tanh %392 : vector<2x64xf32>
    %394 = arith.mulf %389, %393 : vector<2x64xf32>
    %c6_122 = arith.constant 6 : index
    %c0_123 = arith.constant 0 : index
    %395 = vector.load %arg20[%c6_122, %c0_123] : memref<16x256xf32, #tpu.memory_space<vmem>>, vector<2x256xf32>
    %cst_124 = arith.constant dense<0.000000e+00> : vector<2x256xf32>
    %396 = tpu.matmul %394, %337, %cst_124 {dimension_numbers = #tpu.dot_dimension_numbers<[1], [0], [0], [1], [0, 0, 1, 1], [], []>} : vector<2x64xf32>, vector<64x256xf32>, vector<2x256xf32> -> vector<2x256xf32>
    %397 = arith.addf %395, %396 : vector<2x256xf32>
    %398 = vector.extract_strided_slice %397 {offsets = [0, 0], sizes = [2, 192], strides = [1, 1]} : vector<2x256xf32> to vector<2x192xf32>
    %399 = arith.negf %398 : vector<2x192xf32>
    %400 = math.exp %399 : vector<2x192xf32>
    %cst_125 = arith.constant 1.000000e+00 : f32
    %401 = vector.broadcast %cst_125 : f32 to vector<2x192xf32>
    %402 = arith.addf %401, %400 : vector<2x192xf32>
    %403 = arith.divf %401, %402 : vector<2x192xf32>
    %404 = vector.extract_strided_slice %397 {offsets = [0, 192], sizes = [2, 64], strides = [1, 1]} : vector<2x256xf32> to vector<2x64xf32>
    %405 = math.tanh %404 : vector<2x64xf32>
    %406 = vector.extract_strided_slice %403 {offsets = [0, 0], sizes = [2, 64], strides = [1, 1]} : vector<2x192xf32> to vector<2x64xf32>
    %407 = vector.extract_strided_slice %403 {offsets = [0, 64], sizes = [2, 64], strides = [1, 1]} : vector<2x192xf32> to vector<2x64xf32>
    %408 = vector.extract_strided_slice %403 {offsets = [0, 128], sizes = [2, 64], strides = [1, 1]} : vector<2x192xf32> to vector<2x64xf32>
    %409 = arith.mulf %407, %392 : vector<2x64xf32>
    %410 = arith.mulf %406, %405 : vector<2x64xf32>
    %411 = arith.addf %409, %410 : vector<2x64xf32>
    %412 = math.tanh %411 : vector<2x64xf32>
    %413 = arith.mulf %408, %412 : vector<2x64xf32>
    %c8_126 = arith.constant 8 : index
    %c0_127 = arith.constant 0 : index
    %414 = vector.load %arg20[%c8_126, %c0_127] : memref<16x256xf32, #tpu.memory_space<vmem>>, vector<2x256xf32>
    %cst_128 = arith.constant dense<0.000000e+00> : vector<2x256xf32>
    %415 = tpu.matmul %413, %337, %cst_128 {dimension_numbers = #tpu.dot_dimension_numbers<[1], [0], [0], [1], [0, 0, 1, 1], [], []>} : vector<2x64xf32>, vector<64x256xf32>, vector<2x256xf32> -> vector<2x256xf32>
    %416 = arith.addf %414, %415 : vector<2x256xf32>
    %417 = vector.extract_strided_slice %416 {offsets = [0, 0], sizes = [2, 192], strides = [1, 1]} : vector<2x256xf32> to vector<2x192xf32>
    %418 = arith.negf %417 : vector<2x192xf32>
    %419 = math.exp %418 : vector<2x192xf32>
    %cst_129 = arith.constant 1.000000e+00 : f32
    %420 = vector.broadcast %cst_129 : f32 to vector<2x192xf32>
    %421 = arith.addf %420, %419 : vector<2x192xf32>
    %422 = arith.divf %420, %421 : vector<2x192xf32>
    %423 = vector.extract_strided_slice %416 {offsets = [0, 192], sizes = [2, 64], strides = [1, 1]} : vector<2x256xf32> to vector<2x64xf32>
    %424 = math.tanh %423 : vector<2x64xf32>
    %425 = vector.extract_strided_slice %422 {offsets = [0, 0], sizes = [2, 64], strides = [1, 1]} : vector<2x192xf32> to vector<2x64xf32>
    %426 = vector.extract_strided_slice %422 {offsets = [0, 64], sizes = [2, 64], strides = [1, 1]} : vector<2x192xf32> to vector<2x64xf32>
    %427 = vector.extract_strided_slice %422 {offsets = [0, 128], sizes = [2, 64], strides = [1, 1]} : vector<2x192xf32> to vector<2x64xf32>
    %428 = arith.mulf %426, %411 : vector<2x64xf32>
    %429 = arith.mulf %425, %424 : vector<2x64xf32>
    %430 = arith.addf %428, %429 : vector<2x64xf32>
    %431 = math.tanh %430 : vector<2x64xf32>
    %432 = arith.mulf %427, %431 : vector<2x64xf32>
    %c10_130 = arith.constant 10 : index
    %c0_131 = arith.constant 0 : index
    %433 = vector.load %arg20[%c10_130, %c0_131] : memref<16x256xf32, #tpu.memory_space<vmem>>, vector<2x256xf32>
    %cst_132 = arith.constant dense<0.000000e+00> : vector<2x256xf32>
    %434 = tpu.matmul %432, %337, %cst_132 {dimension_numbers = #tpu.dot_dimension_numbers<[1], [0], [0], [1], [0, 0, 1, 1], [], []>} : vector<2x64xf32>, vector<64x256xf32>, vector<2x256xf32> -> vector<2x256xf32>
    %435 = arith.addf %433, %434 : vector<2x256xf32>
    %436 = vector.extract_strided_slice %435 {offsets = [0, 0], sizes = [2, 192], strides = [1, 1]} : vector<2x256xf32> to vector<2x192xf32>
    %437 = arith.negf %436 : vector<2x192xf32>
    %438 = math.exp %437 : vector<2x192xf32>
    %cst_133 = arith.constant 1.000000e+00 : f32
    %439 = vector.broadcast %cst_133 : f32 to vector<2x192xf32>
    %440 = arith.addf %439, %438 : vector<2x192xf32>
    %441 = arith.divf %439, %440 : vector<2x192xf32>
    %442 = vector.extract_strided_slice %435 {offsets = [0, 192], sizes = [2, 64], strides = [1, 1]} : vector<2x256xf32> to vector<2x64xf32>
    %443 = math.tanh %442 : vector<2x64xf32>
    %444 = vector.extract_strided_slice %441 {offsets = [0, 0], sizes = [2, 64], strides = [1, 1]} : vector<2x192xf32> to vector<2x64xf32>
    %445 = vector.extract_strided_slice %441 {offsets = [0, 64], sizes = [2, 64], strides = [1, 1]} : vector<2x192xf32> to vector<2x64xf32>
    %446 = vector.extract_strided_slice %441 {offsets = [0, 128], sizes = [2, 64], strides = [1, 1]} : vector<2x192xf32> to vector<2x64xf32>
    %447 = arith.mulf %445, %430 : vector<2x64xf32>
    %448 = arith.mulf %444, %443 : vector<2x64xf32>
    %449 = arith.addf %447, %448 : vector<2x64xf32>
    %450 = math.tanh %449 : vector<2x64xf32>
    %451 = arith.mulf %446, %450 : vector<2x64xf32>
    %c12_134 = arith.constant 12 : index
    %c0_135 = arith.constant 0 : index
    %452 = vector.load %arg20[%c12_134, %c0_135] : memref<16x256xf32, #tpu.memory_space<vmem>>, vector<2x256xf32>
    %cst_136 = arith.constant dense<0.000000e+00> : vector<2x256xf32>
    %453 = tpu.matmul %451, %337, %cst_136 {dimension_numbers = #tpu.dot_dimension_numbers<[1], [0], [0], [1], [0, 0, 1, 1], [], []>} : vector<2x64xf32>, vector<64x256xf32>, vector<2x256xf32> -> vector<2x256xf32>
    %454 = arith.addf %452, %453 : vector<2x256xf32>
    %455 = vector.extract_strided_slice %454 {offsets = [0, 0], sizes = [2, 192], strides = [1, 1]} : vector<2x256xf32> to vector<2x192xf32>
    %456 = arith.negf %455 : vector<2x192xf32>
    %457 = math.exp %456 : vector<2x192xf32>
    %cst_137 = arith.constant 1.000000e+00 : f32
    %458 = vector.broadcast %cst_137 : f32 to vector<2x192xf32>
    %459 = arith.addf %458, %457 : vector<2x192xf32>
    %460 = arith.divf %458, %459 : vector<2x192xf32>
    %461 = vector.extract_strided_slice %454 {offsets = [0, 192], sizes = [2, 64], strides = [1, 1]} : vector<2x256xf32> to vector<2x64xf32>
    %462 = math.tanh %461 : vector<2x64xf32>
    %463 = vector.extract_strided_slice %460 {offsets = [0, 0], sizes = [2, 64], strides = [1, 1]} : vector<2x192xf32> to vector<2x64xf32>
    %464 = vector.extract_strided_slice %460 {offsets = [0, 64], sizes = [2, 64], strides = [1, 1]} : vector<2x192xf32> to vector<2x64xf32>
    %465 = vector.extract_strided_slice %460 {offsets = [0, 128], sizes = [2, 64], strides = [1, 1]} : vector<2x192xf32> to vector<2x64xf32>
    %466 = arith.mulf %464, %449 : vector<2x64xf32>
    %467 = arith.mulf %463, %462 : vector<2x64xf32>
    %468 = arith.addf %466, %467 : vector<2x64xf32>
    %469 = math.tanh %468 : vector<2x64xf32>
    %470 = arith.mulf %465, %469 : vector<2x64xf32>
    %c14_138 = arith.constant 14 : index
    %c0_139 = arith.constant 0 : index
    %471 = vector.load %arg20[%c14_138, %c0_139] : memref<16x256xf32, #tpu.memory_space<vmem>>, vector<2x256xf32>
    %cst_140 = arith.constant dense<0.000000e+00> : vector<2x256xf32>
    %472 = tpu.matmul %470, %337, %cst_140 {dimension_numbers = #tpu.dot_dimension_numbers<[1], [0], [0], [1], [0, 0, 1, 1], [], []>} : vector<2x64xf32>, vector<64x256xf32>, vector<2x256xf32> -> vector<2x256xf32>
    %473 = arith.addf %471, %472 : vector<2x256xf32>
    %474 = vector.extract_strided_slice %473 {offsets = [0, 0], sizes = [2, 192], strides = [1, 1]} : vector<2x256xf32> to vector<2x192xf32>
    %475 = arith.negf %474 : vector<2x192xf32>
    %476 = math.exp %475 : vector<2x192xf32>
    %cst_141 = arith.constant 1.000000e+00 : f32
    %477 = vector.broadcast %cst_141 : f32 to vector<2x192xf32>
    %478 = arith.addf %477, %476 : vector<2x192xf32>
    %479 = arith.divf %477, %478 : vector<2x192xf32>
    %480 = vector.extract_strided_slice %473 {offsets = [0, 192], sizes = [2, 64], strides = [1, 1]} : vector<2x256xf32> to vector<2x64xf32>
    %481 = math.tanh %480 : vector<2x64xf32>
    %482 = vector.extract_strided_slice %479 {offsets = [0, 0], sizes = [2, 64], strides = [1, 1]} : vector<2x192xf32> to vector<2x64xf32>
    %483 = vector.extract_strided_slice %479 {offsets = [0, 64], sizes = [2, 64], strides = [1, 1]} : vector<2x192xf32> to vector<2x64xf32>
    %484 = vector.extract_strided_slice %479 {offsets = [0, 128], sizes = [2, 64], strides = [1, 1]} : vector<2x192xf32> to vector<2x64xf32>
    %485 = arith.mulf %483, %468 : vector<2x64xf32>
    %486 = arith.mulf %482, %481 : vector<2x64xf32>
    %487 = arith.addf %485, %486 : vector<2x64xf32>
    %488 = math.tanh %487 : vector<2x64xf32>
    %489 = arith.mulf %484, %488 : vector<2x64xf32>
    %c14_142 = arith.constant 14 : index
    %c0_143 = arith.constant 0 : index
    %490 = vector.load %arg19[%c14_142, %c0_143] : memref<16x128xf32, #tpu.memory_space<vmem>>, vector<2x128xf32>
    %c0_144 = arith.constant 0 : index
    %c0_145 = arith.constant 0 : index
    %491 = vector.load %arg8[%c0_144, %c0_145] : memref<128x256xf32, #tpu.memory_space<vmem>>, vector<128x256xf32>
    %cst_146 = arith.constant dense<0.000000e+00> : vector<2x256xf32>
    %492 = tpu.matmul %490, %491, %cst_146 {dimension_numbers = #tpu.dot_dimension_numbers<[1], [0], [0], [1], [0, 0, 1, 1], [], []>} : vector<2x128xf32>, vector<128x256xf32>, vector<2x256xf32> -> vector<2x256xf32>
    %c0_147 = arith.constant 0 : index
    %c0_148 = arith.constant 0 : index
    %493 = vector.load %arg9[%c0_147, %c0_148] : memref<1x256xf32, #tpu.memory_space<vmem>>, vector<1x256xf32>
    %494 = vector.broadcast %493 : vector<1x256xf32> to vector<2x256xf32>
    %495 = arith.addf %492, %494 : vector<2x256xf32>
    %496 = vector.extract_strided_slice %495 {offsets = [0, 0], sizes = [2, 192], strides = [1, 1]} : vector<2x256xf32> to vector<2x192xf32>
    %497 = arith.negf %496 : vector<2x192xf32>
    %498 = math.exp %497 : vector<2x192xf32>
    %cst_149 = arith.constant 1.000000e+00 : f32
    %499 = vector.broadcast %cst_149 : f32 to vector<2x192xf32>
    %500 = arith.addf %499, %498 : vector<2x192xf32>
    %501 = arith.divf %499, %500 : vector<2x192xf32>
    %502 = vector.extract_strided_slice %495 {offsets = [0, 192], sizes = [2, 64], strides = [1, 1]} : vector<2x256xf32> to vector<2x64xf32>
    %503 = math.tanh %502 : vector<2x64xf32>
    %504 = vector.extract_strided_slice %501 {offsets = [0, 0], sizes = [2, 64], strides = [1, 1]} : vector<2x192xf32> to vector<2x64xf32>
    %505 = vector.extract_strided_slice %501 {offsets = [0, 64], sizes = [2, 64], strides = [1, 1]} : vector<2x192xf32> to vector<2x64xf32>
    %506 = vector.extract_strided_slice %501 {offsets = [0, 128], sizes = [2, 64], strides = [1, 1]} : vector<2x192xf32> to vector<2x64xf32>
    %507 = arith.mulf %505, %9 : vector<2x64xf32>
    %508 = arith.mulf %504, %503 : vector<2x64xf32>
    %509 = arith.addf %507, %508 : vector<2x64xf32>
    %510 = math.tanh %509 : vector<2x64xf32>
    %511 = arith.mulf %506, %510 : vector<2x64xf32>
    %512 = tpu.concatenate %489, %511 in 1 : vector<2x64xf32>, vector<2x64xf32> -> vector<2x128xf32>
    %c0_150 = arith.constant 0 : index
    %c0_151 = arith.constant 0 : index
    %513 = vector.load %arg10[%c0_150, %c0_151] : memref<128x64xf32, #tpu.memory_space<vmem>>, vector<128x64xf32>
    %cst_152 = arith.constant dense<0.000000e+00> : vector<2x64xf32>
    %514 = tpu.matmul %512, %513, %cst_152 {dimension_numbers = #tpu.dot_dimension_numbers<[1], [0], [0], [1], [0, 0, 1, 1], [], []>} : vector<2x128xf32>, vector<128x64xf32>, vector<2x64xf32> -> vector<2x64xf32>
    %c0_153 = arith.constant 0 : index
    %c0_154 = arith.constant 0 : index
    %515 = vector.load %arg11[%c0_153, %c0_154] : memref<1x64xf32, #tpu.memory_space<vmem>>, vector<1x64xf32>
    %516 = vector.broadcast %515 : vector<1x64xf32> to vector<2x64xf32>
    %517 = arith.addf %514, %516 : vector<2x64xf32>
    %cst_155 = arith.constant 0.000000e+00 : f32
    %518 = vector.broadcast %cst_155 : f32 to vector<2x64xf32>
    %519 = arith.maximumf %517, %518 : vector<2x64xf32>
    %c0_156 = arith.constant 0 : index
    %c0_157 = arith.constant 0 : index
    %520 = vector.load %arg12[%c0_156, %c0_157] : memref<64x32xf32, #tpu.memory_space<vmem>>, vector<64x32xf32>
    %cst_158 = arith.constant dense<0.000000e+00> : vector<2x32xf32>
    %521 = tpu.matmul %519, %520, %cst_158 {dimension_numbers = #tpu.dot_dimension_numbers<[1], [0], [0], [1], [0, 0, 1, 1], [], []>} : vector<2x64xf32>, vector<64x32xf32>, vector<2x32xf32> -> vector<2x32xf32>
    %c0_159 = arith.constant 0 : index
    %c0_160 = arith.constant 0 : index
    %522 = vector.load %arg13[%c0_159, %c0_160] : memref<1x32xf32, #tpu.memory_space<vmem>>, vector<1x32xf32>
    %523 = vector.broadcast %522 : vector<1x32xf32> to vector<2x32xf32>
    %524 = arith.addf %521, %523 : vector<2x32xf32>
    %cst_161 = arith.constant 0.000000e+00 : f32
    %525 = vector.broadcast %cst_161 : f32 to vector<2x32xf32>
    %526 = arith.maximumf %524, %525 : vector<2x32xf32>
    %c0_162 = arith.constant 0 : index
    %c0_163 = arith.constant 0 : index
    %527 = vector.load %arg14[%c0_162, %c0_163] : memref<32x3xf32, #tpu.memory_space<vmem>>, vector<32x3xf32>
    %cst_164 = arith.constant dense<0.000000e+00> : vector<2x3xf32>
    %528 = tpu.matmul %526, %527, %cst_164 {dimension_numbers = #tpu.dot_dimension_numbers<[1], [0], [0], [1], [0, 0, 1, 1], [], []>} : vector<2x32xf32>, vector<32x3xf32>, vector<2x3xf32> -> vector<2x3xf32>
    %c0_165 = arith.constant 0 : index
    %c0_166 = arith.constant 0 : index
    %529 = vector.load %arg15[%c0_165, %c0_166] : memref<1x3xf32, #tpu.memory_space<vmem>>, vector<1x3xf32>
    %530 = vector.broadcast %529 : vector<1x3xf32> to vector<2x3xf32>
    %531 = arith.addf %528, %530 : vector<2x3xf32>
    %c0_167 = arith.constant 0 : index
    %c0_168 = arith.constant 0 : index
    %532 = vector.load %arg17[%c0_167, %c0_168] : memref<2x32xf32, #tpu.memory_space<vmem>>, vector<2x32xf32>
    tpu.vector_store %arg17[%c0_167, %c0_168], %526 {strides = array<i32>} : memref<2x32xf32, #tpu.memory_space<vmem>>, vector<2x32xf32>,
    %c0_169 = arith.constant 0 : index
    %c0_170 = arith.constant 0 : index
    %533 = vector.load %arg16[%c0_169, %c0_170] : memref<2x3xf32, #tpu.memory_space<vmem>>, vector<2x3xf32>
    tpu.vector_store %arg16[%c0_169, %c0_170], %531 {strides = array<i32>} : memref<2x3xf32, #tpu.memory_space<vmem>>, vector<2x3xf32>,
    return
  }
}

</mosaic_0001>

<bundles_post_ra>
// kernel: eeglstm_forward.1
= control target key start
LH: loop header
LB: loop body
LE: loop exit
PB: predicated region body
PF: predicated region fallthrough
CT: control target
= control target key end

     0   :  { %s6223_s0 = inlined_call_operand.vmem [shape: f32[16,28], index: 0, kind: input, shape index: {}]   ;;  %s6224_s1 = inlined_call_operand.vmem [shape: f32[28,512], index: 1, kind: input, shape index: {}]   ;;  %s6225_s2 = inlined_call_operand.hbm [shape: f32[1,512], index: 2, kind: input, shape index: {}]   ;;  %s6226_s3 = inlined_call_operand.hbm [shape: f32[64,256], index: 3, kind: input, shape index: {}]   ;;  %s6227_s4 = inlined_call_operand.hbm [shape: f32[64,256], index: 4, kind: input, shape index: {}]   ;;  %s6228_s5 = inlined_call_operand.vmem [shape: f32[128,256], index: 5, kind: input, shape index: {}]   ;;  %s6229_s6 = inlined_call_operand.hbm [shape: f32[64,256], index: 6, kind: input, shape index: {}]   ;;  %s6230_s7 = inlined_call_operand.hbm [shape: f32[1,256], index: 7, kind: input, shape index: {}]   ;;  %s6231_s8 = inlined_call_operand.hbm [shape: f32[128,256], index: 8, kind: input, shape index: {}]   ;;  %s6232_s9 = inlined_call_operand.hbm [shape: f32[1,256], index: 9, kind: input, shape index: {}]   ;;  %s6233_s10 = inlined_call_operand.vmem [shape: f32[128,64], index: 10, kind: input, shape index: {}]   ;;  %s6234_s11 = inlined_call_operand.hbm [shape: f32[1,64], index: 11, kind: input, shape index: {}]   ;;  %s6235_s12 = inlined_call_operand.vmem [shape: f32[64,32], index: 12, kind: input, shape index: {}]   ;;  %s6236_s13 = inlined_call_operand.hbm [shape: f32[1,32], index: 13, kind: input, shape index: {}]   ;;  %s6237_s14 = inlined_call_operand.vmem [shape: f32[32,3], index: 14, kind: input, shape index: {}]   ;;  %s6238_s15 = inlined_call_operand.hbm [shape: f32[1,3], index: 15, kind: input, shape index: {}]   ;;  %s6239_s16 = inlined_call_operand.hbm [shape: f32[2,3], index: 16, kind: output, shape index: {0}]   ;;  %s6240_s17 = inlined_call_operand.hbm [shape: f32[2,32], index: 17, kind: output, shape index: {1}]  }
   0x1   :  { %6244 = sst [smem:[#allocation33_spill]] %s6223_s0 }
   0x2   :  { %6245 = sst [smem:[#allocation34_spill]] %s6224_s1 }
   0x3   :  { %6246 = sst [smem:[#allocation35_spill]] %s6239_s16 }
   0x4   :  { %23 = vsyncpa [#allocation6], 0 }
   0x5   :  { %24 = vsyncpa [#allocation9], 0 }
   0x6   :  { %25 = vsyncpa [#allocation12], 0 }
   0x7   :  { %26 = vsyncpa [#allocation15], 0 }
   0x8   :  { %27 = vsyncpa [#allocation18], 0 }
   0x9   :  { %28 = vsyncpa [#allocation21], 0 }
   0xa   :  { %29 = vsyncpa [#allocation7], 0 }
   0xb   :  { %30 = vsyncpa [#allocation24], 0  ;;  %s5151_s24 = smov [#allocation8]   ;;  %s4871_s28 = scalar_lea.hbm %s6226_s3, 2048 }
   0xc   :  { %s50_s25 = sshll.u32 %s5151_s24, 4  ;;  %p4872_p0 = scmp.ne.s32.totalorder %s6226_s3, %s4871_s28  ;;  %s51_s25 = int_to_ptr.vmem [resolvable:$true] %s50_s25 }
   0xd   :  { %p4875_p1 = scmp.lt.u32.totalorder %s4871_s28, %s6226_s3 }
   0xf   :  { %p4877_p2 = pnand %p4875_p1, %p4872_p0 }
  0x11   :  { %4880 = shalt.err (!%p4877_p2)
}
  0x12   :  { %s4881_s19 = scalar_lea.vmem %s51_s25, 2048  ;;  %p4886_p4 = scmp.lt.s32.totalorder %s51_s25, %s51_s25 }
  0x13   :  { %p4882_p3 = scmp.ne.s32.totalorder %s51_s25, %s4881_s19  ;;  %p4887_p5 = scmp.lt.s32.totalorder %s4881_s19, %s4881_s19 }
  0x15   :  { %p4888_p6 = por %p4887_p5, %p4886_p4 }
  0x17   :  { %p4889_p7 = pnand %p4888_p6, %p4882_p3 }
  0x19   :  { %4892 = shalt.err (!%p4889_p7)
}
  0x1a   :  { %s5152_s1 = smov 256   ;;  %s5153_s20 = smov 16  }
  0x1b   :  { %56 = dma.hbm_to_vmem [thread:$0]  %s6226_s3, 2048, %s51_s25, [#allocation9], %s5152_s1, %s5152_s1, %s5153_s20  }
  0x1c   :  { %s5154_s23 = smov [#allocation11]   ;;  %s5155_s26 = smov [#allocation14]  }
  0x1d   :  { %s76_s24 = sshll.u32 %s5154_s23, 4  ;;  %s98_s27 = sshll.u32 %s5155_s26, 4  ;;  %s77_s24 = int_to_ptr.vmem [resolvable:$true] %s76_s24  ;;  %s99_s27 = int_to_ptr.vmem [resolvable:$true] %s98_s27 }
  0x1e   :  { %s4893_s0 = scalar_lea.hbm %s6229_s6, 2048 }
  0x1f   :  { %p4894_p8 = scmp.ne.s32.totalorder %s6229_s6, %s4893_s0  ;;  %p4897_p9 = scmp.lt.u32.totalorder %s4893_s0, %s6229_s6 }
  0x21   :  { %p4899_p10 = pnand %p4897_p9, %p4894_p8 }
  0x23   :  { %4902 = shalt.err (!%p4899_p10)
}
  0x24   :  { %s4903_s3 = scalar_lea.vmem %s77_s24, 2048  ;;  %p4908_p12 = scmp.lt.s32.totalorder %s77_s24, %s77_s24 }
  0x25   :  { %p4904_p11 = scmp.ne.s32.totalorder %s77_s24, %s4903_s3  ;;  %p4909_p13 = scmp.lt.s32.totalorder %s4903_s3, %s4903_s3 }
  0x27   :  { %p4910_p0 = por %p4909_p13, %p4908_p12 }
  0x29   :  { %p4911_p1 = pnand %p4910_p0, %p4904_p11 }
  0x2b   :  { %4914 = shalt.err (!%p4911_p1)
}
  0x2c   :  { %82 = dma.hbm_to_vmem [thread:$0]  %s6229_s6, 2048, %s77_s24, [#allocation12], %s5152_s1, %s5152_s1, %s5153_s20  }
  0x2d   :  { %s4915_s23 = scalar_lea.hbm %s6231_s8, 4096 }
  0x2e   :  { %p4916_p2 = scmp.ne.s32.totalorder %s6231_s8, %s4915_s23  ;;  %p4919_p3 = scmp.lt.u32.totalorder %s4915_s23, %s6231_s8 }
  0x30   :  { %p4921_p4 = pnand %p4919_p3, %p4916_p2 }
  0x32   :  { %4924 = shalt.err (!%p4921_p4)
}
  0x33   :  { %s4925_s30 = scalar_lea.vmem %s99_s27, 4096  ;;  %p4930_p6 = scmp.lt.s32.totalorder %s99_s27, %s99_s27 }
  0x34   :  { %p4926_p5 = scmp.ne.s32.totalorder %s99_s27, %s4925_s30  ;;  %p4931_p7 = scmp.lt.s32.totalorder %s4925_s30, %s4925_s30 }
  0x36   :  { %p4932_p8 = por %p4931_p7, %p4930_p6 }
  0x38   :  { %p4933_p9 = pnand %p4932_p8, %p4926_p5 }
  0x3a   :  { %4936 = shalt.err (!%p4933_p9)
}
  0x3b   :  { %104 = dma.hbm_to_vmem [thread:$0]  %s6231_s8, 4096, %s99_s27, [#allocation15], %s5152_s1, %s5152_s1, %s5153_s20  }
  0x3c   :  { %s5156_s18 = smov [#allocation17]   ;;  %s5157_s3 = smov [#allocation5]  }
  0x3d   :  { %s123_s19 = sshll.u32 %s5156_s18, 4  ;;  %s41_s25 = sshll.u32 %s5157_s3, 4  ;;  %s124_s19 = int_to_ptr.vmem [resolvable:$true] %s123_s19  ;;  %s42_s25 = int_to_ptr.vmem [resolvable:$true] %s41_s25 }
  0x3e   :  { %s4937_s16 = scalar_lea.hbm %s6234_s11, 16 }
  0x3f   :  { %p4938_p10 = scmp.ne.s32.totalorder %s6234_s11, %s4937_s16  ;;  %p4941_p11 = scmp.lt.u32.totalorder %s4937_s16, %s6234_s11 }
  0x41   :  { %p4943_p12 = pnand %p4941_p11, %p4938_p10 }
  0x43   :  { %4946 = shalt.err (!%p4943_p12)
}
  0x44   :  { %s4947_s8 = scalar_lea.vmem %s124_s19, 16  ;;  %s4951_s27 = scalar_lea.vmem %s124_s19, 32 }
  0x45   :  { %p4948_p13 = scmp.ne.s32.totalorder %s124_s19, %s4947_s8  ;;  %p4952_p0 = scmp.lt.s32.totalorder %s124_s19, %s124_s19 }
  0x46   :  { %p4953_p1 = scmp.lt.s32.totalorder %s4951_s27, %s4947_s8 }
  0x48   :  { %p4954_p2 = por %p4953_p1, %p4952_p0 }
  0x4a   :  { %p4955_p3 = pnand %p4954_p2, %p4948_p13 }
  0x4c   :  { %4958 = shalt.err (!%p4955_p3)
}
  0x4d   :  { %126 = dma.hbm_to_vmem [thread:$0]  %s6234_s11, 16, %s124_s19, [#allocation18]  }
  0x4e   :  { %s4959_s18 = scalar_lea.hbm %s6225_s2, 64 }
  0x4f   :  { %p4960_p4 = scmp.ne.s32.totalorder %s6225_s2, %s4959_s18  ;;  %p4963_p5 = scmp.lt.u32.totalorder %s4959_s18, %s6225_s2 }
  0x51   :  { %p4965_p6 = pnand %p4963_p5, %p4960_p4 }
  0x53   :  { %4968 = shalt.err (!%p4965_p6)
}
  0x54   :  { %s4969_s23 = scalar_lea.vmem %s42_s25, 64  ;;  %p4974_p8 = scmp.lt.s32.totalorder %s42_s25, %s42_s25 }
  0x55   :  { %p4970_p7 = scmp.ne.s32.totalorder %s42_s25, %s4969_s23  ;;  %p4975_p9 = scmp.lt.s32.totalorder %s4969_s23, %s4969_s23 }
  0x57   :  { %p4976_p10 = por %p4975_p9, %p4974_p8 }
  0x59   :  { %p4977_p11 = pnand %p4976_p10, %p4970_p7 }
  0x5b   :  { %4980 = shalt.err (!%p4977_p11)
}
  0x5c   :  { %44 = dma.hbm_to_vmem [thread:$0]  %s6225_s2, 64, %s42_s25, [#allocation6]  }
  0x5d   :  { %s5158_s26 = smov [#allocation10]   ;;  %s5159_s29 = smov [#allocation13]  }
  0x5e   :  { %s62_s28 = sshll.u32 %s5158_s26, 4  ;;  %s89_s8 = sshll.u32 %s5159_s29, 4  ;;  %s63_s28 = int_to_ptr.vmem [resolvable:$true] %s62_s28  ;;  %s90_s8 = int_to_ptr.vmem [resolvable:$true] %s89_s8 }
  0x5f   :  { %s4981_s30 = scalar_lea.hbm %s6227_s4, 2048 }
  0x60   :  { %p4982_p12 = scmp.ne.s32.totalorder %s6227_s4, %s4981_s30  ;;  %p4985_p13 = scmp.lt.u32.totalorder %s4981_s30, %s6227_s4 }
  0x62   :  { %p4987_p0 = pnand %p4985_p13, %p4982_p12 }
  0x64   :  { %4990 = shalt.err (!%p4987_p0)
}
  0x65   :  { %s4991_s2 = scalar_lea.vmem %s63_s28, 2048  ;;  %p4996_p2 = scmp.lt.s32.totalorder %s63_s28, %s63_s28 }
  0x66   :  { %p4992_p1 = scmp.ne.s32.totalorder %s63_s28, %s4991_s2  ;;  %p4997_p3 = scmp.lt.s32.totalorder %s4991_s2, %s4991_s2 }
  0x68   :  { %p4998_p4 = por %p4997_p3, %p4996_p2 }
  0x6a   :  { %p4999_p5 = pnand %p4998_p4, %p4992_p1 }
  0x6c   :  { %5002 = shalt.err (!%p4999_p5)
}
  0x6d   :  { %68 = dma.hbm_to_vmem [thread:$0]  %s6227_s4, 2048, %s63_s28, [#allocation9], %s5152_s1, %s5152_s1, %s5153_s20  }
  0x6e   :  { %s5003_s23 = scalar_lea.hbm %s6230_s7, 32 }
  0x6f   :  { %p5004_p6 = scmp.ne.s32.totalorder %s6230_s7, %s5003_s23  ;;  %p5007_p7 = scmp.lt.u32.totalorder %s5003_s23, %s6230_s7 }
  0x71   :  { %p5009_p8 = pnand %p5007_p7, %p5004_p6 }
  0x73   :  { %5012 = shalt.err (!%p5009_p8)
}
  0x74   :  { %s5013_s27 = scalar_lea.vmem %s90_s8, 32  ;;  %p5018_p10 = scmp.lt.s32.totalorder %s90_s8, %s90_s8 }
  0x75   :  { %p5014_p9 = scmp.ne.s32.totalorder %s90_s8, %s5013_s27  ;;  %p5019_p11 = scmp.lt.s32.totalorder %s5013_s27, %s5013_s27 }
  0x77   :  { %p5020_p12 = por %p5019_p11, %p5018_p10 }
  0x79   :  { %p5021_p13 = pnand %p5020_p12, %p5014_p9 }
  0x7b   :  { %5024 = shalt.err (!%p5021_p13)
}
  0x7c   :  { %92 = dma.hbm_to_vmem [thread:$0]  %s6230_s7, 32, %s90_s8, [#allocation12]  }
  0x7d   :  { %s5160_s20 = smov [#allocation16]   ;;  %s5161_s0 = smov [#allocation19]  }
  0x7e   :  { %s111_s28 = sshll.u32 %s5160_s20, 4  ;;  %s135_s30 = sshll.u32 %s5161_s0, 4  ;;  %s112_s28 = int_to_ptr.vmem [resolvable:$true] %s111_s28  ;;  %s136_s30 = int_to_ptr.vmem [resolvable:$true] %s135_s30 }
  0x7f   :  { %s5025_s18 = scalar_lea.hbm %s6232_s9, 32 }
  0x80   :  { %p5026_p0 = scmp.ne.s32.totalorder %s6232_s9, %s5025_s18  ;;  %p5029_p1 = scmp.lt.u32.totalorder %s5025_s18, %s6232_s9 }
  0x82   :  { %p5031_p2 = pnand %p5029_p1, %p5026_p0 }
  0x84   :  { %5034 = shalt.err (!%p5031_p2)
}
  0x85   :  { %s5035_s7 = scalar_lea.vmem %s112_s28, 32  ;;  %p5040_p4 = scmp.lt.s32.totalorder %s112_s28, %s112_s28 }
  0x86   :  { %p5036_p3 = scmp.ne.s32.totalorder %s112_s28, %s5035_s7  ;;  %p5041_p5 = scmp.lt.s32.totalorder %s5035_s7, %s5035_s7 }
  0x88   :  { %p5042_p6 = por %p5041_p5, %p5040_p4 }
  0x8a   :  { %p5043_p7 = pnand %p5042_p6, %p5036_p3 }
  0x8c   :  { %5046 = shalt.err (!%p5043_p7)
}
  0x8d   :  { %114 = dma.hbm_to_vmem [thread:$0]  %s6232_s9, 32, %s112_s28, [#allocation15]  }
  0x8e   :  { %s5047_s11 = scalar_lea.hbm %s6236_s13, 16 }
  0x8f   :  { %p5048_p8 = scmp.ne.s32.totalorder %s6236_s13, %s5047_s11  ;;  %p5051_p9 = scmp.lt.u32.totalorder %s5047_s11, %s6236_s13 }
  0x91   :  { %p5053_p10 = pnand %p5051_p9, %p5048_p8 }
  0x93   :  { %5056 = shalt.err (!%p5053_p10)
}
  0x94   :  { %s5057_s4 = scalar_lea.vmem %s136_s30, 16  ;;  %s5061_s1 = scalar_lea.vmem %s136_s30, 32 }
  0x95   :  { %p5058_p11 = scmp.ne.s32.totalorder %s136_s30, %s5057_s4  ;;  %p5062_p12 = scmp.lt.s32.totalorder %s136_s30, %s136_s30 }
  0x96   :  { %p5063_p13 = scmp.lt.s32.totalorder %s5061_s1, %s5057_s4 }
  0x98   :  { %p5064_p0 = por %p5063_p13, %p5062_p12 }
  0x9a   :  { %p5065_p1 = pnand %p5064_p0, %p5058_p11 }
  0x9c   :  { %5068 = shalt.err (!%p5065_p1)
}
  0x9d   :  { %138 = dma.hbm_to_vmem [thread:$0]  %s6236_s13, 16, %s136_s30, [#allocation18]  }
  0x9e   :  { %s5162_s28 = smov [#allocation20]   ;;  %s5069_s18 = scalar_lea.hbm %s6238_s15, 16 }
  0x9f   :  { %s147_s0 = sshll.u32 %s5162_s28, 4  ;;  %p5070_p2 = scmp.ne.s32.totalorder %s6238_s15, %s5069_s18  ;;  %s148_s0 = int_to_ptr.vmem [resolvable:$true] %s147_s0 }
  0xa0   :  { %p5073_p3 = scmp.lt.u32.totalorder %s5069_s18, %s6238_s15 }
  0xa2   :  { %p5075_p4 = pnand %p5073_p3, %p5070_p2 }
  0xa4   :  { %5078 = shalt.err (!%p5075_p4)
}
  0xa5   :  { %s5079_s7 = scalar_lea.vmem %s148_s0, 16  ;;  %s5083_s13 = scalar_lea.vmem %s148_s0, 32 }
  0xa6   :  { %p5080_p5 = scmp.ne.s32.totalorder %s148_s0, %s5079_s7  ;;  %p5084_p6 = scmp.lt.s32.totalorder %s148_s0, %s148_s0 }
  0xa7   :  { %p5085_p7 = scmp.lt.s32.totalorder %s5083_s13, %s5079_s7 }
  0xa9   :  { %p5086_p8 = por %p5085_p7, %p5084_p6 }
  0xab   :  { %p5087_p9 = pnand %p5086_p8, %p5080_p5 }
  0xad   :  { %5090 = shalt.err (!%p5087_p9)
}
  0xae   :  { %150 = dma.hbm_to_vmem [thread:$0]  %s6238_s15, 16, %s148_s0, [#allocation21]  }
  0xaf   :  { %5135 = dma.done.wait [#allocation6], 64  }
  0xb0   :  { %5136 = vsyncadd [#allocation6], 4294967232 }
  0xb1   :  { %5137 = dma.done.wait [#allocation9], 4096  }
  0xb2   :  { %5138 = vsyncadd [#allocation9], 4294963200 }
  0xb3   :  { %5139 = dma.done.wait [#allocation12], 2080  }
  0xb4   :  { %5140 = vsyncadd [#allocation12], 4294965216 }
  0xb5   :  { %5141 = dma.done.wait [#allocation15], 4128  }
  0xb6   :  { %5142 = vsyncadd [#allocation15], 4294963168 }
  0xb7   :  { %5143 = dma.done.wait [#allocation18], 32  }
  0xb8   :  { %5144 = vsyncadd [#allocation18], 4294967264 }
  0xb9   :  { %5145 = dma.done.wait [#allocation21], 16  }
  0xba   :  { %5146 = vsyncadd [#allocation21], 4294967280  ;;  %v5163_v0 = vmov 0.0   ;;  %vm228_vm0 = vcmask 1043456   ;;  %s6247_s16 = sld [smem:[#allocation34_spill]]  ;;  %vm5164_vm1 = vmmov 1  }
  0xbb   :  { %382 = vmatprep.mubr.f32.mxu1 %v5163_v0  ;;  %305 = vmatprep.mubr.f32.mxu0 %v5163_v0  ;;  %vm5412_vm2 = vmpackc.low %vm228_vm0, %vm5164_vm1  ;;  %v420_v13 = vld [vmem:[#allocation10 + $0x8] sm:$0xff]  ;;  %v422_v14 = vld [vmem:[#allocation10 + $0x18] sm:$0xff]  ;;  %s6250_s2 = sld [smem:[#allocation33_spill]]  ;;  %vm221_vm3 = vcmask 228352   ;;  %vm437_vm4 = vcmask 523264   ;;  %vm655_vm5 = vcmask 517120  }
  0xbc   :  { %v5424_v16 = vpack.c.bf16 %v422_v14, %v420_v13  ;;  %v419_v17 = vld [vmem:[#allocation10] sm:$0xff]  ;;  %v421_v18 = vld [vmem:[#allocation10 + $0x10] sm:$0xff]  ;;  %v424_v19 = vld [vmem:[#allocation10 + $0x28] sm:$0xff]  ;;  %v201_v13 = vlaneseq  ;;  %vm897_vm6 = vcmask 519170   ;;  %vm1140_vm7 = vcmask 521220   ;;  %s5168_s15 = smov [#allocation23]  }
  0xbd   :  { %v426_v20 = vld [vmem:[#allocation10 + $0x38] sm:$0xff]  ;;  %v423_v22 = vld [vmem:[#allocation10 + $0x20] sm:$0xff]  ;;  %v5431_v23 = vpack.c.bf16 %v421_v18, %v419_v17  ;;  %v425_v24 = vld [vmem:[#allocation10 + $0x30] sm:$0xff]  ;;  %vm1377_vm8 = vcmask 523270   ;;  %vm903_vm9 = vcmask 1046020   ;;  %vm661_vm10 = vcmask 1048070  }
  0xbe   :  { %v428_v25 = vld [vmem:[#allocation10 + $0x48] sm:$0xff]  ;;  %v5437_v27 = vpack.c.bf16 %v426_v20, %v424_v19  ;;  %v430_v31 = vld [vmem:[#allocation10 + $0x58] sm:$0xff]  ;;  %v5462_v39 = vpack.c.bf16 %v425_v24, %v423_v22  ;;  %v427_v44 = vld [vmem:[#allocation10 + $0x40] sm:$0xff]  ;;  %v202_v14 = vshrl.u32 %v201_v13, 7  ;;  %vm1146_vm11 = vcmask 1043970   ;;  %s3844_s23 = sshll.u32 %s5168_s15, 4  ;;  %s3845_s23 = int_to_ptr.vmem [resolvable:$true] %s3844_s23 }
  0xbf   :  { %v404_v41 = vld [vmem:[#allocation8 + $0x8] sm:$0xff]  ;;  %v406_v42 = vld [vmem:[#allocation8 + $0x18] sm:$0xff]  ;;  %v5469_v43 = vpack.c.bf16 %v430_v31, %v428_v25  ;;  %v429_v45 = vld [vmem:[#allocation10 + $0x50] sm:$0xff]  ;;  %vm1383_vm12 = vcmask 1041920   ;;  %vm5167_vm13 = vmmov 0   ;;  %vm3750_vm14 = vcmask 261120   ;;  %p5096_p11 = scmp.lt.s32.totalorder %s3845_s23, %s3845_s23 }
  0xc0   :  { %v186_v1 = vld [vmem:[%s6247_s16 + $0x18] sm:$0xff]  ;;  %v185_v3 = vld [vmem:[%s6247_s16 + $0x10] sm:$0xff]  ;;  %v184_v26 = vld [vmem:[%s6247_s16 + $0x8] sm:$0xff]  ;;  %v5474_v49 = vpack.c.bf16 %v406_v42, %v404_v41  ;;  %v5477_v52 = vpack.c.bf16 %v429_v45, %v427_v44  ;;  %v215_v18 = vsub.s32 3, %v202_v14  ;;  %vm3824_vm15 = vcmask 254976   ;;  %s5091_s11 = scalar_lea.vmem %s3845_s23, 32 }
  0xc1   :  { %v190_v2 = vld [vmem:[%s6247_s16 + $0x38] sm:$0xff]  ;;  %v189_v5 = vld [vmem:[%s6247_s16 + $0x30] sm:$0xff]  ;;  %v181_v21 = vld [vmem:[%s6250_s2] sm:$0xff]  ;;  %p5092_p10 = scmp.ne.s32.totalorder %s3845_s23, %s5091_s11  ;;  %p5097_p12 = scmp.lt.s32.totalorder %s5091_s11, %s5091_s11 }
  0xc2   :  { %v4052_v4 = vpack.c.bf16 %v190_v2, %v186_v1  ;;  %v194_v6 = vld [vmem:[%s6247_s16 + $0x58] sm:$0xff]  ;;  %v4054_v8 = vpack.c.bf16 %v189_v5, %v185_v3  ;;  %v193_v11 = vld [vmem:[%s6247_s16 + $0x50] sm:$0xff]  ;;  %v188_v28 = vld [vmem:[%s6247_s16 + $0x28] sm:$0xff] }
  0xc3   :  { %v198_v7 = vld [vmem:[%s6247_s16 + $0x78] sm:$0xf]  ;;  %v197_v12 = vld [vmem:[%s6247_s16 + $0x70] sm:$0xf]  ;;  %v183_v29 = vld [vmem:[%s6247_s16] sm:$0xff]  ;;  %v4042_v32 = vpack.c.bf16 %v188_v28, %v184_v26  ;;  %v5538_v26 = vsub.s32 0, %v202_v14  ;;  %p5098_p13 = por %p5097_p12, %p5096_p11 }
  0xc4   :  { %v4056_v10 = vpack.c.bf16 %v198_v7, %v194_v6  ;;  %4053 = vmatprep.subr.bf16.mxu1 %v4052_v4  ;;  %v4059_v15 = vpack.c.bf16 %v197_v12, %v193_v11  ;;  %v187_v30 = vld [vmem:[%s6247_s16 + $0x20] sm:$0xff]  ;;  %v192_v34 = vld [vmem:[%s6247_s16 + $0x48] sm:$0xff]  ;;  %v403_v50 = vld [vmem:[#allocation8] sm:$0xff] }
  0xc5   :  { %4055 = vmatpush1.bf16.msra.mxu1 %v4054_v8  ;;  %v4044_v33 = vpack.c.bf16 %v187_v30, %v183_v29  ;;  %v196_v35 = vld [vmem:[%s6247_s16 + $0x68] sm:$0xf]  ;;  %v191_v37 = vld [vmem:[%s6247_s16 + $0x40] sm:$0xff]  ;;  %4043 = vmatprep.subr.bf16.mxu0 %v4042_v32  ;;  %v434_v47 = vld [vmem:[#allocation10 + $0x78] sm:$0xff]  ;;  %v5540_v29 = vsub.s32 1, %v202_v14  ;;  %p5099_p0 = pnand %p5098_p13, %p5092_p10 }
  0xc6   :  { %4058 = vmatprep.subr.msk.bf16.mxu1 %vm5412_vm2, %v4056_v10  ;;  %v4046_v36 = vpack.c.bf16 %v196_v35, %v192_v34  ;;  %v195_v38 = vld [vmem:[%s6247_s16 + $0x60] sm:$0xf]  ;;  %v182_v40 = vld [vmem:[%s6250_s2 + $0x8] sm:$0xff]  ;;  %v431_v56 = vld [vmem:[#allocation10 + $0x60] sm:$0xff]  ;;  %s5165_s16 = smov 64  }
  0xc7   :  { %v432_v46 = vld [vmem:[#allocation10 + $0x68] sm:$0xff]  ;;  %4045 = vmatpush1.bf16.msra.mxu0 %v4044_v33  ;;  %v4049_v48 = vpack.c.bf16 %v195_v38, %v191_v37  ;;  %v405_v51 = vld [vmem:[#allocation8 + $0x10] sm:$0xff]  ;;  %v410_v54 = vld [vmem:[#allocation8 + $0x38] sm:$0xff] }
  0xc8   :  { %4048 = vmatprep.subr.msk.bf16.mxu0 %vm5412_vm2, %v4046_v36  ;;  %v408_v53 = vld [vmem:[#allocation8 + $0x28] sm:$0xff]  ;;  %v5481_v55 = vpack.c.bf16 %v434_v47, %v432_v46  ;;  %v433_v57 = vld [vmem:[#allocation10 + $0x70] sm:$0xff]  ;;  %v5485_v58 = vpack.c.bf16 %v405_v51, %v403_v50  ;;  %v407_v60 = vld [vmem:[#allocation8 + $0x20] sm:$0xff] }
  0xc9   :  { %4061 = vmatpush1.bf16.msk.msra.mxu1 %vm5412_vm2, %v4059_v15  ;;  %v5488_v59 = vpack.c.bf16 %v410_v54, %v408_v53  ;;  %v409_v61 = vld [vmem:[#allocation8 + $0x30] sm:$0xff]  ;;  %v5491_v62 = vpack.c.bf16 %v433_v57, %v431_v56  ;;  %v412_v63 = vld [vmem:[#allocation8 + $0x48] sm:$0xff]  ;;  %v414_v1 = vld [vmem:[#allocation8 + $0x58] sm:$0xff]  ;;  %v211_v15 = vsub.s32 2, %v202_v14 }
  0xca   :  { %4079 = vmatprep.subr.bf16.mxu1 %v5424_v16  ;;  %v5496_v2 = vpack.c.bf16 %v409_v61, %v407_v60  ;;  %v5500_v3 = vpack.c.bf16 %v414_v1, %v412_v63  ;;  %v411_v4 = vld [vmem:[#allocation8 + $0x40] sm:$0xff]  ;;  %v413_v5 = vld [vmem:[#allocation8 + $0x50] sm:$0xff]  ;;  %v416_v6 = vld [vmem:[#allocation8 + $0x68] sm:$0xff] }
  0xcb   :  { %4051 = vmatpush1.bf16.msk.msra.mxu0 %vm5412_vm2, %v4049_v48  ;;  %v418_v7 = vld [vmem:[#allocation8 + $0x78] sm:$0xff]  ;;  %v5506_v8 = vpack.c.bf16 %v413_v5, %v411_v4  ;;  %v415_v10 = vld [vmem:[#allocation8 + $0x60] sm:$0xff]  ;;  %v417_v11 = vld [vmem:[#allocation8 + $0x70] sm:$0xff] }
  0xcc   :  { %3868 = vmatmul.mubr.msk.f32.vlgmr.msra.gmra.mrb[0].mxu1 %vm221_vm3, %v181_v21  ;;  %4063 = vmatprep.subr.bf16.mxu0 %v5474_v49  ;;  %v5511_v9 = vpack.c.bf16 %v418_v7, %v416_v6  ;;  %v5517_v12 = vpack.c.bf16 %v417_v11, %v415_v10  ;;  %v199_v17 = vld [vmem:[#allocation5] sm:$0xf] }
  0xcd   :  { %4081 = vmatpush1.bf16.msra.mxu1 %v5431_v23  ;;  %388 = vmatprep.mubr.f32.mxu1 %v5163_v0  ;;  %v212_v19 = vrot.slane %v199_v17, %v211_v15  ;;  %v216_v20 = vrot.slane %v199_v17, %v215_v18  ;;  %v204_v33 = vrot.slane %v199_v17, %v5538_v26 }
  0xce   :  { %4083 = vmatprep.subr.bf16.mxu1 %v5437_v27  ;;  %3864 = vmatmul.mubr.msk.f32.vlgmr.msra.gmra.mrb[0].mxu0 %vm221_vm3, %v181_v21  ;;  %v208_v34 = vrot.slane %v199_v17, %v5540_v29 }
  0xcf   :  { %4065 = vmatpush1.bf16.msra.mxu0 %v5485_v58  ;;  %311 = vmatprep.mubr.f32.mxu0 %v5163_v0 }
  0xd0   :  { %3869 = vmatmul.mubr.msk.f32.gmra.mrb[2].mxu1 %vm221_vm3, %v182_v40  ;;  %4067 = vmatprep.subr.bf16.mxu0 %v5488_v59 }
  0xd1   :  { %4085 = vmatpush1.bf16.msra.mxu1 %v5462_v39  ;;  %580 = vmatprep.mubr.f32.mxu1 %v5163_v0 }
  0xd2   :  { %4087 = vmatprep.subr.bf16.mxu1 %v5469_v43  ;;  %3865 = vmatmul.mubr.msk.f32.gmra.mrb[2].mxu0 %vm221_vm3, %v182_v40 }
  0xd3   :  { %4069 = vmatpush1.bf16.msra.mxu0 %v5496_v2  ;;  %505 = vmatprep.mubr.f32.mxu0 %v5163_v0 }
  0xd4   :  { %4071 = vmatprep.subr.bf16.mxu0 %v5500_v3 }
  0xd5   :  { %4089 = vmatpush1.bf16.msra.mxu1 %v5477_v52 }
  0xd6   :  { %4091 = vmatprep.subr.bf16.mxu1 %v5481_v55 }
  0xd7   :  { %4073 = vmatpush1.bf16.msra.mxu0 %v5506_v8 }
  0xd8   :  { %4075 = vmatprep.subr.bf16.mxu0 %v5511_v9 }
  0xd9   :  { %4093 = vmatpush1.bf16.msra.mxu1 %v5491_v62 }
  0xda   :  { %4111 = vmatprep.subr.bf16.mxu1 %v5424_v16 }
  0xdb   :  { %4077 = vmatpush1.bf16.msra.mxu0 %v5517_v12 }
  0xdc   :  { %581 = vmatmul.mubr.f32.vlgmr.msra.gmra.mrb[4].mxu1 %v5163_v0  ;;  %4095 = vmatprep.subr.bf16.mxu0 %v5474_v49 }
  0xdd   :  { %4113 = vmatpush1.bf16.msra.mxu1 %v5431_v23  ;;  %816 = vmatprep.mubr.f32.mxu1 %v5163_v0 }
  0xde   :  { %4115 = vmatprep.subr.bf16.mxu1 %v5437_v27  ;;  %506 = vmatmul.mubr.f32.vlgmr.msra.gmra.mrb[4].mxu0 %v5163_v0 }
  0xdf   :  { %4097 = vmatpush1.bf16.msra.mxu0 %v5485_v58  ;;  %732 = vmatprep.mubr.f32.mxu0 %v5163_v0 }
  0xe0   :  { %4099 = vmatprep.subr.bf16.mxu0 %v5488_v59 }
  0xe1   :  { %4117 = vmatpush1.bf16.msra.mxu1 %v5462_v39 }
  0xe2   :  { %4119 = vmatprep.subr.bf16.mxu1 %v5469_v43 }
  0xe3   :  { %4101 = vmatpush1.bf16.msra.mxu0 %v5496_v2 }
  0xe4   :  { %4103 = vmatprep.subr.bf16.mxu0 %v5500_v3 }
  0xe5   :  { %4121 = vmatpush1.bf16.msra.mxu1 %v5477_v52 }
  0xe6   :  { %4123 = vmatprep.subr.bf16.mxu1 %v5481_v55 }
  0xe7   :  { %4105 = vmatpush1.bf16.msra.mxu0 %v5506_v8 }
  0xe8   :  { %4107 = vmatprep.subr.bf16.mxu0 %v5511_v9 }
  0xe9   :  { %4125 = vmatpush1.bf16.msra.mxu1 %v5491_v62 }
  0xea   :  { %4143 = vmatprep.subr.bf16.mxu1 %v5424_v16 }
  0xeb   :  { %4109 = vmatpush1.bf16.msra.mxu0 %v5517_v12 }
  0xec   :  { %4127 = vmatprep.subr.bf16.mxu0 %v5474_v49 }
 0x19f   :  { %v384_v21 = vpop.f32.mrb[0].mxu1 }
 0x1a0   :  { %v385_v22 = vadd.f32 %v384_v21, %v212_v19  ;;  %v386_v24 = vpop.f32.mrb[1].mxu1 }
 0x1a1   :  { %v387_v25 = vadd.f32 %v386_v24, %v216_v20  ;;  %v307_v35 = vpop.f32.mrb[0].mxu0 }
 0x1a2   :  { %397 = vst [vmem:[#allocation2 + $0x10] sm:$0xff] %v385_v22  ;;  %v308_v36 = vadd.f32 %v307_v35, %v204_v33  ;;  %v309_v37 = vpop.f32.mrb[1].mxu0 }
 0x1a3   :  { %398 = vst [vmem:[#allocation2 + $0x18] sm:$0xff] %v387_v25  ;;  %v390_v28 = vpop.f32.mrb[2].mxu1  ;;  %v310_v38 = vadd.f32 %v309_v37, %v208_v34 }
 0x1a4   :  { %v391_v30 = vadd.f32 %v390_v28, %v212_v19  ;;  %v392_v31 = vpop.f32.mrb[3].mxu1  ;;  %395 = vst [vmem:[#allocation2] sm:$0xff] %v308_v36 }
 0x1a5   :  { %v393_v32 = vadd.f32 %v392_v31, %v216_v20  ;;  %396 = vst [vmem:[#allocation2 + $0x8] sm:$0xff] %v310_v38  ;;  %v313_v40 = vpop.f32.mrb[2].mxu0 }
 0x1a6   :  { %401 = vst [vmem:[#allocation2 + $0x30] sm:$0xff] %v391_v30  ;;  %v314_v41 = vadd.f32 %v313_v40, %v204_v33  ;;  %v315_v42 = vpop.f32.mrb[3].mxu0 }
 0x1a7   :  { %402 = vst [vmem:[#allocation2 + $0x38] sm:$0xff] %v393_v32  ;;  %v316_v45 = vadd.f32 %v315_v42, %v208_v34 }
 0x1a8   :  { %399 = vst [vmem:[#allocation2 + $0x20] sm:$0xff] %v314_v41 }
 0x1a9   :  { %400 = vst [vmem:[#allocation2 + $0x28] sm:$0xff] %v316_v45 }
 0x1ab   :  { %v435_v13 = vld [vmem:[#allocation2] sm:$0x3] }
 0x1ac   :  { %v436_v4 = vld [vmem:[#allocation2 + $0x8] sm:$0x3] }
 0x1ad   :  { %v514_v57 = vld [vmem:[#allocation2 + $0x30] sm:$0xc0] }
 0x1ae   :  { %v515_v46 = vld [vmem:[#allocation2 + $0x38] sm:$0xc0] }
 0x1af   :  { %v582_v44 = vpop.f32.mrb[4].mxu1 }
 0x1b0   :  { %v584_v47 = vpop.f32.mrb[5].mxu1  ;;  %v589_v56 = vrot.slane %v582_v44, 2 }
 0x1b1   :  { %v590_v48 = vrot.slane %v584_v47, 2  ;;  %v507_v51 = vpop.f32.mrb[4].mxu0 }
 0x1b2   :  { %v509_v53 = vpop.f32.mrb[5].mxu0  ;;  %v593_v60 = vadd.f32 %v589_v56, %v514_v57  ;;  %v512_v14 = vadd.f32 %v507_v51, %v435_v13 }
 0x1b3   :  { %v594_v50 = vadd.f32 %v590_v48, %v515_v46  ;;  %v513_v5 = vadd.f32 %v509_v53, %v436_v4 }
 0x1b4   :  { %v3872_v61 = vmul.f32 -1.442695, %v593_v60  ;;  %v3870_v15 = vmul.f32 -1.442695, %v512_v14 }
 0x1b5   :  { %4571 = vtanh.f32 %v594_v50  ;;  %v3873_v30 = vmul.f32 -1.442695, %v594_v50  ;;  %v3871_v42 = vmul.f32 -1.442695, %v513_v5 }
 0x1b6   :  { %4573 = vpow2.f32 %v3872_v61  ;;  %v747_v61 = vld [vmem:[#allocation2 + $0x30] sm:$0x30] }
 0x1bf   :  { %v4572_v54 = vpop.eup %4571 }
 0x1c0   :  { %640 = vrot.lane.b32.xlu0 %v4572_v54, %s5165_s16  ;;  %v4574_v63 = vpop.eup %4573  ;;  %v748_v54 = vld [vmem:[#allocation2 + $0x38] sm:$0x30] }
 0x1c1   :  { %v631_v1 = vadd.f32 1.0, %v4574_v63 }
 0x1c3   :  { %4575 = vrcp.f32 %v631_v1 }
 0x1c4   :  { %4577 = vtanh.f32 %v513_v5 }
 0x1c5   :  { %4579 = vpow2.f32 %v3870_v15 }
 0x1cd   :  { %v4576_v6 = vpop.eup %4575 }
 0x1ce   :  { %v4578_v11 = vpop.eup %4577  ;;  %v638_v19 = vmul.f32 0.0, %v4576_v6 }
 0x1cf   :  { %v4580_v17 = vpop.eup %4579 }
 0x1d0   :  { %v601_v18 = vadd.f32 1.0, %v4580_v17 }
 0x1d2   :  { %4581 = vrcp.f32 %v601_v18 }
 0x1dc   :  { %v4582_v22 = vpop.eup %4581 }
 0x1dd   :  { %v608_v33 = vmul.f32 0.0, %v4582_v22 }
 0x232   :  { %v641_v7 = vpop.permute.xlu0 %640 }
 0x233   :  { %v643_v10 = vmul.f32 %v4576_v6, %v641_v7 }
 0x235   :  { %645 = vrot.lane.b32.xlu0 %v643_v10, %s5165_s16 }
 0x239   :  { %610 = vrot.lane.b32.xlu0 %v4578_v11, %s5165_s16  ;;  %v664_v11 = vld [vmem:[#allocation2 + $0x8] sm:$0xc] }
 0x2a7   :  { %v646_v20 = vpop.permute.xlu0 %645 }
 0x2a8   :  { %v5547_v21 = vadd.f32 %v646_v20, %v638_v19  ;;  %v663_v20 = vld [vmem:[#allocation2] sm:$0xc] }
 0x2aa   :  { %4583 = vtanh.f32 %v5547_v21 }
 0x2ab   :  { %v611_v24 = vpop.permute.xlu0 %610  ;;  %4585 = vpow2.f32 %v3873_v30  ;;  %v878_v30 = vrot.slane %v5547_v21, 2 }
 0x2ac   :  { %v613_v25 = vmul.f32 %v4582_v22, %v611_v24 }
 0x2ae   :  { %615 = vrot.lane.b32.xlu0 %v613_v25, %s5165_s16 }
 0x2b4   :  { %v4584_v28 = vpop.eup %4583 }
 0x2b5   :  { %651 = vrot.lane.b32.xlu1 %v4584_v28, %s5165_s16  ;;  %v4586_v31 = vpop.eup %4585 }
 0x2b6   :  { %v632_v32 = vadd.f32 1.0, %v4586_v31 }
 0x2b8   :  { %4587 = vrcp.f32 %v632_v32 }
 0x2c2   :  { %v4588_v36 = vpop.eup %4587 }
 0x320   :  { %v616_v34 = vpop.permute.xlu0 %615 }
 0x321   :  { %v5552_v35 = vadd.f32 %v616_v34, %v608_v33 }
 0x323   :  { %4589 = vtanh.f32 %v5552_v35  ;;  %v845_v21 = vrot.slane %v5552_v35, 6 }
 0x324   :  { %4591 = vpow2.f32 %v3871_v42 }
 0x327   :  { %v652_v37 = vpop.permute.xlu1 %651 }
 0x328   :  { %v5555_v38 = vmul.f32 %v4588_v36, %v652_v37 }
 0x32a   :  { %v749_v40 = vrot.slane %v5555_v38, 6 }
 0x32c   :  { %3875 = vmatmul.mubr.msk.f32.vlgmr.msra.gmra.mrb[6].mxu1 %vm437_vm4, %v749_v40 }
 0x32d   :  { %v4590_v41 = vpop.eup %4589  ;;  %4145 = vmatpush1.bf16.msra.mxu1 %v5431_v23  ;;  %1059 = vmatprep.mubr.f32.mxu1 %v5163_v0 }
 0x32e   :  { %621 = vrot.lane.b32.xlu0 %v4590_v41, %s5165_s16  ;;  %4147 = vmatprep.subr.bf16.mxu1 %v5437_v27  ;;  %v4592_v44 = vpop.eup %4591 }
 0x32f   :  { %v602_v45 = vadd.f32 1.0, %v4592_v44 }
 0x331   :  { %4149 = vmatpush1.bf16.msra.mxu1 %v5462_v39  ;;  %4593 = vrcp.f32 %v602_v45 }
 0x332   :  { %4151 = vmatprep.subr.bf16.mxu1 %v5469_v43 }
 0x335   :  { %4153 = vmatpush1.bf16.msra.mxu1 %v5477_v52 }
 0x336   :  { %4155 = vmatprep.subr.bf16.mxu1 %v5481_v55 }
 0x339   :  { %4157 = vmatpush1.bf16.msra.mxu1 %v5491_v62 }
 0x33a   :  { %4175 = vmatprep.subr.bf16.mxu1 %v5424_v16 }
 0x33b   :  { %v4594_v46 = vpop.eup %4593 }
 0x3a0   :  { %v622_v47 = vpop.permute.xlu0 %621 }
 0x3a1   :  { %v624_v48 = vmul.f32 %v4594_v46, %v622_v47 }
 0x3a3   :  { %656 = vst.msk [vmem:[#allocation3] sm:$0x3] %vm655_vm5, %v624_v48  ;;  %3874 = vmatmul.mubr.msk.f32.vlgmr.msra.gmra.mrb[6].mxu0 %vm437_vm4, %v624_v48 }
 0x3a4   :  { %4129 = vmatpush1.bf16.msra.mxu0 %v5485_v58  ;;  %975 = vmatprep.mubr.f32.mxu0 %v5163_v0 }
 0x3a5   :  { %4131 = vmatprep.subr.bf16.mxu0 %v5488_v59 }
 0x3a8   :  { %4133 = vmatpush1.bf16.msra.mxu0 %v5496_v2 }
 0x3a9   :  { %4135 = vmatprep.subr.bf16.mxu0 %v5500_v3 }
 0x3ac   :  { %4137 = vmatpush1.bf16.msra.mxu0 %v5506_v8 }
 0x3ad   :  { %4139 = vmatprep.subr.bf16.mxu0 %v5511_v9 }
 0x3b0   :  { %4141 = vmatpush1.bf16.msra.mxu0 %v5517_v12 }
 0x3b1   :  { %4159 = vmatprep.subr.bf16.mxu0 %v5474_v49 }
 0x3ff   :  { %v818_v50 = vpop.f32.mrb[6].mxu1 }
 0x400   :  { %v820_v51 = vpop.f32.mrb[7].mxu1  ;;  %v825_v60 = vrot.slane %v818_v50, 4 }
 0x401   :  { %v826_v53 = vrot.slane %v820_v51, 4 }
 0x402   :  { %v829_v63 = vadd.f32 %v825_v60, %v747_v61 }
 0x403   :  { %v830_v56 = vadd.f32 %v826_v53, %v748_v54 }
 0x404   :  { %v3878_v1 = vmul.f32 -1.442695, %v829_v63 }
 0x405   :  { %4595 = vtanh.f32 %v830_v56  ;;  %v3879_v41 = vmul.f32 -1.442695, %v830_v56 }
 0x406   :  { %4597 = vpow2.f32 %v3878_v1 }
 0x40f   :  { %v4596_v57 = vpop.eup %4595 }
 0x410   :  { %882 = vrot.lane.b32.xlu1 %v4596_v57, %s5165_s16  ;;  %v4598_v4 = vpop.eup %4597 }
 0x411   :  { %v870_v5 = vadd.f32 1.0, %v4598_v4 }
 0x413   :  { %4599 = vrcp.f32 %v870_v5 }
 0x41d   :  { %v4600_v14 = vpop.eup %4599 }
 0x41e   :  { %v880_v31 = vmul.f32 %v4600_v14, %v878_v30 }
 0x476   :  { %v734_v6 = vpop.f32.mrb[6].mxu0 }
 0x477   :  { %v736_v7 = vpop.f32.mrb[7].mxu0  ;;  %v741_v19 = vrot.slane %v734_v6, 6 }
 0x478   :  { %v742_v10 = vrot.slane %v736_v7, 6  ;;  %v991_v7 = vld [vmem:[#allocation2 + $0x38] sm:$0xc] }
 0x479   :  { %v745_v22 = vadd.f32 %v741_v19, %v663_v20 }
 0x47a   :  { %v746_v13 = vadd.f32 %v742_v10, %v664_v11 }
 0x47b   :  { %v3876_v24 = vmul.f32 -1.442695, %v745_v22 }
 0x47c   :  { %4601 = vtanh.f32 %v746_v13  ;;  %v3877_v35 = vmul.f32 -1.442695, %v746_v13 }
 0x47d   :  { %4603 = vpow2.f32 %v3876_v24 }
 0x482   :  { %v883_v15 = vpop.permute.xlu1 %882 }
 0x483   :  { %v885_v17 = vmul.f32 %v4600_v14, %v883_v15  ;;  %v990_v14 = vld [vmem:[#allocation2 + $0x30] sm:$0xc] }
 0x485   :  { %887 = vrot.lane.b32.xlu1 %v885_v17, %s5165_s16 }
 0x486   :  { %v4602_v18 = vpop.eup %4601 }
 0x487   :  { %849 = vrot.lane.b32.xlu0 %v4602_v18, %s5165_s16  ;;  %v4604_v25 = vpop.eup %4603 }
 0x488   :  { %v837_v28 = vadd.f32 1.0, %v4604_v25  ;;  %v906_v25 = vld [vmem:[#allocation2 + $0x8] sm:$0x30] }
 0x48a   :  { %4605 = vrcp.f32 %v837_v28 }
 0x494   :  { %v4606_v34 = vpop.eup %4605 }
 0x495   :  { %v847_v45 = vmul.f32 %v4606_v34, %v845_v21 }
 0x4f7   :  { %v888_v32 = vpop.permute.xlu1 %887 }
 0x4f8   :  { %v5584_v33 = vadd.f32 %v888_v32, %v880_v31 }
 0x4f9   :  { %v850_v36 = vpop.permute.xlu0 %849 }
 0x4fa   :  { %4607 = vtanh.f32 %v5584_v33  ;;  %v852_v37 = vmul.f32 %v4606_v34, %v850_v36  ;;  %v1121_v21 = vrot.slane %v5584_v33, 2 }
 0x4fb   :  { %4609 = vpow2.f32 %v3879_v41 }
 0x4fc   :  { %854 = vrot.lane.b32.xlu0 %v852_v37, %s5165_s16  ;;  %v905_v37 = vld [vmem:[#allocation2] sm:$0x30] }
 0x504   :  { %v4608_v40 = vpop.eup %4607 }
 0x505   :  { %893 = vrot.lane.b32.xlu1 %v4608_v40, %s5165_s16  ;;  %v4610_v42 = vpop.eup %4609 }
 0x506   :  { %v871_v44 = vadd.f32 1.0, %v4610_v42 }
 0x508   :  { %4611 = vrcp.f32 %v871_v44 }
 0x512   :  { %v4612_v48 = vpop.eup %4611 }
 0x56e   :  { %v855_v46 = vpop.permute.xlu0 %854 }
 0x56f   :  { %v5590_v47 = vadd.f32 %v855_v46, %v847_v45 }
 0x571   :  { %4613 = vtanh.f32 %v5590_v47  ;;  %v1088_v33 = vrot.slane %v5590_v47, 6 }
 0x572   :  { %4615 = vpow2.f32 %v3877_v35 }
 0x577   :  { %v894_v50 = vpop.permute.xlu1 %893 }
 0x578   :  { %v5593_v51 = vmul.f32 %v4612_v48, %v894_v50 }
 0x57a   :  { %v992_v53 = vrot.slane %v5593_v51, 4 }
 0x57b   :  { %v4614_v54 = vpop.eup %4613 }
 0x57c   :  { %3881 = vmatmul.mubr.msk.f32.vlgmr.msra.gmra.mrb[8].mxu1 %vm437_vm4, %v992_v53  ;;  %860 = vrot.lane.b32.xlu0 %v4614_v54, %s5165_s16  ;;  %v4616_v56 = vpop.eup %4615 }
 0x57d   :  { %4177 = vmatpush1.bf16.msra.mxu1 %v5431_v23  ;;  %1302 = vmatprep.mubr.f32.mxu1 %v5163_v0  ;;  %v838_v57 = vadd.f32 1.0, %v4616_v56 }
 0x57e   :  { %4179 = vmatprep.subr.bf16.mxu1 %v5437_v27 }
 0x57f   :  { %4617 = vrcp.f32 %v838_v57 }
 0x581   :  { %4181 = vmatpush1.bf16.msra.mxu1 %v5462_v39 }
 0x582   :  { %4183 = vmatprep.subr.bf16.mxu1 %v5469_v43 }
 0x585   :  { %4185 = vmatpush1.bf16.msra.mxu1 %v5477_v52 }
 0x586   :  { %4187 = vmatprep.subr.bf16.mxu1 %v5481_v55 }
 0x589   :  { %4189 = vmatpush1.bf16.msra.mxu1 %v5491_v62  ;;  %v4618_v60 = vpop.eup %4617 }
 0x58a   :  { %4207 = vmatprep.subr.bf16.mxu1 %v5424_v16 }
 0x5ee   :  { %v861_v61 = vpop.permute.xlu0 %860 }
 0x5ef   :  { %v863_v63 = vmul.f32 %v4618_v60, %v861_v61 }
 0x5f1   :  { %898 = vst.msk [vmem:[#allocation3] sm:$0xc] %vm897_vm6, %v863_v63  ;;  %v908_v1 = vrot.slane %v863_v63, 2 }
 0x5f3   :  { %3880 = vmatmul.mubr.msk.f32.vlgmr.msra.gmra.mrb[8].mxu0 %vm437_vm4, %v908_v1 }
 0x5f4   :  { %4161 = vmatpush1.bf16.msra.mxu0 %v5485_v58  ;;  %1218 = vmatprep.mubr.f32.mxu0 %v5163_v0 }
 0x5f5   :  { %4163 = vmatprep.subr.bf16.mxu0 %v5488_v59 }
 0x5f8   :  { %4165 = vmatpush1.bf16.msra.mxu0 %v5496_v2 }
 0x5f9   :  { %4167 = vmatprep.subr.bf16.mxu0 %v5500_v3 }
 0x5fc   :  { %4169 = vmatpush1.bf16.msra.mxu0 %v5506_v8 }
 0x5fd   :  { %4171 = vmatprep.subr.bf16.mxu0 %v5511_v9 }
 0x600   :  { %4173 = vmatpush1.bf16.msra.mxu0 %v5517_v12 }
 0x601   :  { %4191 = vmatprep.subr.bf16.mxu0 %v5474_v49 }
 0x64f   :  { %v1061_v4 = vpop.f32.mrb[8].mxu1 }
 0x650   :  { %v1063_v5 = vpop.f32.mrb[9].mxu1  ;;  %v1068_v13 = vrot.slane %v1061_v4, 6 }
 0x651   :  { %v1069_v6 = vrot.slane %v1063_v5, 6 }
 0x652   :  { %v1072_v15 = vadd.f32 %v1068_v13, %v990_v14 }
 0x653   :  { %v1073_v10 = vadd.f32 %v1069_v6, %v991_v7 }
 0x654   :  { %v3884_v17 = vmul.f32 -1.442695, %v1072_v15 }
 0x655   :  { %4619 = vtanh.f32 %v1073_v10  ;;  %v3885_v56 = vmul.f32 -1.442695, %v1073_v10 }
 0x656   :  { %4621 = vpow2.f32 %v3884_v17 }
 0x65f   :  { %v4620_v11 = vpop.eup %4619 }
 0x660   :  { %1125 = vrot.lane.b32.xlu1 %v4620_v11, %s5165_s16  ;;  %v4622_v18 = vpop.eup %4621 }
 0x661   :  { %v1113_v19 = vadd.f32 1.0, %v4622_v18 }
 0x663   :  { %4623 = vrcp.f32 %v1113_v19 }
 0x66d   :  { %v4624_v30 = vpop.eup %4623 }
 0x66e   :  { %v1123_v45 = vmul.f32 %v4624_v30, %v1121_v21 }
 0x6c6   :  { %v977_v20 = vpop.f32.mrb[8].mxu0 }
 0x6c7   :  { %v979_v22 = vpop.f32.mrb[9].mxu0  ;;  %v984_v36 = vrot.slane %v977_v20, 4  ;;  %v1234_v20 = vld [vmem:[#allocation2 + $0x38] sm:$0x3] }
 0x6c8   :  { %v985_v24 = vrot.slane %v979_v22, 4 }
 0x6c9   :  { %v988_v40 = vadd.f32 %v984_v36, %v905_v37 }
 0x6ca   :  { %v989_v28 = vadd.f32 %v985_v24, %v906_v25 }
 0x6cb   :  { %v3882_v41 = vmul.f32 -1.442695, %v988_v40 }
 0x6cc   :  { %4625 = vtanh.f32 %v989_v28  ;;  %v3883_v47 = vmul.f32 -1.442695, %v989_v28  ;;  %v1233_v28 = vld [vmem:[#allocation2 + $0x30] sm:$0x3] }
 0x6cd   :  { %4627 = vpow2.f32 %v3882_v41  ;;  %v1149_v41 = vld [vmem:[#allocation2 + $0x8] sm:$0xc0] }
 0x6d2   :  { %v1126_v31 = vpop.permute.xlu1 %1125 }
 0x6d3   :  { %v1128_v32 = vmul.f32 %v4624_v30, %v1126_v31 }
 0x6d5   :  { %1130 = vrot.lane.b32.xlu1 %v1128_v32, %s5165_s16 }
 0x6d6   :  { %v4626_v34 = vpop.eup %4625 }
 0x6d7   :  { %1092 = vrot.lane.b32.xlu0 %v4626_v34, %s5165_s16  ;;  %v4628_v42 = vpop.eup %4627 }
 0x6d8   :  { %v1080_v44 = vadd.f32 1.0, %v4628_v42 }
 0x6da   :  { %4629 = vrcp.f32 %v1080_v44 }
 0x6e4   :  { %v4630_v50 = vpop.eup %4629 }
 0x6e5   :  { %v1090_v61 = vmul.f32 %v4630_v50, %v1088_v33 }
 0x747   :  { %v1131_v46 = vpop.permute.xlu1 %1130 }
 0x748   :  { %v5622_v48 = vadd.f32 %v1131_v46, %v1123_v45 }
 0x749   :  { %v1093_v53 = vpop.permute.xlu0 %1092 }
 0x74a   :  { %4631 = vtanh.f32 %v5622_v48  ;;  %v1095_v54 = vmul.f32 %v4630_v50, %v1093_v53  ;;  %v1148_v53 = vld [vmem:[#allocation2] sm:$0xc0] }
 0x74b   :  { %4633 = vpow2.f32 %v3885_v56 }
 0x74c   :  { %1097 = vrot.lane.b32.xlu0 %v1095_v54, %s5165_s16 }
 0x754   :  { %v4632_v35 = vpop.eup %4631 }
 0x755   :  { %1136 = vrot.lane.b32.xlu1 %v4632_v35, %s5165_s16  ;;  %v4634_v57 = vpop.eup %4633 }
 0x756   :  { %v1114_v60 = vadd.f32 1.0, %v4634_v57 }
 0x758   :  { %4635 = vrcp.f32 %v1114_v60  ;;  %v1358_v60 = vrot.slane %v5622_v48, 2 }
 0x762   :  { %v4636_v4 = vpop.eup %4635 }
 0x7be   :  { %v1098_v63 = vpop.permute.xlu0 %1097 }
 0x7bf   :  { %v5628_v1 = vadd.f32 %v1098_v63, %v1090_v61 }
 0x7c1   :  { %4637 = vtanh.f32 %v5628_v1  ;;  %v1325_v48 = vrot.slane %v5628_v1, 6 }
 0x7c2   :  { %4639 = vpow2.f32 %v3883_v47 }
 0x7c7   :  { %v1137_v5 = vpop.permute.xlu1 %1136 }
 0x7c8   :  { %v5631_v6 = vmul.f32 %v4636_v4, %v1137_v5 }
 0x7ca   :  { %v1235_v7 = vrot.slane %v5631_v6, 2 }
 0x7cb   :  { %v4638_v11 = vpop.eup %4637 }
 0x7cc   :  { %3887 = vmatmul.mubr.msk.f32.vlgmr.msra.gmra.mrb[10].mxu1 %vm437_vm4, %v1235_v7  ;;  %1103 = vrot.lane.b32.xlu0 %v4638_v11, %s5165_s16  ;;  %v4640_v10 = vpop.eup %4639 }
 0x7cd   :  { %4209 = vmatpush1.bf16.msra.mxu1 %v5431_v23  ;;  %1532 = vmatprep.mubr.f32.mxu1 %v5163_v0  ;;  %v1081_v13 = vadd.f32 1.0, %v4640_v10 }
 0x7ce   :  { %4211 = vmatprep.subr.bf16.mxu1 %v5437_v27 }
 0x7cf   :  { %4641 = vrcp.f32 %v1081_v13 }
 0x7d1   :  { %4213 = vmatpush1.bf16.msra.mxu1 %v5462_v39 }
 0x7d2   :  { %4215 = vmatprep.subr.bf16.mxu1 %v5469_v43 }
 0x7d5   :  { %4217 = vmatpush1.bf16.msra.mxu1 %v5477_v52 }
 0x7d6   :  { %4219 = vmatprep.subr.bf16.mxu1 %v5481_v55 }
 0x7d9   :  { %4221 = vmatpush1.bf16.msra.mxu1 %v5491_v62  ;;  %v4642_v14 = vpop.eup %4641 }
 0x7da   :  { %4239 = vmatprep.subr.bf16.mxu1 %v5424_v16 }
 0x83e   :  { %v1104_v15 = vpop.permute.xlu0 %1103 }
 0x83f   :  { %v1106_v17 = vmul.f32 %v4642_v14, %v1104_v15 }
 0x841   :  { %1141 = vst.msk [vmem:[#allocation3] sm:$0x30] %vm1140_vm7, %v1106_v17  ;;  %v1151_v18 = vrot.slane %v1106_v17, 4 }
 0x843   :  { %3886 = vmatmul.mubr.msk.f32.vlgmr.msra.gmra.mrb[10].mxu0 %vm437_vm4, %v1151_v18 }
 0x844   :  { %4193 = vmatpush1.bf16.msra.mxu0 %v5485_v58  ;;  %1455 = vmatprep.mubr.f32.mxu0 %v5163_v0 }
 0x845   :  { %4195 = vmatprep.subr.bf16.mxu0 %v5488_v59 }
 0x848   :  { %4197 = vmatpush1.bf16.msra.mxu0 %v5496_v2 }
 0x849   :  { %4199 = vmatprep.subr.bf16.mxu0 %v5500_v3 }
 0x84c   :  { %4201 = vmatpush1.bf16.msra.mxu0 %v5506_v8 }
 0x84d   :  { %4203 = vmatprep.subr.bf16.mxu0 %v5511_v9 }
 0x850   :  { %4205 = vmatpush1.bf16.msra.mxu0 %v5517_v12 }
 0x851   :  { %4223 = vmatprep.subr.bf16.mxu0 %v5474_v49 }
 0x89f   :  { %v1304_v19 = vpop.f32.mrb[10].mxu1 }
 0x8a0   :  { %v1306_v22 = vpop.f32.mrb[11].mxu1  ;;  %v1309_v30 = vadd.f32 %v1304_v19, %v1233_v28 }
 0x8a1   :  { %v1310_v24 = vadd.f32 %v1306_v22, %v1234_v20 }
 0x8a2   :  { %v3890_v31 = vmul.f32 -1.442695, %v1309_v30 }
 0x8a3   :  { %4643 = vtanh.f32 %v1310_v24  ;;  %v3891_v47 = vmul.f32 -1.442695, %v1310_v24 }
 0x8a4   :  { %4645 = vpow2.f32 %v3890_v31 }
 0x8ad   :  { %v4644_v25 = vpop.eup %4643 }
 0x8ae   :  { %1362 = vrot.lane.b32.xlu1 %v4644_v25, %s5165_s16  ;;  %v4646_v32 = vpop.eup %4645 }
 0x8af   :  { %v1350_v34 = vadd.f32 1.0, %v4646_v32 }
 0x8b1   :  { %4647 = vrcp.f32 %v1350_v34 }
 0x8bb   :  { %v4648_v44 = vpop.eup %4647 }
 0x8bc   :  { %v1360_v33 = vmul.f32 %v4648_v44, %v1358_v60 }
 0x916   :  { %v1220_v36 = vpop.f32.mrb[10].mxu0 }
 0x917   :  { %v1222_v37 = vpop.f32.mrb[11].mxu0  ;;  %v1227_v50 = vrot.slane %v1220_v36, 2 }
 0x918   :  { %v1228_v40 = vrot.slane %v1222_v37, 2 }
 0x919   :  { %v1231_v54 = vadd.f32 %v1227_v50, %v1148_v53 }
 0x91a   :  { %v1232_v42 = vadd.f32 %v1228_v40, %v1149_v41  ;;  %v1465_v40 = vld [vmem:[#allocation2 + $0x18] sm:$0xc0] }
 0x91b   :  { %v3888_v35 = vmul.f32 -1.442695, %v1231_v54 }
 0x91c   :  { %4649 = vtanh.f32 %v1232_v42  ;;  %v3889_v22 = vmul.f32 -1.442695, %v1232_v42 }
 0x91d   :  { %4651 = vpow2.f32 %v3888_v35  ;;  %v1386_v35 = vld [vmem:[#allocation2 + $0x28] sm:$0x3] }
 0x920   :  { %v1363_v21 = vpop.permute.xlu1 %1362 }
 0x921   :  { %v1365_v45 = vmul.f32 %v4648_v44, %v1363_v21  ;;  %v1464_v21 = vld [vmem:[#allocation2 + $0x10] sm:$0xc0] }
 0x923   :  { %1367 = vrot.lane.b32.xlu1 %v1365_v45, %s5165_s16 }
 0x926   :  { %v4650_v46 = vpop.eup %4649 }
 0x927   :  { %1329 = vrot.lane.b32.xlu0 %v4650_v46, %s5165_s16  ;;  %v4652_v56 = vpop.eup %4651 }
 0x928   :  { %v1317_v57 = vadd.f32 1.0, %v4652_v56 }
 0x92a   :  { %4653 = vrcp.f32 %v1317_v57 }
 0x934   :  { %v4654_v4 = vpop.eup %4653 }
 0x935   :  { %v1327_v14 = vmul.f32 %v4654_v4, %v1325_v48 }
 0x995   :  { %v1368_v61 = vpop.permute.xlu1 %1367 }
 0x996   :  { %v5660_v63 = vadd.f32 %v1368_v61, %v1360_v33 }
 0x998   :  { %4655 = vtanh.f32 %v5660_v63 }
 0x999   :  { %v1330_v5 = vpop.permute.xlu0 %1329  ;;  %4657 = vpow2.f32 %v3891_v47 }
 0x99a   :  { %v1332_v7 = vmul.f32 %v4654_v4, %v1330_v5  ;;  %v1385_v5 = vld [vmem:[#allocation2 + $0x20] sm:$0x3] }
 0x99c   :  { %1334 = vrot.lane.b32.xlu0 %v1332_v7, %s5165_s16 }
 0x9a2   :  { %v4656_v11 = vpop.eup %4655 }
 0x9a3   :  { %1373 = vrot.lane.b32.xlu1 %v4656_v11, %s5165_s16  ;;  %v4658_v10 = vpop.eup %4657 }
 0x9a4   :  { %v1351_v13 = vadd.f32 1.0, %v4658_v10 }
 0x9a6   :  { %4659 = vrcp.f32 %v1351_v13  ;;  %v1594_v13 = vrot.slane %v5660_v63, 2 }
 0x9b0   :  { %v4660_v18 = vpop.eup %4659 }
 0xa0e   :  { %v1335_v15 = vpop.permute.xlu0 %1334 }
 0xa0f   :  { %v5666_v17 = vadd.f32 %v1335_v15, %v1327_v14 }
 0xa11   :  { %4661 = vtanh.f32 %v5666_v17  ;;  %v1561_v63 = vrot.slane %v5666_v17, 6 }
 0xa12   :  { %4663 = vpow2.f32 %v3889_v22 }
 0xa15   :  { %v1374_v19 = vpop.permute.xlu1 %1373 }
 0xa16   :  { %v5669_v20 = vmul.f32 %v4660_v18, %v1374_v19 }
 0xa18   :  { %3893 = vmatmul.mubr.msk.f32.vlgmr.msra.gmra.mrb[12].mxu1 %vm437_vm4, %v5669_v20 }
 0xa19   :  { %4241 = vmatpush1.bf16.msra.mxu1 %v5431_v23  ;;  %1772 = vmatprep.mubr.f32.mxu1 %v5163_v0 }
 0xa1a   :  { %4243 = vmatprep.subr.bf16.mxu1 %v5437_v27 }
 0xa1b   :  { %v4662_v1 = vpop.eup %4661 }
 0xa1c   :  { %1340 = vrot.lane.b32.xlu0 %v4662_v1, %s5165_s16  ;;  %v4664_v24 = vpop.eup %4663 }
 0xa1d   :  { %4245 = vmatpush1.bf16.msra.mxu1 %v5462_v39  ;;  %v1318_v25 = vadd.f32 1.0, %v4664_v24 }
 0xa1e   :  { %4247 = vmatprep.subr.bf16.mxu1 %v5469_v43 }
 0xa1f   :  { %4665 = vrcp.f32 %v1318_v25 }
 0xa21   :  { %4249 = vmatpush1.bf16.msra.mxu1 %v5477_v52 }
 0xa22   :  { %4251 = vmatprep.subr.bf16.mxu1 %v5481_v55 }
 0xa25   :  { %4253 = vmatpush1.bf16.msra.mxu1 %v5491_v62 }
 0xa26   :  { %4271 = vmatprep.subr.bf16.mxu1 %v5424_v16 }
 0xa29   :  { %v4666_v28 = vpop.eup %4665 }
 0xa8e   :  { %v1341_v30 = vpop.permute.xlu0 %1340 }
 0xa8f   :  { %v1343_v31 = vmul.f32 %v4666_v28, %v1341_v30 }
 0xa91   :  { %1378 = vst.msk [vmem:[#allocation3] sm:$0xc0] %vm1377_vm8, %v1343_v31  ;;  %v1388_v32 = vrot.slane %v1343_v31, 6 }
 0xa93   :  { %3892 = vmatmul.mubr.msk.f32.vlgmr.msra.gmra.mrb[12].mxu0 %vm437_vm4, %v1388_v32 }
 0xa94   :  { %4225 = vmatpush1.bf16.msra.mxu0 %v5485_v58  ;;  %1688 = vmatprep.mubr.f32.mxu0 %v5163_v0 }
 0xa95   :  { %4227 = vmatprep.subr.bf16.mxu0 %v5488_v59 }
 0xa98   :  { %4229 = vmatpush1.bf16.msra.mxu0 %v5496_v2 }
 0xa99   :  { %4231 = vmatprep.subr.bf16.mxu0 %v5500_v3 }
 0xa9c   :  { %4233 = vmatpush1.bf16.msra.mxu0 %v5506_v8 }
 0xa9d   :  { %4235 = vmatprep.subr.bf16.mxu0 %v5511_v9 }
 0xaa0   :  { %4237 = vmatpush1.bf16.msra.mxu0 %v5517_v12 }
 0xaa1   :  { %4255 = vmatprep.subr.bf16.mxu0 %v5474_v49 }
 0xaeb   :  { %v1534_v34 = vpop.f32.mrb[12].mxu1 }
 0xaec   :  { %v1536_v36 = vpop.f32.mrb[13].mxu1  ;;  %v1541_v44 = vrot.slane %v1534_v34, 2 }
 0xaed   :  { %v1542_v37 = vrot.slane %v1536_v36, 2 }
 0xaee   :  { %v1545_v45 = vadd.f32 %v1541_v44, %v1464_v21 }
 0xaef   :  { %v1546_v41 = vadd.f32 %v1542_v37, %v1465_v40 }
 0xaf0   :  { %v3896_v46 = vmul.f32 -1.442695, %v1545_v45 }
 0xaf1   :  { %4667 = vtanh.f32 %v1546_v41  ;;  %v3897_v24 = vmul.f32 -1.442695, %v1546_v41 }
 0xaf2   :  { %4669 = vpow2.f32 %v3896_v46 }
 0xafb   :  { %v4668_v42 = vpop.eup %4667 }
 0xafc   :  { %1598 = vrot.lane.b32.xlu1 %v4668_v42, %s5165_s16  ;;  %v4670_v50 = vpop.eup %4669 }
 0xafd   :  { %v1586_v53 = vadd.f32 1.0, %v4670_v50 }
 0xaff   :  { %4671 = vrcp.f32 %v1586_v53 }
 0xb09   :  { %v4672_v60 = vpop.eup %4671 }
 0xb0a   :  { %v1596_v48 = vmul.f32 %v4672_v60, %v1594_v13 }
 0xb66   :  { %v1457_v54 = vpop.f32.mrb[12].mxu0 }
 0xb67   :  { %v1459_v56 = vpop.f32.mrb[13].mxu0  ;;  %v1462_v7 = vadd.f32 %v1457_v54, %v1385_v5  ;;  %v1704_v54 = vld [vmem:[#allocation2 + $0x18] sm:$0x30] }
 0xb68   :  { %v1463_v57 = vadd.f32 %v1459_v56, %v1386_v35 }
 0xb69   :  { %v3894_v11 = vmul.f32 -1.442695, %v1462_v7 }
 0xb6a   :  { %4673 = vtanh.f32 %v1463_v57  ;;  %v3895_v17 = vmul.f32 -1.442695, %v1463_v57 }
 0xb6b   :  { %4675 = vpow2.f32 %v3894_v11 }
 0xb6e   :  { %v1599_v33 = vpop.permute.xlu1 %1598 }
 0xb6f   :  { %v1601_v61 = vmul.f32 %v4672_v60, %v1599_v33  ;;  %v1703_v60 = vld [vmem:[#allocation2 + $0x10] sm:$0x30] }
 0xb71   :  { %1603 = vrot.lane.b32.xlu1 %v1601_v61, %s5165_s16 }
 0xb74   :  { %v4674_v4 = vpop.eup %4673 }
 0xb75   :  { %1565 = vrot.lane.b32.xlu0 %v4674_v4, %s5165_s16  ;;  %v4676_v47 = vpop.eup %4675 }
 0xb76   :  { %v1553_v10 = vadd.f32 1.0, %v4676_v47  ;;  %v1620_v47 = vld [vmem:[#allocation2 + $0x28] sm:$0xc] }
 0xb78   :  { %4677 = vrcp.f32 %v1553_v10 }
 0xb82   :  { %v4678_v18 = vpop.eup %4677 }
 0xb83   :  { %v1563_v30 = vmul.f32 %v4678_v18, %v1561_v63 }
 0xbe3   :  { %v1604_v14 = vpop.permute.xlu1 %1603 }
 0xbe4   :  { %v5698_v15 = vadd.f32 %v1604_v14, %v1596_v48 }
 0xbe6   :  { %4679 = vtanh.f32 %v5698_v15  ;;  %v1834_v63 = vrot.slane %v5698_v15, 2 }
 0xbe7   :  { %v1566_v19 = vpop.permute.xlu0 %1565  ;;  %4681 = vpow2.f32 %v3897_v24 }
 0xbe8   :  { %v1568_v1 = vmul.f32 %v4678_v18, %v1566_v19 }
 0xbea   :  { %1570 = vrot.lane.b32.xlu0 %v1568_v1, %s5165_s16  ;;  %v1619_v1 = vld [vmem:[#allocation2 + $0x20] sm:$0xc] }
 0xbf0   :  { %v4680_v22 = vpop.eup %4679 }
 0xbf1   :  { %1609 = vrot.lane.b32.xlu1 %v4680_v22, %s5165_s16  ;;  %v4682_v25 = vpop.eup %4681 }
 0xbf2   :  { %v1587_v28 = vadd.f32 1.0, %v4682_v25 }
 0xbf4   :  { %4683 = vrcp.f32 %v1587_v28 }
 0xbfe   :  { %v4684_v34 = vpop.eup %4683 }
 0xc5c   :  { %v1571_v31 = vpop.permute.xlu0 %1570 }
 0xc5d   :  { %v5704_v32 = vadd.f32 %v1571_v31, %v1563_v30 }
 0xc5f   :  { %4685 = vtanh.f32 %v5704_v32  ;;  %v1801_v15 = vrot.slane %v5704_v32, 6 }
 0xc60   :  { %4687 = vpow2.f32 %v3895_v17 }
 0xc63   :  { %v1610_v36 = vpop.permute.xlu1 %1609 }
 0xc64   :  { %v5707_v37 = vmul.f32 %v4684_v34, %v1610_v36 }
 0xc66   :  { %v1705_v40 = vrot.slane %v5707_v37, 6 }
 0xc68   :  { %3899 = vmatmul.mubr.msk.f32.vlgmr.msra.gmra.mrb[14].mxu1 %vm437_vm4, %v1705_v40 }
 0xc69   :  { %v4686_v41 = vpop.eup %4685  ;;  %4273 = vmatpush1.bf16.msra.mxu1 %v5431_v23  ;;  %2013 = vmatprep.mubr.f32.mxu1 %v5163_v0 }
 0xc6a   :  { %1576 = vrot.lane.b32.xlu0 %v4686_v41, %s5165_s16  ;;  %4275 = vmatprep.subr.bf16.mxu1 %v5437_v27  ;;  %v4688_v42 = vpop.eup %4687 }
 0xc6b   :  { %v1554_v44 = vadd.f32 1.0, %v4688_v42 }
 0xc6d   :  { %4277 = vmatpush1.bf16.msra.mxu1 %v5462_v39  ;;  %4689 = vrcp.f32 %v1554_v44 }
 0xc6e   :  { %4279 = vmatprep.subr.bf16.mxu1 %v5469_v43 }
 0xc71   :  { %4281 = vmatpush1.bf16.msra.mxu1 %v5477_v52 }
 0xc72   :  { %4283 = vmatprep.subr.bf16.mxu1 %v5481_v55 }
 0xc75   :  { %4285 = vmatpush1.bf16.msra.mxu1 %v5491_v62 }
 0xc76   :  { %4303 = vmatprep.subr.bf16.mxu1 %v5424_v16 }
 0xc77   :  { %v4690_v21 = vpop.eup %4689 }
 0xcdc   :  { %v1577_v45 = vpop.permute.xlu0 %1576 }
 0xcdd   :  { %v5721_v46 = vmul.f32 %v4690_v21, %v1577_v45 }
 0xcdf   :  { %3898 = vmatmul.mubr.msk.f32.vlgmr.msra.gmra.mrb[14].mxu0 %vm437_vm4, %v5721_v46 }
 0xce0   :  { %4257 = vmatpush1.bf16.msra.mxu0 %v5485_v58  ;;  %1929 = vmatprep.mubr.f32.mxu0 %v5163_v0 }
 0xce1   :  { %4259 = vmatprep.subr.bf16.mxu0 %v5488_v59 }
 0xce4   :  { %4261 = vmatpush1.bf16.msra.mxu0 %v5496_v2 }
 0xce5   :  { %4263 = vmatprep.subr.bf16.mxu0 %v5500_v3 }
 0xce8   :  { %4265 = vmatpush1.bf16.msra.mxu0 %v5506_v8 }
 0xce9   :  { %4267 = vmatprep.subr.bf16.mxu0 %v5511_v9 }
 0xcec   :  { %4269 = vmatpush1.bf16.msra.mxu0 %v5517_v12 }
 0xced   :  { %4287 = vmatprep.subr.bf16.mxu0 %v5474_v49 }
 0xd3b   :  { %v1774_v16 = vpop.f32.mrb[14].mxu1 }
 0xd3c   :  { %v1776_v50 = vpop.f32.mrb[15].mxu1  ;;  %v1781_v57 = vrot.slane %v1774_v16, 4 }
 0xd3d   :  { %v1782_v53 = vrot.slane %v1776_v50, 4 }
 0xd3e   :  { %v1785_v33 = vadd.f32 %v1781_v57, %v1703_v60 }
 0xd3f   :  { %v1786_v35 = vadd.f32 %v1782_v53, %v1704_v54 }
 0xd40   :  { %v3902_v61 = vmul.f32 -1.442695, %v1785_v33 }
 0xd41   :  { %4691 = vtanh.f32 %v1786_v35  ;;  %v3903_v42 = vmul.f32 -1.442695, %v1786_v35 }
 0xd42   :  { %4693 = vpow2.f32 %v3902_v61 }
 0xd4b   :  { %v4692_v56 = vpop.eup %4691 }
 0xd4c   :  { %1838 = vrot.lane.b32.xlu1 %v4692_v56, %s5165_s16  ;;  %v4694_v4 = vpop.eup %4693 }
 0xd4d   :  { %v1826_v5 = vadd.f32 1.0, %v4694_v4 }
 0xd4f   :  { %4695 = vrcp.f32 %v1826_v5  ;;  %v1944_v5 = vld [vmem:[#allocation2 + $0x10] sm:$0xc] }
 0xd59   :  { %v4696_v13 = vpop.eup %4695 }
 0xd5a   :  { %v1836_v30 = vmul.f32 %v4696_v13, %v1834_v63 }
 0xdb2   :  { %v1690_v7 = vpop.f32.mrb[14].mxu0 }
 0xdb3   :  { %v1692_v11 = vpop.f32.mrb[15].mxu0  ;;  %v1697_v19 = vrot.slane %v1690_v7, 6 }
 0xdb4   :  { %v1698_v49 = vrot.slane %v1692_v11, 6 }
 0xdb5   :  { %v1701_v22 = vadd.f32 %v1697_v19, %v1619_v1  ;;  %v1859_v19 = vld [vmem:[#allocation2 + $0x20] sm:$0x30] }
 0xdb6   :  { %v1702_v10 = vadd.f32 %v1698_v49, %v1620_v47  ;;  %v1860_v49 = vld [vmem:[#allocation2 + $0x28] sm:$0x30] }
 0xdb7   :  { %v3900_v24 = vmul.f32 -1.442695, %v1701_v22 }
 0xdb8   :  { %4697 = vtanh.f32 %v1702_v10  ;;  %v3901_v32 = vmul.f32 -1.442695, %v1702_v10 }
 0xdb9   :  { %4699 = vpow2.f32 %v3900_v24 }
 0xdbe   :  { %v1839_v48 = vpop.permute.xlu1 %1838 }
 0xdbf   :  { %v1841_v14 = vmul.f32 %v4696_v13, %v1839_v48 }
 0xdc1   :  { %1843 = vrot.lane.b32.xlu1 %v1841_v14, %s5165_s16 }
 0xdc2   :  { %v4698_v18 = vpop.eup %4697 }
 0xdc3   :  { %1805 = vrot.lane.b32.xlu0 %v4698_v18, %s5165_s16  ;;  %v4700_v25 = vpop.eup %4699 }
 0xdc4   :  { %v1793_v28 = vadd.f32 1.0, %v4700_v25 }
 0xdc6   :  { %4701 = vrcp.f32 %v1793_v28 }
 0xdd0   :  { %v4702_v36 = vpop.eup %4701 }
 0xdd1   :  { %v1803_v45 = vmul.f32 %v4702_v36, %v1801_v15 }
 0xe33   :  { %v1844_v31 = vpop.permute.xlu1 %1843 }
 0xe34   :  { %v5738_v34 = vadd.f32 %v1844_v31, %v1836_v30 }
 0xe35   :  { %v1806_v40 = vpop.permute.xlu0 %1805 }
 0xe36   :  { %4703 = vtanh.f32 %v5738_v34  ;;  %v1808_v41 = vmul.f32 %v4702_v36, %v1806_v40  ;;  %v2075_v28 = vrot.slane %v5738_v34, 2 }
 0xe37   :  { %4705 = vpow2.f32 %v3903_v42 }
 0xe38   :  { %1810 = vrot.lane.b32.xlu0 %v1808_v41, %s5165_s16 }
 0xe40   :  { %v4704_v17 = vpop.eup %4703 }
 0xe41   :  { %1849 = vrot.lane.b32.xlu1 %v4704_v17, %s5165_s16  ;;  %v4706_v44 = vpop.eup %4705 }
 0xe42   :  { %v1827_v21 = vadd.f32 1.0, %v4706_v44 }
 0xe44   :  { %4707 = vrcp.f32 %v1827_v21 }
 0xe4e   :  { %v4708_v53 = vpop.eup %4707 }
 0xeaa   :  { %v1811_v16 = vpop.permute.xlu0 %1810 }
 0xeab   :  { %v5744_v50 = vadd.f32 %v1811_v16, %v1803_v45 }
 0xead   :  { %4709 = vtanh.f32 %v5744_v50  ;;  %v2042_v34 = vrot.slane %v5744_v50, 6 }
 0xeae   :  { %4711 = vpow2.f32 %v3901_v32 }
 0xeb3   :  { %v1850_v54 = vpop.permute.xlu1 %1849 }
 0xeb4   :  { %v5747_v56 = vmul.f32 %v4708_v53, %v1850_v54 }
 0xeb6   :  { %v1946_v57 = vrot.slane %v5747_v56, 4 }
 0xeb7   :  { %v4710_v60 = vpop.eup %4709 }
 0xeb8   :  { %3905 = vmatmul.mubr.msk.f32.vlgmr.msra.gmra.mrb[16].mxu1 %vm437_vm4, %v1946_v57  ;;  %1816 = vrot.lane.b32.xlu0 %v4710_v60, %s5165_s16  ;;  %v4712_v35 = vpop.eup %4711 }
 0xeb9   :  { %4305 = vmatpush1.bf16.msra.mxu1 %v5431_v23  ;;  %2254 = vmatprep.mubr.f32.mxu1 %v5163_v0  ;;  %v1794_v33 = vadd.f32 1.0, %v4712_v35 }
 0xeba   :  { %4307 = vmatprep.subr.bf16.mxu1 %v5437_v27 }
 0xebb   :  { %4713 = vrcp.f32 %v1794_v33 }
 0xebd   :  { %4309 = vmatpush1.bf16.msra.mxu1 %v5462_v39 }
 0xebe   :  { %4311 = vmatprep.subr.bf16.mxu1 %v5469_v43 }
 0xec1   :  { %4313 = vmatpush1.bf16.msra.mxu1 %v5477_v52 }
 0xec2   :  { %4315 = vmatprep.subr.bf16.mxu1 %v5481_v55  ;;  %v1945_v55 = vld [vmem:[#allocation2 + $0x18] sm:$0xc] }
 0xec5   :  { %4317 = vmatpush1.bf16.msra.mxu1 %v5491_v62  ;;  %v4714_v23 = vpop.eup %4713 }
 0xf2a   :  { %v1817_v61 = vpop.permute.xlu0 %1816 }
 0xf2b   :  { %v5760_v4 = vmul.f32 %v4714_v23, %v1817_v61 }
 0xf2d   :  { %v1862_v27 = vrot.slane %v5760_v4, 2 }
 0xf2f   :  { %3904 = vmatmul.mubr.msk.f32.vlgmr.msra.gmra.mrb[16].mxu0 %vm437_vm4, %v1862_v27 }
 0xf30   :  { %4289 = vmatpush1.bf16.msra.mxu0 %v5485_v58  ;;  %2170 = vmatprep.mubr.f32.mxu0 %v5163_v0 }
 0xf31   :  { %4291 = vmatprep.subr.bf16.mxu0 %v5488_v59 }
 0xf34   :  { %4293 = vmatpush1.bf16.msra.mxu0 %v5496_v2 }
 0xf35   :  { %4295 = vmatprep.subr.bf16.mxu0 %v5500_v3 }
 0xf38   :  { %4297 = vmatpush1.bf16.msra.mxu0 %v5506_v8 }
 0xf39   :  { %4299 = vmatprep.subr.bf16.mxu0 %v5511_v9 }
 0xf3c   :  { %4301 = vmatpush1.bf16.msra.mxu0 %v5517_v12 }
 0xf8b   :  { %v2015_v39 = vpop.f32.mrb[16].mxu1 }
 0xf8c   :  { %v2017_v43 = vpop.f32.mrb[17].mxu1  ;;  %v2022_v59 = vrot.slane %v2015_v39, 6 }
 0xf8d   :  { %v2023_v52 = vrot.slane %v2017_v43, 6 }
 0xf8e   :  { %v2026_v2 = vadd.f32 %v2022_v59, %v1944_v5  ;;  %v2185_v59 = vld [vmem:[#allocation2 + $0x10] sm:$0x3] }
 0xf8f   :  { %v2027_v62 = vadd.f32 %v2023_v52, %v1945_v55  ;;  %v2186_v52 = vld [vmem:[#allocation2 + $0x18] sm:$0x3] }
 0xf90   :  { %v3908_v7 = vmul.f32 -1.442695, %v2026_v2 }
 0xf91   :  { %4715 = vtanh.f32 %v2027_v62  ;;  %v3909_v42 = vmul.f32 -1.442695, %v2027_v62 }
 0xf92   :  { %4717 = vpow2.f32 %v3908_v7 }
 0xf9b   :  { %v4716_v58 = vpop.eup %4715 }
 0xf9c   :  { %2079 = vrot.lane.b32.xlu1 %v4716_v58, %s5165_s16  ;;  %v4718_v3 = vpop.eup %4717 }
 0xf9d   :  { %v2067_v8 = vadd.f32 1.0, %v4718_v3 }
 0xf9f   :  { %4719 = vrcp.f32 %v2067_v8 }
 0xfa9   :  { %v4720_v10 = vpop.eup %4719 }
 0xfaa   :  { %v2077_v63 = vmul.f32 %v4720_v10, %v2075_v28 }
0x1002   :  { %v1931_v11 = vpop.f32.mrb[16].mxu0 }
0x1003   :  { %v1933_v9 = vpop.f32.mrb[17].mxu0  ;;  %v1938_v18 = vrot.slane %v1931_v11, 4 }
0x1004   :  { %v1939_v12 = vrot.slane %v1933_v9, 4 }
0x1005   :  { %v1942_v1 = vadd.f32 %v1938_v18, %v1859_v19  ;;  %v2340_v18 = vld [vmem:[%s6228_s5 + $0x18] sm:$0xff]  ;;  %v2337_v19 = vld [vmem:[%s6228_s5] sm:$0xff] }
0x1006   :  { %v1943_v47 = vadd.f32 %v1939_v12, %v1860_v49 }
0x1007   :  { %v3906_v22 = vmul.f32 -1.442695, %v1942_v1 }
0x1008   :  { %4721 = vtanh.f32 %v1943_v47  ;;  %v3907_v50 = vmul.f32 -1.442695, %v1943_v47 }
0x1009   :  { %4723 = vpow2.f32 %v3906_v22  ;;  %v2339_v22 = vld [vmem:[%s6228_s5 + $0x10] sm:$0xff] }
0x100a   :  { %v4320_v28 = vpack.c.bf16 %v2339_v22, %v2337_v19  ;;  %v2368_v19 = vld [vmem:[%s6228_s5 + $0xf8] sm:$0xff] }
0x100e   :  { %v2080_v13 = vpop.permute.xlu1 %2079 }
0x100f   :  { %v2082_v48 = vmul.f32 %v4720_v10, %v2080_v13 }
0x1011   :  { %2084 = vrot.lane.b32.xlu1 %v2082_v48, %s5165_s16 }
0x1012   :  { %v4722_v14 = vpop.eup %4721 }
0x1013   :  { %2046 = vrot.lane.b32.xlu0 %v4722_v14, %s5165_s16  ;;  %v4724_v24 = vpop.eup %4723  ;;  %v2338_v14 = vld [vmem:[%s6228_s5 + $0x8] sm:$0xff] }
0x1014   :  { %v2034_v25 = vadd.f32 1.0, %v4724_v24  ;;  %v4318_v1 = vpack.c.bf16 %v2340_v18, %v2338_v14  ;;  %v2342_v24 = vld [vmem:[%s6228_s5 + $0x28] sm:$0xff] }
0x1015   :  { %v2366_v18 = vld [vmem:[%s6228_s5 + $0xe8] sm:$0xff] }
0x1016   :  { %4725 = vrcp.f32 %v2034_v25  ;;  %v2344_v25 = vld [vmem:[%s6228_s5 + $0x38] sm:$0xff]  ;;  %4319 = vmatprep.subr.bf16.mxu0 %v4318_v1  ;;  %v2365_v1 = vld [vmem:[%s6228_s5 + $0xe0] sm:$0xff]  ;;  %v4346_v22 = vpack.c.bf16 %v2368_v19, %v2366_v18  ;;  %v2101_v18 = vld [vmem:[#allocation2 + $0x28] sm:$0xc0] }
0x1020   :  { %v4726_v36 = vpop.eup %4725 }
0x1021   :  { %v2044_v15 = vmul.f32 %v4726_v36, %v2042_v34  ;;  %v2350_v34 = vld [vmem:[%s6228_s5 + $0x68] sm:$0xff] }
0x1083   :  { %v2085_v30 = vpop.permute.xlu1 %2084 }
0x1084   :  { %v5776_v31 = vadd.f32 %v2085_v30, %v2077_v63  ;;  %v4322_v63 = vpack.c.bf16 %v2344_v25, %v2342_v24  ;;  %v2341_v30 = vld [vmem:[%s6228_s5 + $0x20] sm:$0xff]  ;;  %v2367_v24 = vld [vmem:[%s6228_s5 + $0xf0] sm:$0xff] }
0x1085   :  { %v2047_v40 = vpop.permute.xlu0 %2046  ;;  %v2467_v25 = vld [vmem:[#allocation11 + $0x28] sm:$0xff] }
0x1086   :  { %4727 = vtanh.f32 %v5776_v31  ;;  %v2049_v41 = vmul.f32 %v4726_v36, %v2047_v40  ;;  %v2310_v47 = vrot.slane %v5776_v31, 2  ;;  %v2343_v31 = vld [vmem:[%s6228_s5 + $0x30] sm:$0xff]  ;;  %v2346_v36 = vld [vmem:[%s6228_s5 + $0x48] sm:$0xff]  ;;  %v2348_v40 = vld [vmem:[%s6228_s5 + $0x58] sm:$0xff] }
0x1087   :  { %4729 = vpow2.f32 %v3909_v42  ;;  %v4326_v42 = vpack.c.bf16 %v2348_v40, %v2346_v36  ;;  %v2468_v36 = vld [vmem:[#allocation11 + $0x30] sm:$0xff] }
0x1088   :  { %2051 = vrot.lane.b32.xlu0 %v2049_v41, %s5165_s16 }
0x1090   :  { %v4728_v17 = vpop.eup %4727 }
0x1091   :  { %2090 = vrot.lane.b32.xlu1 %v4728_v17, %s5165_s16  ;;  %v4730_v44 = vpop.eup %4729  ;;  %v4324_v17 = vpack.c.bf16 %v2343_v31, %v2341_v30  ;;  %v2466_v31 = vld [vmem:[#allocation11 + $0x20] sm:$0xff] }
0x1092   :  { %v2068_v21 = vadd.f32 1.0, %v4730_v44  ;;  %v2345_v44 = vld [vmem:[%s6228_s5 + $0x40] sm:$0xff]  ;;  %v5919_v40 = vpack.c.bf16 %v2468_v36, %v2466_v31 }
0x1094   :  { %4731 = vrcp.f32 %v2068_v21  ;;  %v2347_v21 = vld [vmem:[%s6228_s5 + $0x50] sm:$0xff] }
0x109e   :  { %v4732_v53 = vpop.eup %4731 }
0x10fa   :  { %v2052_v45 = vpop.permute.xlu0 %2051 }
0x10fb   :  { %v5782_v16 = vadd.f32 %v2052_v45, %v2044_v15  ;;  %v2352_v15 = vld [vmem:[%s6228_s5 + $0x78] sm:$0xff]  ;;  %v4328_v45 = vpack.c.bf16 %v2347_v21, %v2345_v44  ;;  %v2472_v21 = vld [vmem:[#allocation11 + $0x50] sm:$0xff] }
0x10fd   :  { %4733 = vtanh.f32 %v5782_v16 }
0x10fe   :  { %4735 = vpow2.f32 %v3907_v50  ;;  %v2356_v50 = vld [vmem:[%s6228_s5 + $0x98] sm:$0xff] }
0x1103   :  { %v2091_v54 = vpop.permute.xlu1 %2090 }
0x1104   :  { %v5785_v57 = vmul.f32 %v4732_v53, %v2091_v54  ;;  %v4330_v53 = vpack.c.bf16 %v2352_v15, %v2350_v34  ;;  %v2349_v54 = vld [vmem:[%s6228_s5 + $0x60] sm:$0xff]  ;;  %v2477_v15 = vld [vmem:[#allocation11 + $0x78] sm:$0xff] }
0x1105   :  { %v2475_v34 = vld [vmem:[#allocation11 + $0x68] sm:$0xff] }
0x1106   :  { %v2187_v60 = vrot.slane %v5785_v57, 2 }
0x1107   :  { %v4734_v32 = vpop.eup %4733 }
0x1108   :  { %3911 = vmatmul.mubr.msk.f32.vlgmr.msra.gmra.mrb[18].mxu1 %vm437_vm4, %v2187_v60  ;;  %2057 = vrot.lane.b32.xlu0 %v4734_v32, %s5165_s16  ;;  %v4736_v35 = vpop.eup %4735  ;;  %v2351_v60 = vld [vmem:[%s6228_s5 + $0x70] sm:$0xff]  ;;  %v2354_v32 = vld [vmem:[%s6228_s5 + $0x88] sm:$0xff] }
0x1109   :  { %2544 = vmatprep.mubr.f32.mxu1 %v5163_v0  ;;  %v2035_v33 = vadd.f32 1.0, %v4736_v35  ;;  %v4334_v35 = vpack.c.bf16 %v2356_v50, %v2354_v32  ;;  %v2474_v32 = vld [vmem:[#allocation11 + $0x60] sm:$0xff]  ;;  %v2476_v50 = vld [vmem:[#allocation11 + $0x70] sm:$0xff] }
0x110b   :  { %4737 = vrcp.f32 %v2035_v33  ;;  %v2353_v33 = vld [vmem:[%s6228_s5 + $0x80] sm:$0xff] }
0x110c   :  { %1855 = vrot.lane.b32.xlu0 %v5747_v56, %s5165_s16 }
0x1115   :  { %v4738_v23 = vpop.eup %4737 }
0x117a   :  { %v2058_v61 = vpop.permute.xlu0 %2057 }
0x117b   :  { %v5793_v27 = vmul.f32 %v4738_v23, %v2058_v61  ;;  %v2355_v23 = vld [vmem:[%s6228_s5 + $0x90] sm:$0xff]  ;;  %v2358_v61 = vld [vmem:[%s6228_s5 + $0xa8] sm:$0xff] }
0x117d   :  { %v2103_v39 = vrot.slane %v5793_v27, 4 }
0x117e   :  { %v1856_v43 = vpop.permute.xlu0 %1855 }
0x117f   :  { %1858 = vst.msk [vmem:[#allocation3] sm:$0x30] %vm903_vm9, %v1856_v43  ;;  %3910 = vmatmul.mubr.msk.f32.vlgmr.msra.gmra.mrb[18].mxu0 %vm437_vm4, %v2103_v39  ;;  %v2360_v39 = vld [vmem:[%s6228_s5 + $0xb8] sm:$0xff] }
0x1180   :  { %2445 = vmatprep.mubr.f32.mxu0 %v5163_v0  ;;  %4321 = vmatpush1.bf16.msra.mxu0 %v4320_v28  ;;  %v4338_v43 = vpack.c.bf16 %v2360_v39, %v2358_v61  ;;  %v2469_v28 = vld [vmem:[#allocation11 + $0x38] sm:$0xff] }
0x1181   :  { %4323 = vmatprep.subr.bf16.mxu0 %v4322_v63  ;;  %v4348_v63 = vpack.c.bf16 %v2367_v24, %v2365_v1  ;;  %v5916_v30 = vpack.c.bf16 %v2469_v28, %v2467_v25 }
0x1184   :  { %4325 = vmatpush1.bf16.msra.mxu0 %v4324_v17  ;;  %v2473_v17 = vld [vmem:[#allocation11 + $0x58] sm:$0xff] }
0x1185   :  { %4327 = vmatprep.subr.bf16.mxu0 %v4326_v42  ;;  %v2470_v42 = vld [vmem:[#allocation11 + $0x40] sm:$0xff] }
0x1188   :  { %4329 = vmatpush1.bf16.msra.mxu0 %v4328_v45 }
0x1189   :  { %4331 = vmatprep.subr.bf16.mxu0 %v4330_v53 }
0x11db   :  { %v2256_v56 = vpop.f32.mrb[18].mxu1 }
0x11dc   :  { %v2258_v55 = vpop.f32.mrb[19].mxu1  ;;  %v2261_v5 = vadd.f32 %v2256_v56, %v2185_v59  ;;  %v2357_v56 = vld [vmem:[%s6228_s5 + $0xa0] sm:$0xff] }
0x11dd   :  { %v5799_v62 = vadd.f32 %v2258_v55, %v2186_v52  ;;  %v2359_v52 = vld [vmem:[%s6228_s5 + $0xb0] sm:$0xff] }
0x11de   :  { %v3914_v2 = vmul.f32 -1.442695, %v2261_v5  ;;  %v4340_v55 = vpack.c.bf16 %v2359_v52, %v2357_v56  ;;  %v2369_v56 = vld [vmem:[#allocation13] sm:$0x3] }
0x11df   :  { %4739 = vtanh.f32 %v5799_v62  ;;  %v5961_v52 = vrot.slane %v2369_v56, %v5538_v26 }
0x11e0   :  { %4741 = vpow2.f32 %v3914_v2  ;;  %v2362_v2 = vld [vmem:[%s6228_s5 + $0xc8] sm:$0xff] }
0x11e9   :  { %v4740_v58 = vpop.eup %4739 }
0x11ea   :  { %2314 = vrot.lane.b32.xlu1 %v4740_v58, %s5165_s16  ;;  %v4742_v7 = vpop.eup %4741  ;;  %v3915_v58 = vmul.f32 -1.442695, %v5799_v62  ;;  %v2363_v62 = vld [vmem:[%s6228_s5 + $0xd0] sm:$0xff] }
0x11eb   :  { %v2302_v3 = vadd.f32 1.0, %v4742_v7  ;;  %v2364_v7 = vld [vmem:[%s6228_s5 + $0xd8] sm:$0xff] }
0x11ed   :  { %4743 = vrcp.f32 %v2302_v3  ;;  %v4342_v3 = vpack.c.bf16 %v2364_v7, %v2362_v2 }
0x11f7   :  { %v4744_v9 = vpop.eup %4743 }
0x11f8   :  { %v2312_v10 = vmul.f32 %v4744_v9, %v2310_v47  ;;  %v2465_v47 = vld [vmem:[#allocation11 + $0x18] sm:$0xff] }
0x1252   :  { %v5803_v8 = vpop.f32.mrb[18].mxu0 }
0x1253   :  { %v5805_v11 = vpop.f32.mrb[19].mxu0  ;;  %v2179_v28 = vrot.slane %v5803_v8, 2 }
0x125c   :  { %v2315_v12 = vpop.permute.xlu1 %2314 }
0x125d   :  { %v2317_v49 = vmul.f32 %v4744_v9, %v2315_v12  ;;  %v2361_v9 = vld [vmem:[%s6228_s5 + $0xc0] sm:$0xff] }
0x125e   :  { %v2463_v12 = vld [vmem:[#allocation11 + $0x8] sm:$0xff] }
0x125f   :  { %2319 = vrot.lane.b32.xlu1 %v2317_v49, %s5165_s16  ;;  %v4344_v49 = vpack.c.bf16 %v2363_v62, %v2361_v9 }
0x12d1   :  { %v2320_v13 = vpop.permute.xlu1 %2319 }
0x12d2   :  { %v2322_v48 = vadd.f32 %v2320_v13, %v2312_v10  ;;  %v2462_v10 = vld [vmem:[#allocation11] sm:$0xff]  ;;  %v2464_v13 = vld [vmem:[#allocation11 + $0x10] sm:$0xff] }
0x12d3   :  { %v5901_v14 = vpack.c.bf16 %v2464_v13, %v2462_v10  ;;  %v2180_v13 = vrot.slane %v5805_v11, 2 }
0x12d4   :  { %4745 = vtanh.f32 %v2322_v48  ;;  %v5899_v48 = vpack.c.bf16 %v2465_v47, %v2463_v12 }
0x12d5   :  { %4747 = vpow2.f32 %v3915_v58  ;;  %v2184_v19 = vadd.f32 %v2180_v13, %v2101_v18 }
0x12d6   :  { %4351 = vmatprep.subr.bf16.mxu1 %v5899_v48 }
0x12d7   :  { %4353 = vmatpush1.bf16.msra.mxu1 %v5901_v14 }
0x12d8   :  { %4355 = vmatprep.subr.bf16.mxu1 %v5916_v30 }
0x12db   :  { %4357 = vmatpush1.bf16.msra.mxu1 %v5919_v40 }
0x12de   :  { %v4746_v41 = vpop.eup %4745 }
0x12df   :  { %2325 = vrot.lane.b32.xlu1 %v4746_v41, %s5165_s16  ;;  %v4748_v59 = vpop.eup %4747  ;;  %v2471_v41 = vld [vmem:[#allocation11 + $0x48] sm:$0xff] }
0x12e0   :  { %v2303_v5 = vadd.f32 1.0, %v4748_v59  ;;  %v5924_v44 = vpack.c.bf16 %v2473_v17, %v2471_v41 }
0x12e2   :  { %4749 = vrcp.f32 %v2303_v5  ;;  %4359 = vmatprep.subr.bf16.mxu1 %v5924_v44 }
0x12e3   :  { %1615 = vrot.lane.b32.xlu1 %v5707_v37, %s5165_s16  ;;  %v4332_v37 = vpack.c.bf16 %v2351_v60, %v2349_v54  ;;  %v5926_v54 = vpack.c.bf16 %v2472_v21, %v2470_v42  ;;  %v5928_v60 = vpack.c.bf16 %v2477_v15, %v2475_v34 }
0x12e5   :  { %4333 = vmatpush1.bf16.msra.mxu0 %v4332_v37  ;;  %4361 = vmatpush1.bf16.msra.mxu1 %v5926_v54 }
0x12e6   :  { %4335 = vmatprep.subr.bf16.mxu0 %v4334_v35  ;;  %v5933_v35 = vpack.c.bf16 %v2476_v50, %v2474_v32  ;;  %4363 = vmatprep.subr.bf16.mxu1 %v5928_v60 }
0x12e7   :  { %2096 = vrot.lane.b32.xlu1 %v5785_v57, %s5165_s16  ;;  %v4336_v57 = vpack.c.bf16 %v2355_v23, %v2353_v33 }
0x12e9   :  { %4337 = vmatpush1.bf16.msra.mxu0 %v4336_v57  ;;  %4365 = vmatpush1.bf16.msra.mxu1 %v5933_v35 }
0x12ea   :  { %4339 = vmatprep.subr.bf16.mxu0 %v4338_v43  ;;  %4367 = vmatprep.subr.bf16.mxu1 %v5899_v48 }
0x12ec   :  { %v4750_v45 = vpop.eup %4749  ;;  %2545 = vmatmul.mubr.f32.vlgmr.msra.gmra.mrb[20].mxu1 %v5163_v0 }
0x12ed   :  { %4341 = vmatpush1.bf16.msra.mxu0 %v4340_v55  ;;  %4369 = vmatpush1.bf16.msra.mxu1 %v5901_v14  ;;  %v5964_v55 = vrot.slane %v2369_v56, %v5540_v29 }
0x12ee   :  { %4343 = vmatprep.subr.bf16.mxu0 %v4342_v3  ;;  %2652 = vmatprep.mubr.f32.mxu1 %v5163_v0 }
0x12ef   :  { %4371 = vmatprep.subr.bf16.mxu1 %v5916_v30 }
0x12f1   :  { %4345 = vmatpush1.bf16.msra.mxu0 %v4344_v49  ;;  %4373 = vmatpush1.bf16.msra.mxu1 %v5919_v40 }
0x12f2   :  { %4347 = vmatprep.subr.bf16.mxu0 %v4346_v22  ;;  %4375 = vmatprep.subr.bf16.mxu1 %v5924_v44 }
0x12f5   :  { %4349 = vmatpush1.bf16.msra.mxu0 %v4348_v63  ;;  %4377 = vmatpush1.bf16.msra.mxu1 %v5926_v54  ;;  %v2100_v63 = vld [vmem:[#allocation2 + $0x20] sm:$0xc0] }
0x12f6   :  { %4383 = vmatprep.subr.bf16.mxu0 %v5899_v48  ;;  %4379 = vmatprep.subr.bf16.mxu1 %v5928_v60  ;;  %v2183_v31 = vadd.f32 %v2179_v28, %v2100_v63 }
0x12f8   :  { %v3912_v36 = vmul.f32 -1.442695, %v2183_v31 }
0x12f9   :  { %4381 = vmatpush1.bf16.msra.mxu1 %v5933_v35 }
0x12fa   :  { %4399 = vmatprep.subr.bf16.mxu1 %v5899_v48 }
0x1351   :  { %v2326_v53 = vpop.permute.xlu1 %2325 }
0x1352   :  { %v2328_v37 = vmul.f32 %v4750_v45, %v2326_v53 }
0x1354   :  { %2331 = vrot.lane.b32.xlu0 %v2328_v37, %s5165_s16  ;;  %v2277_v37 = vrot.slane %v5782_v16, 6  ;;  %v3913_v16 = vmul.f32 -1.442695, %v2184_v19 }
0x1355   :  { %v1616_v33 = vpop.permute.xlu1 %1615 }
0x1356   :  { %1618 = vst.msk [vmem:[#allocation3] sm:$0xc0] %vm661_vm10, %v1616_v33 }
0x1359   :  { %v2097_v23 = vpop.permute.xlu1 %2096 }
0x135a   :  { %2099 = vst.msk [vmem:[#allocation3] sm:$0xc] %vm1146_vm11, %v2097_v23 }
0x13bf   :  { %v2546_v57 = vpop.f32.mrb[20].mxu1 }
0x13c0   :  { %v2548_v43 = vpop.f32.mrb[21].mxu1 }
0x13c6   :  { %v2332_v61 = vpop.permute.xlu0 %2331 }
0x13c7   :  { %2334 = vst.msk [vmem:[#allocation3] sm:$0x3] %vm1383_vm12, %v2332_v61 }
0x13ce   :  { %v2335_v39 = vld [vmem:[#allocation3] sm:$0xff] }
0x13cf   :  { %2446 = vmatmul.mubr.f32.vlgmr.msra.gmra.mrb[20].mxu0 %v2335_v39 }
0x13d0   :  { %2451 = vmatprep.mubr.f32.mxu0 %v5163_v0  ;;  %4385 = vmatpush1.bf16.msra.mxu0 %v5901_v14 }
0x13d1   :  { %4387 = vmatprep.subr.bf16.mxu0 %v5916_v30 }
0x13d4   :  { %4389 = vmatpush1.bf16.msra.mxu0 %v5919_v40 }
0x13d5   :  { %4391 = vmatprep.subr.bf16.mxu0 %v5924_v44 }
0x13d8   :  { %4393 = vmatpush1.bf16.msra.mxu0 %v5926_v54 }
0x13d9   :  { %4395 = vmatprep.subr.bf16.mxu0 %v5928_v60 }
0x13dc   :  { %4397 = vmatpush1.bf16.msra.mxu0 %v5933_v35 }
0x13dd   :  { %4415 = vmatprep.subr.bf16.mxu0 %v5899_v48 }
0x14a2   :  { %v2447_v58 = vpop.f32.mrb[20].mxu0 }
0x14a3   :  { %v2448_v59 = vadd.f32 %v2447_v58, %v5961_v52  ;;  %v2449_v5 = vpop.f32.mrb[21].mxu0 }
0x14a4   :  { %v2450_v2 = vadd.f32 %v2449_v5, %v5964_v55 }
0x14a5   :  { %2458 = vst [vmem:[#allocation4] sm:$0xff] %v2448_v59 }
0x14a6   :  { %2459 = vst [vmem:[#allocation4 + $0x8] sm:$0xff] %v2450_v2 }
0x14ac   :  { %v2478_v62 = vld [vmem:[#allocation4] sm:$0x3]  ;;  %v2583_v13 = vld [vmem:[#allocation4] sm:$0xc] }
0x14ad   :  { %v2479_v7 = vld [vmem:[#allocation4 + $0x8] sm:$0x3]  ;;  %v2551_v12 = vadd.f32 %v2546_v57, %v2478_v62 }
0x14ae   :  { %v2552_v3 = vadd.f32 %v2548_v43, %v2479_v7 }
0x14af   :  { %v3916_v49 = vmul.f32 -1.442695, %v2551_v12  ;;  %v2584_v12 = vld [vmem:[#allocation4 + $0x8] sm:$0xc] }
0x14b0   :  { %4751 = vtanh.f32 %v2552_v3  ;;  %v3917_v8 = vmul.f32 -1.442695, %v2552_v3 }
0x14b1   :  { %4753 = vpow2.f32 %v3916_v49 }
0x14ba   :  { %v4752_v9 = vpop.eup %4751 }
0x14bb   :  { %2568 = vrot.lane.b32.xlu1 %v4752_v9, %s5165_s16  ;;  %v4754_v47 = vpop.eup %4753 }
0x14bc   :  { %v2559_v10 = vadd.f32 1.0, %v4754_v47 }
0x14be   :  { %4755 = vrcp.f32 %v2559_v10 }
0x14bf   :  { %4757 = vtanh.f32 %v2184_v19 }
0x14c0   :  { %4759 = vpow2.f32 %v3912_v36 }
0x14c8   :  { %v4756_v1 = vpop.eup %4755 }
0x14c9   :  { %v4758_v25 = vpop.eup %4757  ;;  %v2566_v17 = vmul.f32 0.0, %v4756_v1 }
0x14ca   :  { %v4760_v41 = vpop.eup %4759 }
0x14cb   :  { %v2269_v11 = vadd.f32 1.0, %v4760_v41 }
0x14cd   :  { %4761 = vrcp.f32 %v2269_v11 }
0x14d7   :  { %v4762_v34 = vpop.eup %4761 }
0x14d8   :  { %v2279_v33 = vmul.f32 %v4762_v34, %v2277_v37 }
0x152d   :  { %v2569_v22 = vpop.permute.xlu1 %2568 }
0x152e   :  { %v2571_v24 = vmul.f32 %v4756_v1, %v2569_v22 }
0x1530   :  { %2573 = vrot.lane.b32.xlu0 %v2571_v24, %s5165_s16 }
0x1534   :  { %2281 = vrot.lane.b32.xlu0 %v4758_v25, %s5165_s16 }
0x15a2   :  { %v2574_v42 = vpop.permute.xlu0 %2573 }
0x15a3   :  { %v5973_v21 = vadd.f32 %v2574_v42, %v2566_v17 }
0x15a5   :  { %4763 = vtanh.f32 %v5973_v21  ;;  %v2681_v25 = vrot.slane %v5973_v21, 6 }
0x15a6   :  { %v2282_v15 = vpop.permute.xlu0 %2281  ;;  %4765 = vpow2.f32 %v3917_v8 }
0x15a7   :  { %v2284_v45 = vmul.f32 %v4762_v34, %v2282_v15 }
0x15a9   :  { %2286 = vrot.lane.b32.xlu0 %v2284_v45, %s5165_s16 }
0x15af   :  { %v4764_v53 = vpop.eup %4763 }
0x15b0   :  { %2579 = vrot.lane.b32.xlu1 %v4764_v53, %s5165_s16  ;;  %v4766_v32 = vpop.eup %4765 }
0x15b1   :  { %v2560_v50 = vadd.f32 1.0, %v4766_v32 }
0x15b3   :  { %4767 = vrcp.f32 %v2560_v50 }
0x15bd   :  { %v4768_v39 = vpop.eup %4767 }
0x161b   :  { %v2287_v23 = vpop.permute.xlu0 %2286 }
0x161c   :  { %v2289_v61 = vadd.f32 %v2287_v23, %v2279_v33  ;;  %v2701_v23 = vld [vmem:[#allocation4 + $0x8] sm:$0x30] }
0x161e   :  { %4769 = vtanh.f32 %v2289_v61 }
0x161f   :  { %4771 = vpow2.f32 %v3913_v16 }
0x1622   :  { %v2580_v57 = vpop.permute.xlu1 %2579 }
0x1623   :  { %v2582_v43 = vmul.f32 %v4768_v39, %v2580_v57 }
0x1625   :  { %3918 = vmatmul.mubr.msk.f32.vlgmr.msra.gmra.mrb[22].mxu1 %vm437_vm4, %v2582_v43  ;;  %v2700_v43 = vld [vmem:[#allocation4] sm:$0x30] }
0x1626   :  { %4401 = vmatpush1.bf16.msra.mxu1 %v5901_v14  ;;  %2888 = vmatprep.mubr.f32.mxu1 %v5163_v0 }
0x1627   :  { %4403 = vmatprep.subr.bf16.mxu1 %v5916_v30 }
0x1628   :  { %v4770_v56 = vpop.eup %4769 }
0x1629   :  { %2292 = vrot.lane.b32.xlu0 %v4770_v56, %s5165_s16  ;;  %v4772_v58 = vpop.eup %4771 }
0x162a   :  { %4405 = vmatpush1.bf16.msra.mxu1 %v5919_v40  ;;  %v2270_v59 = vadd.f32 1.0, %v4772_v58 }
0x162b   :  { %4407 = vmatprep.subr.bf16.mxu1 %v5924_v44 }
0x162c   :  { %4773 = vrcp.f32 %v2270_v59 }
0x162d   :  { %900 = vrot.lane.b32.xlu0 %v5593_v51, %s5165_s16 }
0x162e   :  { %4409 = vmatpush1.bf16.msra.mxu1 %v5926_v54 }
0x162f   :  { %4411 = vmatprep.subr.bf16.mxu1 %v5928_v60 }
0x1631   :  { %1380 = vrot.lane.b32.xlu0 %v5669_v20, %s5165_s16 }
0x1632   :  { %4413 = vmatpush1.bf16.msra.mxu1 %v5933_v35 }
0x1633   :  { %4431 = vmatprep.subr.bf16.mxu1 %v5899_v48 }
0x1636   :  { %v4774_v5 = vpop.eup %4773 }
0x169b   :  { %v2293_v2 = vpop.permute.xlu0 %2292 }
0x169c   :  { %v2295_v7 = vmul.f32 %v4774_v5, %v2293_v2 }
0x169f   :  { %v901_v51 = vpop.permute.xlu0 %900 }
0x16a0   :  { %904 = vst.msk [vmem:[#allocation3 + $0x8] sm:$0x30] %vm903_vm9, %v901_v51 }
0x16a1   :  { %2094 = vst.msk [vmem:[#allocation3 + $0x8] sm:$0x30] %vm1140_vm7, %v5793_v27 }
0x16a3   :  { %v1381_v3 = vpop.permute.xlu0 %1380 }
0x16a4   :  { %1384 = vst.msk [vmem:[#allocation3 + $0x8] sm:$0x3] %vm1383_vm12, %v1381_v3 }
0x16a5   :  { %1613 = vst.msk [vmem:[#allocation3 + $0x8] sm:$0x3] %vm655_vm5, %v5721_v46 }
0x16f8   :  { %v2654_v20 = vpop.f32.mrb[22].mxu1 }
0x16f9   :  { %v2656_v9 = vpop.f32.mrb[23].mxu1  ;;  %v2661_v10 = vrot.slane %v2654_v20, 6 }
0x16fa   :  { %v2662_v62 = vrot.slane %v2656_v9, 6 }
0x16fb   :  { %v2665_v18 = vadd.f32 %v2661_v10, %v2583_v13 }
0x16fc   :  { %v2666_v49 = vadd.f32 %v2662_v62, %v2584_v12 }
0x16fd   :  { %v3919_v19 = vmul.f32 -1.442695, %v2665_v18 }
0x16fe   :  { %4775 = vtanh.f32 %v2666_v49  ;;  %v3920_v11 = vmul.f32 -1.442695, %v2666_v49 }
0x16ff   :  { %4777 = vpow2.f32 %v3919_v19 }
0x1708   :  { %v4776_v47 = vpop.eup %4775 }
0x1709   :  { %2685 = vrot.lane.b32.xlu1 %v4776_v47, %s5165_s16  ;;  %v4778_v27 = vpop.eup %4777 }
0x170a   :  { %v2673_v1 = vadd.f32 1.0, %v4778_v27 }
0x170c   :  { %4779 = vrcp.f32 %v2673_v1  ;;  %v2819_v1 = vld [vmem:[#allocation4 + $0x8] sm:$0xc0] }
0x1716   :  { %v4780_v22 = vpop.eup %4779 }
0x1717   :  { %v2683_v28 = vmul.f32 %v4780_v22, %v2681_v25  ;;  %v2818_v25 = vld [vmem:[#allocation4] sm:$0xc0] }
0x177b   :  { %v2686_v24 = vpop.permute.xlu1 %2685 }
0x177c   :  { %v2688_v46 = vmul.f32 %v4780_v22, %v2686_v24 }
0x177e   :  { %2690 = vrot.lane.b32.xlu1 %v2688_v46, %s5165_s16 }
0x1782   :  { %658 = vrot.lane.b32.xlu1 %v5555_v38, %s5165_s16 }
0x1786   :  { %1143 = vrot.lane.b32.xlu1 %v5631_v6, %s5165_s16 }
0x17f0   :  { %v2691_v63 = vpop.permute.xlu1 %2690 }
0x17f1   :  { %v2693_v31 = vadd.f32 %v2691_v63, %v2683_v28 }
0x17f3   :  { %4781 = vtanh.f32 %v2693_v31  ;;  %v2799_v2 = vrot.slane %v2693_v31, 6 }
0x17f4   :  { %v659_v36 = vpop.permute.xlu1 %658  ;;  %4783 = vpow2.f32 %v3920_v11 }
0x17f5   :  { %662 = vst.msk [vmem:[#allocation3 + $0x8] sm:$0xc0] %vm661_vm10, %v659_v36 }
0x17f6   :  { %2329 = vst.msk [vmem:[#allocation3 + $0x8] sm:$0xc0] %vm1377_vm8, %v2295_v7 }
0x17f8   :  { %v1144_v41 = vpop.permute.xlu1 %1143 }
0x17f9   :  { %1147 = vst.msk [vmem:[#allocation3 + $0x8] sm:$0xc] %vm1146_vm11, %v1144_v41 }
0x17fa   :  { %1853 = vst.msk [vmem:[#allocation3 + $0x8] sm:$0xc] %vm897_vm6, %v5760_v4 }
0x17fd   :  { %v4782_v38 = vpop.eup %4781 }
0x17fe   :  { %2696 = vrot.lane.b32.xlu1 %v4782_v38, %s5165_s16  ;;  %v4784_v17 = vpop.eup %4783 }
0x17ff   :  { %v2674_v42 = vadd.f32 1.0, %v4784_v17 }
0x1801   :  { %v2336_v6 = vld [vmem:[#allocation3 + $0x8] sm:$0xff]  ;;  %4785 = vrcp.f32 %v2674_v42 }
0x1802   :  { %2452 = vmatmul.mubr.f32.gmra.mrb[22].mxu0 %v2336_v6 }
0x1803   :  { %2770 = vmatprep.mubr.f32.mxu0 %v5163_v0 }
0x180b   :  { %v4786_v21 = vpop.eup %4785 }
0x1870   :  { %v2697_v34 = vpop.permute.xlu1 %2696 }
0x1871   :  { %v2699_v15 = vmul.f32 %v4786_v21, %v2697_v34 }
0x1873   :  { %v2703_v45 = vrot.slane %v2699_v15, 2 }
0x1875   :  { %3921 = vmatmul.mubr.msk.f32.vlgmr.msra.gmra.mrb[24].mxu0 %vm437_vm4, %v2703_v45 }
0x1876   :  { %4417 = vmatpush1.bf16.msra.mxu0 %v5901_v14  ;;  %3006 = vmatprep.mubr.f32.mxu0 %v5163_v0 }
0x1877   :  { %4419 = vmatprep.subr.bf16.mxu0 %v5916_v30 }
0x187a   :  { %4421 = vmatpush1.bf16.msra.mxu0 %v5919_v40 }
0x187b   :  { %4423 = vmatprep.subr.bf16.mxu0 %v5924_v44 }
0x187e   :  { %4425 = vmatpush1.bf16.msra.mxu0 %v5926_v54 }
0x187f   :  { %4427 = vmatprep.subr.bf16.mxu0 %v5928_v60 }
0x1882   :  { %4429 = vmatpush1.bf16.msra.mxu0 %v5933_v35 }
0x1883   :  { %4447 = vmatprep.subr.bf16.mxu0 %v5899_v48 }
0x18d5   :  { %v2453_v4 = vpop.f32.mrb[22].mxu0 }
0x18d6   :  { %v2454_v53 = vadd.f32 %v2453_v4, %v5961_v52  ;;  %v2455_v8 = vpop.f32.mrb[23].mxu0 }
0x18d7   :  { %v2456_v32 = vadd.f32 %v2455_v8, %v5964_v55 }
0x18d8   :  { %2460 = vst [vmem:[#allocation4 + $0x10] sm:$0xff] %v2454_v53 }
0x18d9   :  { %2461 = vst [vmem:[#allocation4 + $0x18] sm:$0xff] %v2456_v32 }
0x1948   :  { %v2772_v50 = vpop.f32.mrb[24].mxu0 }
0x1949   :  { %v2774_v37 = vpop.f32.mrb[25].mxu0  ;;  %v2779_v57 = vrot.slane %v2772_v50, 4 }
0x194a   :  { %v2780_v33 = vrot.slane %v2774_v37, 4  ;;  %v2937_v37 = vld [vmem:[#allocation4 + $0x18] sm:$0x3] }
0x194b   :  { %v2783_v56 = vadd.f32 %v2779_v57, %v2700_v43 }
0x194c   :  { %v2784_v61 = vadd.f32 %v2780_v33, %v2701_v23 }
0x194d   :  { %v3922_v16 = vmul.f32 -1.442695, %v2783_v56 }
0x194e   :  { %4787 = vtanh.f32 %v2784_v61  ;;  %v3923_v9 = vmul.f32 -1.442695, %v2784_v61 }
0x194f   :  { %4789 = vpow2.f32 %v3922_v16 }
0x1958   :  { %v4788_v39 = vpop.eup %4787 }
0x1959   :  { %2803 = vrot.lane.b32.xlu0 %v4788_v39, %s5165_s16  ;;  %v4790_v52 = vpop.eup %4789  ;;  %v2936_v39 = vld [vmem:[#allocation4 + $0x10] sm:$0x3] }
0x195a   :  { %v2791_v58 = vadd.f32 1.0, %v4790_v52 }
0x195c   :  { %4791 = vrcp.f32 %v2791_v58 }
0x1966   :  { %v4792_v55 = vpop.eup %4791 }
0x1967   :  { %v2801_v7 = vmul.f32 %v4792_v55, %v2799_v2 }
0x19cb   :  { %v2804_v59 = vpop.permute.xlu0 %2803 }
0x19cc   :  { %v2806_v5 = vmul.f32 %v4792_v55, %v2804_v59 }
0x19ce   :  { %2808 = vrot.lane.b32.xlu1 %v2806_v5, %s5165_s16 }
0x1a40   :  { %v2809_v51 = vpop.permute.xlu1 %2808 }
0x1a41   :  { %v2811_v3 = vadd.f32 %v2809_v51, %v2801_v7 }
0x1a43   :  { %4793 = vtanh.f32 %v2811_v3  ;;  %v2917_v6 = vrot.slane %v2811_v3, 6 }
0x1a44   :  { %4795 = vpow2.f32 %v3923_v9 }
0x1a4d   :  { %v4794_v20 = vpop.eup %4793 }
0x1a4e   :  { %2814 = vrot.lane.b32.xlu0 %v4794_v20, %s5165_s16  ;;  %v4796_v62 = vpop.eup %4795 }
0x1a4f   :  { %v2792_v12 = vadd.f32 1.0, %v4796_v62 }
0x1a51   :  { %4797 = vrcp.f32 %v2792_v12 }
0x1a5b   :  { %v4798_v49 = vpop.eup %4797 }
0x1ac0   :  { %v2815_v47 = vpop.permute.xlu0 %2814 }
0x1ac1   :  { %v2817_v10 = vmul.f32 %v4798_v49, %v2815_v47 }
0x1ac3   :  { %v2821_v13 = vrot.slane %v2817_v10, 4 }
0x1ac5   :  { %3924 = vmatmul.mubr.msk.f32.vlgmr.msra.gmra.mrb[24].mxu1 %vm437_vm4, %v2821_v13 }
0x1ac6   :  { %4433 = vmatpush1.bf16.msra.mxu1 %v5901_v14  ;;  %3117 = vmatprep.mubr.f32.mxu1 %v5163_v0 }
0x1ac7   :  { %4435 = vmatprep.subr.bf16.mxu1 %v5916_v30 }
0x1aca   :  { %4437 = vmatpush1.bf16.msra.mxu1 %v5919_v40 }
0x1acb   :  { %4439 = vmatprep.subr.bf16.mxu1 %v5924_v44 }
0x1ace   :  { %4441 = vmatpush1.bf16.msra.mxu1 %v5926_v54 }
0x1acf   :  { %4443 = vmatprep.subr.bf16.mxu1 %v5928_v60 }
0x1ad2   :  { %4445 = vmatpush1.bf16.msra.mxu1 %v5933_v35 }
0x1ad3   :  { %4463 = vmatprep.subr.bf16.mxu1 %v5899_v48 }
0x1b98   :  { %v2890_v18 = vpop.f32.mrb[24].mxu1 }
0x1b99   :  { %v2892_v19 = vpop.f32.mrb[25].mxu1  ;;  %v2897_v46 = vrot.slane %v2890_v18, 2  ;;  %v3049_v18 = vld [vmem:[#allocation4 + $0x18] sm:$0xc] }
0x1b9a   :  { %v2898_v27 = vrot.slane %v2892_v19, 2 }
0x1b9b   :  { %v2901_v28 = vadd.f32 %v2897_v46, %v2818_v25 }
0x1b9c   :  { %v2902_v22 = vadd.f32 %v2898_v27, %v2819_v1  ;;  %v3048_v27 = vld [vmem:[#allocation4 + $0x10] sm:$0xc] }
0x1b9d   :  { %v3925_v63 = vmul.f32 -1.442695, %v2901_v28 }
0x1b9e   :  { %4799 = vtanh.f32 %v2902_v22  ;;  %v3926_v34 = vmul.f32 -1.442695, %v2902_v22 }
0x1b9f   :  { %4801 = vpow2.f32 %v3925_v63  ;;  %v3403_v63 = vld [vmem:[#allocation14 + $0x8] sm:$0xff] }
0x1ba8   :  { %v4800_v24 = vpop.eup %4799 }
0x1ba9   :  { %2921 = vrot.lane.b32.xlu1 %v4800_v24, %s5165_s16  ;;  %v4802_v31 = vpop.eup %4801 }
0x1baa   :  { %v2909_v36 = vadd.f32 1.0, %v4802_v31  ;;  %v3405_v31 = vld [vmem:[#allocation14 + $0x18] sm:$0xff] }
0x1bac   :  { %4803 = vrcp.f32 %v2909_v36  ;;  %v4478_v36 = vpack.c.bf16 %v3405_v31, %v3403_v63  ;;  %v3166_v63 = vld [vmem:[#allocation4 + $0x18] sm:$0x30] }
0x1bb6   :  { %v4804_v41 = vpop.eup %4803 }
0x1bb7   :  { %v2919_v11 = vmul.f32 %v4804_v41, %v2917_v6 }
0x1c1b   :  { %v2922_v38 = vpop.permute.xlu1 %2921 }
0x1c1c   :  { %v2924_v48 = vmul.f32 %v4804_v41, %v2922_v38 }
0x1c1e   :  { %2926 = vrot.lane.b32.xlu0 %v2924_v48, %s5165_s16 }
0x1c90   :  { %v2927_v17 = vpop.permute.xlu0 %2926 }
0x1c91   :  { %v2929_v42 = vadd.f32 %v2927_v17, %v2919_v11  ;;  %v3402_v11 = vld [vmem:[#allocation14] sm:$0xff]  ;;  %v3404_v17 = vld [vmem:[#allocation14 + $0x10] sm:$0xff] }
0x1c93   :  { %4805 = vtanh.f32 %v2929_v42  ;;  %v3029_v59 = vrot.slane %v2929_v42, 6 }
0x1c94   :  { %4807 = vpow2.f32 %v3926_v34  ;;  %v3407_v34 = vld [vmem:[#allocation14 + $0x28] sm:$0xff] }
0x1c9d   :  { %v4806_v21 = vpop.eup %4805 }
0x1c9e   :  { %2932 = vrot.lane.b32.xlu1 %v4806_v21, %s5165_s16  ;;  %v4808_v15 = vpop.eup %4807 }
0x1c9f   :  { %v2910_v45 = vadd.f32 1.0, %v4808_v15  ;;  %v3409_v15 = vld [vmem:[#allocation14 + $0x38] sm:$0xff] }
0x1ca1   :  { %4809 = vrcp.f32 %v2910_v45 }
0x1cab   :  { %v4810_v4 = vpop.eup %4809 }
0x1d10   :  { %v2933_v53 = vpop.permute.xlu1 %2932 }
0x1d11   :  { %v2935_v8 = vmul.f32 %v4810_v4, %v2933_v53  ;;  %v4480_v4 = vpack.c.bf16 %v3404_v17, %v3402_v11 }
0x1d13   :  { %v2939_v32 = vrot.slane %v2935_v8, 6  ;;  %v4482_v8 = vpack.c.bf16 %v3409_v15, %v3407_v34 }
0x1d15   :  { %3927 = vmatmul.mubr.msk.f32.vlgmr.msra.gmra.mrb[26].mxu0 %vm437_vm4, %v2939_v32  ;;  %v3406_v32 = vld [vmem:[#allocation14 + $0x20] sm:$0xff] }
0x1d16   :  { %4449 = vmatpush1.bf16.msra.mxu0 %v5901_v14  ;;  %3235 = vmatprep.mubr.f32.mxu0 %v5163_v0 }
0x1d17   :  { %4451 = vmatprep.subr.bf16.mxu0 %v5916_v30 }
0x1d1a   :  { %4453 = vmatpush1.bf16.msra.mxu0 %v5919_v40 }
0x1d1b   :  { %4455 = vmatprep.subr.bf16.mxu0 %v5924_v44 }
0x1d1e   :  { %4457 = vmatpush1.bf16.msra.mxu0 %v5926_v54 }
0x1d1f   :  { %4459 = vmatprep.subr.bf16.mxu0 %v5928_v60 }
0x1d22   :  { %4461 = vmatpush1.bf16.msra.mxu0 %v5933_v35 }
0x1d23   :  { %4479 = vmatprep.subr.bf16.mxu0 %v4478_v36 }
0x1de8   :  { %v3008_v50 = vpop.f32.mrb[26].mxu0 }
0x1de9   :  { %v3010_v33 = vpop.f32.mrb[27].mxu0  ;;  %v3013_v57 = vadd.f32 %v3008_v50, %v2936_v39  ;;  %v3408_v50 = vld [vmem:[#allocation14 + $0x30] sm:$0xff]  ;;  %v3410_v39 = vld [vmem:[#allocation14 + $0x40] sm:$0xff] }
0x1dea   :  { %v3014_v23 = vadd.f32 %v3010_v33, %v2937_v37  ;;  %v3411_v37 = vld [vmem:[#allocation14 + $0x48] sm:$0xff]  ;;  %v3413_v33 = vld [vmem:[#allocation14 + $0x58] sm:$0xff] }
0x1deb   :  { %v3928_v43 = vmul.f32 -1.442695, %v3013_v57  ;;  %v3412_v57 = vld [vmem:[#allocation14 + $0x50] sm:$0xff] }
0x1dec   :  { %4811 = vtanh.f32 %v3014_v23  ;;  %v3929_v3 = vmul.f32 -1.442695, %v3014_v23  ;;  %v4484_v23 = vpack.c.bf16 %v3408_v50, %v3406_v32 }
0x1ded   :  { %4813 = vpow2.f32 %v3928_v43  ;;  %v3415_v43 = vld [vmem:[#allocation14 + $0x68] sm:$0xff] }
0x1df6   :  { %v4812_v61 = vpop.eup %4811 }
0x1df7   :  { %3033 = vrot.lane.b32.xlu0 %v4812_v61, %s5165_s16  ;;  %v4814_v56 = vpop.eup %4813  ;;  %v4486_v61 = vpack.c.bf16 %v3413_v33, %v3411_v37 }
0x1df8   :  { %v3021_v16 = vadd.f32 1.0, %v4814_v56  ;;  %v3417_v56 = vld [vmem:[#allocation14 + $0x78] sm:$0xff] }
0x1dfa   :  { %4815 = vrcp.f32 %v3021_v16  ;;  %v4488_v16 = vpack.c.bf16 %v3412_v57, %v3410_v39 }
0x1e04   :  { %v4816_v52 = vpop.eup %4815 }
0x1e05   :  { %v3031_v5 = vmul.f32 %v4816_v52, %v3029_v59  ;;  %v3419_v59 = vld [vmem:[#allocation14 + $0x88] sm:$0xff] }
0x1e69   :  { %v3034_v58 = vpop.permute.xlu0 %3033 }
0x1e6a   :  { %v3036_v55 = vmul.f32 %v4816_v52, %v3034_v58  ;;  %v4490_v52 = vpack.c.bf16 %v3417_v56, %v3415_v43  ;;  %v3414_v58 = vld [vmem:[#allocation14 + $0x60] sm:$0xff] }
0x1e6c   :  { %3038 = vrot.lane.b32.xlu1 %v3036_v55, %s5165_s16  ;;  %v3416_v55 = vld [vmem:[#allocation14 + $0x70] sm:$0xff] }
0x1ede   :  { %v3039_v2 = vpop.permute.xlu1 %3038 }
0x1edf   :  { %v3041_v7 = vadd.f32 %v3039_v2, %v3031_v5  ;;  %v3421_v5 = vld [vmem:[#allocation14 + $0x98] sm:$0xff]  ;;  %v4492_v2 = vpack.c.bf16 %v3416_v55, %v3414_v58 }
0x1ee1   :  { %4817 = vtanh.f32 %v3041_v7  ;;  %v3146_v24 = vrot.slane %v3041_v7, 6  ;;  %v4494_v7 = vpack.c.bf16 %v3421_v5, %v3419_v59 }
0x1ee2   :  { %4819 = vpow2.f32 %v3929_v3  ;;  %v3420_v3 = vld [vmem:[#allocation14 + $0x90] sm:$0xff] }
0x1eeb   :  { %v4818_v51 = vpop.eup %4817 }
0x1eec   :  { %3044 = vrot.lane.b32.xlu0 %v4818_v51, %s5165_s16  ;;  %v4820_v20 = vpop.eup %4819  ;;  %v3418_v51 = vld [vmem:[#allocation14 + $0x80] sm:$0xff] }
0x1eed   :  { %v3022_v9 = vadd.f32 1.0, %v4820_v20  ;;  %v3423_v20 = vld [vmem:[#allocation14 + $0xa8] sm:$0xff] }
0x1eef   :  { %4821 = vrcp.f32 %v3022_v9  ;;  %v3425_v9 = vld [vmem:[#allocation14 + $0xb8] sm:$0xff] }
0x1ef9   :  { %v4822_v62 = vpop.eup %4821 }
0x1f5e   :  { %v3045_v12 = vpop.permute.xlu0 %3044 }
0x1f5f   :  { %v3047_v49 = vmul.f32 %v4822_v62, %v3045_v12  ;;  %v4496_v62 = vpack.c.bf16 %v3420_v3, %v3418_v51  ;;  %v4498_v12 = vpack.c.bf16 %v3425_v9, %v3423_v20 }
0x1f61   :  { %3930 = vmatmul.mubr.msk.f32.vlgmr.msra.gmra.mrb[26].mxu1 %vm437_vm4, %v3047_v49  ;;  %v3422_v49 = vld [vmem:[#allocation14 + $0xa0] sm:$0xff] }
0x1f62   :  { %4465 = vmatpush1.bf16.msra.mxu1 %v5901_v14  ;;  %3353 = vmatprep.mubr.f32.mxu1 %v5163_v0 }
0x1f63   :  { %4467 = vmatprep.subr.bf16.mxu1 %v5916_v30 }
0x1f66   :  { %4469 = vmatpush1.bf16.msra.mxu1 %v5919_v40 }
0x1f67   :  { %4471 = vmatprep.subr.bf16.mxu1 %v5924_v44 }
0x1f6a   :  { %4473 = vmatpush1.bf16.msra.mxu1 %v5926_v54 }
0x1f6b   :  { %4475 = vmatprep.subr.bf16.mxu1 %v5928_v60 }
0x1f6e   :  { %4477 = vmatpush1.bf16.msra.mxu1 %v5933_v35 }
0x2034   :  { %v3119_v47 = vpop.f32.mrb[26].mxu1 }
0x2035   :  { %v3121_v10 = vpop.f32.mrb[27].mxu1  ;;  %v3126_v30 = vrot.slane %v3119_v47, 6  ;;  %v3424_v47 = vld [vmem:[#allocation14 + $0xb0] sm:$0xff] }
0x2036   :  { %v3127_v13 = vrot.slane %v3121_v10, 6  ;;  %v3427_v10 = vld [vmem:[#allocation14 + $0xc8] sm:$0xff] }
0x2037   :  { %v3130_v40 = vadd.f32 %v3126_v30, %v3048_v27  ;;  %v3428_v30 = vld [vmem:[#allocation14 + $0xd0] sm:$0xff]  ;;  %v3431_v27 = vld [vmem:[#allocation14 + $0xe8] sm:$0xff] }
0x2038   :  { %v3131_v19 = vadd.f32 %v3127_v13, %v3049_v18  ;;  %v3429_v13 = vld [vmem:[#allocation14 + $0xd8] sm:$0xff]  ;;  %v4500_v18 = vpack.c.bf16 %v3424_v47, %v3422_v49 }
0x2039   :  { %v3931_v1 = vmul.f32 -1.442695, %v3130_v40  ;;  %v3433_v40 = vld [vmem:[#allocation14 + $0xf8] sm:$0xff] }
0x203a   :  { %4823 = vtanh.f32 %v3131_v19  ;;  %v3932_v38 = vmul.f32 -1.442695, %v3131_v19  ;;  %v4502_v19 = vpack.c.bf16 %v3429_v13, %v3427_v10 }
0x203b   :  { %4825 = vpow2.f32 %v3931_v1 }
0x2044   :  { %v4824_v14 = vpop.eup %4823 }
0x2045   :  { %3150 = vrot.lane.b32.xlu1 %v4824_v14, %s5165_s16  ;;  %v4826_v44 = vpop.eup %4825  ;;  %v3426_v14 = vld [vmem:[#allocation14 + $0xc0] sm:$0xff] }
0x2046   :  { %v3138_v54 = vadd.f32 1.0, %v4826_v44  ;;  %v4504_v1 = vpack.c.bf16 %v3428_v30, %v3426_v14  ;;  %v4506_v44 = vpack.c.bf16 %v3433_v40, %v3431_v27  ;;  %v3284_v27 = vld [vmem:[#allocation4 + $0x18] sm:$0xc0] }
0x2048   :  { %4827 = vrcp.f32 %v3138_v54  ;;  %v3430_v54 = vld [vmem:[#allocation14 + $0xe0] sm:$0xff] }
0x2052   :  { %v4828_v60 = vpop.eup %4827 }
0x2053   :  { %v3148_v46 = vmul.f32 %v4828_v60, %v3146_v24 }
0x20b7   :  { %v3151_v22 = vpop.permute.xlu1 %3150 }
0x20b8   :  { %v3153_v35 = vmul.f32 %v4828_v60, %v3151_v22  ;;  %v3432_v60 = vld [vmem:[#allocation14 + $0xf0] sm:$0xff] }
0x20b9   :  { %v4508_v22 = vpack.c.bf16 %v3432_v60, %v3430_v54  ;;  %v3283_v54 = vld [vmem:[#allocation4 + $0x10] sm:$0xc0] }
0x20ba   :  { %3155 = vrot.lane.b32.xlu0 %v3153_v35, %s5165_s16  ;;  %v3401_v35 = vld [vmem:[#allocation3 + $0xe] sm:$0x3] }
0x212c   :  { %v3156_v25 = vpop.permute.xlu0 %3155 }
0x212d   :  { %v6065_v28 = vadd.f32 %v3156_v25, %v3148_v46 }
0x212f   :  { %4829 = vtanh.f32 %v6065_v28 }
0x2130   :  { %4831 = vpow2.f32 %v3932_v38 }
0x2139   :  { %v4830_v41 = vpop.eup %4829 }
0x213a   :  { %3161 = vrot.lane.b32.xlu1 %v4830_v41, %s5165_s16  ;;  %v4832_v48 = vpop.eup %4831  ;;  %v3434_v41 = vld [vmem:[#allocation16] sm:$0x3] }
0x213b   :  { %v3139_v6 = vadd.f32 1.0, %v4832_v48  ;;  %v3439_v38 = vrot.slane %v3434_v41, %v5538_v26 }
0x213d   :  { %4833 = vrcp.f32 %v3139_v6 }
0x2147   :  { %v4834_v42 = vpop.eup %4833 }
0x21ac   :  { %v3162_v21 = vpop.permute.xlu1 %3161 }
0x21ad   :  { %v3164_v45 = vmul.f32 %v4834_v42, %v3162_v21  ;;  %v3165_v42 = vld [vmem:[#allocation4 + $0x10] sm:$0x30] }
0x21af   :  { %v3168_v53 = vrot.slane %v3164_v45, 2 }
0x21b1   :  { %3933 = vmatmul.mubr.msk.f32.vlgmr.msra.gmra.mrb[28].mxu0 %vm437_vm4, %v3168_v53 }
0x21b2   :  { %4481 = vmatpush1.bf16.msra.mxu0 %v4480_v4  ;;  %3510 = vmatprep.mubr.f32.mxu0 %v5163_v0  ;;  %v3443_v4 = vrot.slane %v3434_v41, %v5540_v29  ;;  %v3555_v41 = vld [vmem:[%s6233_s10 + $0x10] sm:$0xff] }
0x21b3   :  { %4483 = vmatprep.subr.bf16.mxu0 %v4482_v8 }
0x21b6   :  { %4485 = vmatpush1.bf16.msra.mxu0 %v4484_v23 }
0x21b7   :  { %4487 = vmatprep.subr.bf16.mxu0 %v4486_v61  ;;  %v3264_v61 = vrot.slane %v6065_v28, 6 }
0x21ba   :  { %4489 = vmatpush1.bf16.msra.mxu0 %v4488_v16 }
0x21bb   :  { %4491 = vmatprep.subr.bf16.mxu0 %v4490_v52 }
0x21be   :  { %4493 = vmatpush1.bf16.msra.mxu0 %v4492_v2 }
0x21bf   :  { %4495 = vmatprep.subr.bf16.mxu0 %v4494_v7 }
0x21c2   :  { %4497 = vmatpush1.bf16.msra.mxu0 %v4496_v62 }
0x21c3   :  { %4499 = vmatprep.subr.bf16.mxu0 %v4498_v12 }
0x21c6   :  { %4501 = vmatpush1.bf16.msra.mxu0 %v4500_v18 }
0x21c7   :  { %4503 = vmatprep.subr.bf16.mxu0 %v4502_v19 }
0x21ca   :  { %4505 = vmatpush1.bf16.msra.mxu0 %v4504_v1 }
0x21cb   :  { %4507 = vmatprep.subr.bf16.mxu0 %v4506_v44 }
0x21ce   :  { %4509 = vmatpush1.bf16.msra.mxu0 %v4508_v22 }
0x21d1   :  { %3511 = vmatmul.mubr.f32.vlgmr.msra.gmra.mrb[30].mxu0 %v3401_v35 }
0x21d2   :  { %4028 = vmatprep.mubr.msk.f32.mxu0 %vm5167_vm13, %v5163_v0 }
0x2284   :  { %v3237_v24 = vpop.f32.mrb[28].mxu0 }
0x2285   :  { %v3239_v46 = vpop.f32.mrb[29].mxu0  ;;  %v3244_v17 = vrot.slane %v3237_v24, 4 }
0x2286   :  { %v3245_v25 = vrot.slane %v3239_v46, 4 }
0x2287   :  { %v3248_v21 = vadd.f32 %v3244_v17, %v3165_v42  ;;  %v3557_v17 = vld [vmem:[%s6233_s10 + $0x20] sm:$0xff]  ;;  %v3558_v42 = vld [vmem:[%s6233_s10 + $0x28] sm:$0xff] }
0x2288   :  { %v3249_v31 = vadd.f32 %v3245_v25, %v3166_v63 }
0x2289   :  { %v3934_v34 = vmul.f32 -1.442695, %v3248_v21  ;;  %v4517_v21 = vpack.c.bf16 %v3558_v42, %v3557_v17 }
0x228a   :  { %4835 = vtanh.f32 %v3249_v31  ;;  %v3935_v58 = vmul.f32 -1.442695, %v3249_v31  ;;  %v3553_v31 = vld [vmem:[%s6233_s10] sm:$0xff] }
0x228b   :  { %4837 = vpow2.f32 %v3934_v34  ;;  %v3559_v34 = vld [vmem:[%s6233_s10 + $0x30] sm:$0xff] }
0x2294   :  { %v4836_v36 = vpop.eup %4835 }
0x2295   :  { %3268 = vrot.lane.b32.xlu0 %v4836_v36, %s5165_s16  ;;  %v4838_v15 = vpop.eup %4837  ;;  %v3554_v36 = vld [vmem:[%s6233_s10 + $0x8] sm:$0xff] }
0x2296   :  { %v3256_v45 = vadd.f32 1.0, %v4838_v15  ;;  %v3560_v15 = vld [vmem:[%s6233_s10 + $0x38] sm:$0xff] }
0x2298   :  { %4839 = vrcp.f32 %v3256_v45  ;;  %v4520_v45 = vpack.c.bf16 %v3560_v15, %v3559_v34 }
0x22a2   :  { %v4840_v8 = vpop.eup %4839 }
0x22a3   :  { %v3266_v39 = vmul.f32 %v4840_v8, %v3264_v61 }
0x22a4   :  { %v3512_v48 = vpop.f32.mrb[30].mxu0 }
0x22a5   :  { %v3513_v6 = vadd.f32 %v3512_v48, %v3439_v38  ;;  %v3514_v11 = vpop.f32.mrb[31].mxu0  ;;  %v5166_v38 = vmov 0.0|0.0   ;;  %v4511_v48 = vpack.c.bf16 %v3554_v36, %v3553_v31 }
0x22a6   :  { %v3515_v53 = vadd.f32 %v3514_v11, %v3443_v4  ;;  %4510 = vmatprep.subr.bf16.mxu1 %v5166_v38  ;;  %4534 = vmatprep.subr.bf16.mxu0 %v5166_v38  ;;  %v3561_v4 = vld [vmem:[%s6233_s10 + $0x40] sm:$0xff] }
0x22a7   :  { %v3939_v37 = vmul.f32 -1.442695, %v3513_v6  ;;  %v3556_v6 = vld [vmem:[%s6233_s10 + $0x18] sm:$0xff] }
0x22a8   :  { %4841 = vtanh.f32 %v3515_v53  ;;  %v3940_v62 = vmul.f32 -1.442695, %v3515_v53  ;;  %v4514_v11 = vpack.c.bf16 %v3556_v6, %v3555_v41  ;;  %v3562_v53 = vld [vmem:[%s6233_s10 + $0x48] sm:$0xff] }
0x22a9   :  { %4843 = vpow2.f32 %v3939_v37  ;;  %v3565_v37 = vld [vmem:[%s6233_s10 + $0x60] sm:$0xff] }
0x22b2   :  { %v4842_v26 = vpop.eup %4841 }
0x22b3   :  { %v4844_v33 = vpop.eup %4843 }
0x22b4   :  { %v3523_v23 = vadd.f32 1.0, %v4844_v33  ;;  %v3566_v33 = vld [vmem:[%s6233_s10 + $0x68] sm:$0xff] }
0x22b6   :  { %4845 = vrcp.f32 %v3523_v23  ;;  %v4529_v23 = vpack.c.bf16 %v3566_v33, %v3565_v37 }
0x22c0   :  { %v4846_v43 = vpop.eup %4845 }
0x22c1   :  { %v3530_v28 = vmul.f32 0.0, %v4846_v43 }
0x2307   :  { %v3269_v32 = vpop.permute.xlu0 %3268 }
0x2308   :  { %v3271_v50 = vmul.f32 %v4840_v8, %v3269_v32  ;;  %v4523_v8 = vpack.c.bf16 %v3562_v53, %v3561_v4  ;;  %v3563_v32 = vld [vmem:[%s6233_s10 + $0x50] sm:$0xff] }
0x230a   :  { %3273 = vrot.lane.b32.xlu1 %v3271_v50, %s5165_s16  ;;  %v3564_v50 = vld [vmem:[%s6233_s10 + $0x58] sm:$0xff] }
0x230e   :  { %3532 = vrot.lane.b32.xlu1 %v4842_v26, %s5165_s16  ;;  %v4526_v26 = vpack.c.bf16 %v3564_v50, %v3563_v32 }
0x237c   :  { %v3274_v29 = vpop.permute.xlu1 %3273 }
0x237d   :  { %v6077_v57 = vadd.f32 %v3274_v29, %v3266_v39 }
0x237f   :  { %4847 = vtanh.f32 %v6077_v57  ;;  %v3382_v61 = vrot.slane %v6077_v57, 6  ;;  %v3650_v57 = vld [vmem:[%s6235_s12] sm:$0xff] }
0x2380   :  { %v3533_v56 = vpop.permute.xlu1 %3532  ;;  %4849 = vpow2.f32 %v3935_v58  ;;  %v3651_v58 = vld [vmem:[%s6235_s12 + $0x8] sm:$0xff] }
0x2381   :  { %v3535_v16 = vmul.f32 %v4846_v43, %v3533_v56  ;;  %v3567_v56 = vld [vmem:[%s6233_s10 + $0x70] sm:$0xff] }
0x2383   :  { %3537 = vrot.lane.b32.xlu1 %v3535_v16, %s5165_s16  ;;  %v3568_v16 = vld [vmem:[%s6233_s10 + $0x78] sm:$0xff] }
0x2389   :  { %v4848_v52 = vpop.eup %4847 }
0x238a   :  { %3279 = vrot.lane.b32.xlu0 %v4848_v52, %s5165_s16  ;;  %v4850_v55 = vpop.eup %4849  ;;  %v4532_v52 = vpack.c.bf16 %v3568_v16, %v3567_v56 }
0x238b   :  { %v3257_v59 = vadd.f32 1.0, %v4850_v55  ;;  %v3652_v55 = vld [vmem:[%s6235_s12 + $0x10] sm:$0xff] }
0x238d   :  { %4851 = vrcp.f32 %v3257_v59  ;;  %v4535_v59 = vpack.c.bf16 %v3651_v58, %v3650_v57 }
0x238f   :  { %4536 = vmatpush3.bf16.msra.mxu0 %v4535_v59 }
0x2390   :  { %4537 = vmatprep.subr.bf16.mxu0 %v5166_v38 }
0x2397   :  { %v4852_v7 = vpop.eup %4851 }
0x23f5   :  { %v3538_v5 = vpop.permute.xlu1 %3537 }
0x23f6   :  { %v3540_v2 = vadd.f32 %v3538_v5, %v3530_v28  ;;  %v3653_v28 = vld [vmem:[%s6235_s12 + $0x18] sm:$0xff] }
0x23f7   :  { %v4538_v5 = vpack.c.bf16 %v3653_v28, %v3652_v55 }
0x23f8   :  { %4853 = vtanh.f32 %v3540_v2  ;;  %v3654_v2 = vld [vmem:[%s6235_s12 + $0x20] sm:$0xff] }
0x23f9   :  { %4855 = vpow2.f32 %v3940_v62  ;;  %4539 = vmatpush3.bf16.msra.mxu0 %v4538_v5 }
0x23fa   :  { %4540 = vmatprep.subr.bf16.mxu0 %v5166_v38 }
0x23fc   :  { %v3280_v51 = vpop.permute.xlu0 %3279 }
0x23fd   :  { %v3282_v3 = vmul.f32 %v4852_v7, %v3280_v51  ;;  %v3655_v7 = vld [vmem:[%s6235_s12 + $0x28] sm:$0xff] }
0x23ff   :  { %v3286_v20 = vrot.slane %v3282_v3, 4  ;;  %v4541_v3 = vpack.c.bf16 %v3655_v7, %v3654_v2 }
0x2401   :  { %3936 = vmatmul.mubr.msk.f32.vlgmr.msra.gmra.mrb[28].mxu1 %vm437_vm4, %v3286_v20  ;;  %4542 = vmatpush3.bf16.msra.mxu0 %v4541_v3 }
0x2402   :  { %v4854_v9 = vpop.eup %4853  ;;  %4512 = vmatpush3.bf16.msra.mxu1 %v4511_v48  ;;  %4009 = vmatprep.mubr.msk.f32.mxu1 %vm5167_vm13, %v5163_v0 }
0x2403   :  { %3543 = vrot.lane.b32.xlu1 %v4854_v9, %s5165_s16  ;;  %v4856_v12 = vpop.eup %4855  ;;  %4513 = vmatprep.subr.bf16.mxu1 %v5166_v38 }
0x2404   :  { %v3524_v49 = vadd.f32 1.0, %v4856_v12  ;;  %4543 = vmatprep.subr.bf16.mxu0 %v5166_v38 }
0x2406   :  { %4857 = vrcp.f32 %v3524_v49  ;;  %4515 = vmatpush3.bf16.msra.mxu1 %v4514_v11 }
0x2407   :  { %4516 = vmatprep.subr.bf16.mxu1 %v5166_v38 }
0x240a   :  { %4518 = vmatpush3.bf16.msra.mxu1 %v4517_v21 }
0x240b   :  { %4519 = vmatprep.subr.bf16.mxu1 %v5166_v38 }
0x240e   :  { %4521 = vmatpush3.bf16.msra.mxu1 %v4520_v45 }
0x240f   :  { %4522 = vmatprep.subr.bf16.mxu1 %v5166_v38 }
0x2410   :  { %v4858_v47 = vpop.eup %4857 }
0x2412   :  { %4524 = vmatpush3.bf16.msra.mxu1 %v4523_v8 }
0x2413   :  { %4525 = vmatprep.subr.bf16.mxu1 %v5166_v38 }
0x2416   :  { %4527 = vmatpush3.bf16.msra.mxu1 %v4526_v26 }
0x2417   :  { %4528 = vmatprep.subr.bf16.mxu1 %v5166_v38 }
0x241a   :  { %4530 = vmatpush3.bf16.msra.mxu1 %v4529_v23 }
0x241b   :  { %4531 = vmatprep.subr.bf16.mxu1 %v5166_v38 }
0x241e   :  { %4533 = vmatpush3.bf16.msra.mxu1 %v4532_v52 }
0x241f   :  { %4546 = vmatprep.subr.bf16.mxu1 %v5166_v38 }
0x2475   :  { %v3544_v10 = vpop.permute.xlu1 %3543 }
0x2476   :  { %v3546_v13 = vmul.f32 %v4858_v47, %v3544_v10 }
0x2478   :  { %v3548_v18 = vrot.slane %v3546_v13, 2 }
0x247a   :  { %3549 = vrot.lane.b32.xlu1 %v3548_v18, %s5165_s16 }
0x24d4   :  { %v3355_v19 = vpop.f32.mrb[28].mxu1 }
0x24d5   :  { %v3357_v14 = vpop.f32.mrb[29].mxu1  ;;  %v3362_v44 = vrot.slane %v3355_v19, 2  ;;  %v3656_v19 = vld [vmem:[%s6235_s12 + $0x30] sm:$0xff] }
0x24d6   :  { %v3363_v30 = vrot.slane %v3357_v14, 2  ;;  %v3657_v14 = vld [vmem:[%s6235_s12 + $0x38] sm:$0xff] }
0x24d7   :  { %v3366_v60 = vadd.f32 %v3362_v44, %v3283_v54 }
0x24d8   :  { %v6085_v40 = vadd.f32 %v3363_v30, %v3284_v27  ;;  %v4544_v30 = vpack.c.bf16 %v3657_v14, %v3656_v19  ;;  %v3739_v27 = vld [vmem:[%s6237_s14] sm:$0xff] }
0x24d9   :  { %v3937_v22 = vmul.f32 -1.442695, %v3366_v60 }
0x24da   :  { %4859 = vtanh.f32 %v6085_v40  ;;  %v3938_v20 = vmul.f32 -1.442695, %v6085_v40  ;;  %4545 = vmatpush3.bf16.msra.mxu0 %v4544_v30  ;;  %v3740_v40 = vld [vmem:[%s6237_s14 + $0x8] sm:$0xff] }
0x24db   :  { %4861 = vpow2.f32 %v3937_v22 }
0x24e4   :  { %v4860_v1 = vpop.eup %4859 }
0x24e5   :  { %3386 = vrot.lane.b32.xlu0 %v4860_v1, %s5165_s16  ;;  %v4862_v35 = vpop.eup %4861  ;;  %v4547_v1 = vpack.c.bf16 %v3740_v40, %v3739_v27 }
0x24e6   :  { %v3374_v24 = vadd.f32 1.0, %v4862_v35  ;;  %v3741_v35 = vld [vmem:[%s6237_s14 + $0x10] sm:$0xff] }
0x24e8   :  { %4863 = vrcp.f32 %v3374_v24  ;;  %v3742_v24 = vld [vmem:[%s6237_s14 + $0x18] sm:$0xff] }
0x24ec   :  { %v3550_v10 = vpop.permute.xlu1 %3549 }
0x24f2   :  { %v4864_v46 = vpop.eup %4863 }
0x24f3   :  { %v3384_v39 = vmul.f32 %v4864_v46, %v3382_v61 }
0x2557   :  { %v3387_v25 = vpop.permute.xlu0 %3386 }
0x2558   :  { %v3389_v63 = vmul.f32 %v4864_v46, %v3387_v25  ;;  %v4550_v46 = vpack.c.bf16 %v3742_v24, %v3741_v35  ;;  %v3942_v25 = vld [vmem:[#allocation19] ss:$0 sm:$0xff] }
0x255a   :  { %3391 = vrot.lane.b32.xlu0 %v3389_v63, %s5165_s16 }
0x25cc   :  { %v3392_v29 = vpop.permute.xlu0 %3391 }
0x25cd   :  { %v3394_v43 = vadd.f32 %v3392_v29, %v3384_v39 }
0x25cf   :  { %4865 = vtanh.f32 %v3394_v43 }
0x25d0   :  { %4867 = vpow2.f32 %v3938_v20 }
0x25d9   :  { %v4866_v51 = vpop.eup %4865 }
0x25da   :  { %3397 = vrot.lane.b32.xlu0 %v4866_v51, %s5165_s16  ;;  %v4868_v9 = vpop.eup %4867 }
0x25db   :  { %v3375_v62 = vadd.f32 1.0, %v4868_v9 }
0x25dd   :  { %4869 = vrcp.f32 %v3375_v62 }
0x25e7   :  { %v4870_v12 = vpop.eup %4869 }
0x264c   :  { %v3398_v49 = vpop.permute.xlu0 %3397 }
0x264d   :  { %v3400_v47 = vmul.f32 %v4870_v12, %v3398_v49 }
0x264f   :  { %v3552_v13 = vsel %vm437_vm4, %v3400_v47, %v3550_v10 }
0x2650   :  { %v3577_v18 = vrot.slane %v3552_v13, 6 }
0x2652   :  { %4010 = vmatmul.mubr.f32.vlgmr.msra.gmra.mrb[30].mxu1 %v3577_v18 }
0x2653   :  { %4039 = vmatprep.mubr.msk.f32.mxu1 %vm5167_vm13, %v5163_v0  ;;  %4548 = vmatpush3.bf16.msra.mxu1 %v4547_v1  ;;  %v3941_v0 = vld [vmem:[#allocation17] ss:$0 sm:$0xff] }
0x2654   :  { %4549 = vmatprep.subr.bf16.mxu1 %v5166_v38 }
0x2657   :  { %4551 = vmatpush3.bf16.msra.mxu1 %v4550_v46 }
0x2725   :  { %v3645_v44 = vpop.f32.mrb[30].mxu1 }
0x2726   :  { %v3646_v54 = vadd.f32 %v3941_v0, %v3645_v44  ;;  %v4011_v60 = vpop.f32.mrb[31].mxu1 }
0x2728   :  { %v3649_v22 = vmax.f32 %v3646_v54, 0.0 }
0x272a   :  { %4029 = vmatmul.mubr.msk.f32.vlgmr.msra.gmra.mrb[32].mxu0 %vm437_vm4, %v3649_v22 }
0x27fd   :  { %v3734_v63 = vpop.f32.mrb[32].mxu0 }
0x27fe   :  { %v3735_v31 = vadd.f32 %v3942_v25, %v3734_v63  ;;  %v4030_v36 = vpop.f32.mrb[33].mxu0 }
0x2800   :  { %v3738_v41 = vmax.f32 %v3735_v31, 0.0 }
0x2802   :  { %4040 = vmatmul.mubr.msk.f32.vlgmr.msra.gmra.mrb[32].mxu1 %vm3750_vm14, %v3738_v41  ;;  %3825 = vst.msk [vmem:[#allocation23] sm:$0x3] %vm3824_vm15, %v3738_v41 }
0x2803   :  { %5102 = shalt.err (!%p5099_p0)
}
0x2804   :  { %s5103_s26 = scalar_lea.hbm %s6240_s17, 32 }
0x2805   :  { %p5104_p1 = scmp.ne.s32.totalorder %s6240_s17, %s5103_s26  ;;  %p5107_p2 = scmp.lt.u32.totalorder %s5103_s26, %s6240_s17 }
0x2807   :  { %p5109_p3 = pnand %p5107_p2, %p5104_p1 }
0x2809   :  { %5112 = shalt.err (!%p5109_p3)
}
0x280a   :  { %3847 = dma.vmem_to_hbm [thread:$0]  %s3845_s23, 32, %s6240_s17, [#allocation24]   ;;  %v3944_v38 = vld [vmem:[#allocation20] ss:$0 sm:$0xff]  ;;  %vm3826_vm0 = vcmask 17408  }
0x280b   :  { %s5169_s10 = smov [#allocation22]  }
0x280c   :  { %s3834_s28 = sshll.u32 %s5169_s10, 4  ;;  %s3835_s28 = int_to_ptr.vmem [resolvable:$true] %s3834_s28 }
0x280d   :  { %s5113_s0 = scalar_lea.vmem %s3835_s28, 32  ;;  %p5118_p5 = scmp.lt.s32.totalorder %s3835_s28, %s3835_s28 }
0x280e   :  { %p5114_p4 = scmp.ne.s32.totalorder %s3835_s28, %s5113_s0  ;;  %p5119_p6 = scmp.lt.s32.totalorder %s5113_s0, %s5113_s0 }
0x2810   :  { %p5120_p7 = por %p5119_p6, %p5118_p5 }
0x2812   :  { %p5121_p8 = pnand %p5120_p7, %p5114_p4 }
0x28d5   :  { %v3820_v48 = vpop.f32.mrb[32].mxu1 }
0x28d6   :  { %v3821_v6 = vadd.f32 %v3944_v38, %v3820_v48  ;;  %v4041_v11 = vpop.f32.mrb[33].mxu1 }
0x28d8   :  { %3827 = vst.msk [vmem:[#allocation22] sm:$0x3] %vm3826_vm0, %v3821_v6 }
0x28d9   :  { %5124 = shalt.err (!%p5121_p8)
}
0x28da   :  { %s6251_s18 = sld [smem:[#allocation35_spill]] }
0x28e0   :  { %s5125_s17 = scalar_lea.hbm %s6251_s18, 32 }
0x28e1   :  { %p5126_p9 = scmp.ne.s32.totalorder %s6251_s18, %s5125_s17  ;;  %p5129_p10 = scmp.lt.u32.totalorder %s5125_s17, %s6251_s18 }
0x28e3   :  { %p5131_p11 = pnand %p5129_p10, %p5126_p9 }
0x28e5   :  { %5134 = shalt.err (!%p5131_p11)
}
0x28e6   :  { %3837 = dma.vmem_to_hbm [thread:$0]  %s3835_s28, 32, %s6251_s18, [#allocation7]  }
0x28e7   :  { %5147 = dma.done.wait [#allocation7], 32  }
0x28e8   :  { %5148 = vsyncadd [#allocation7], 4294967264 }
0x28e9   :  { %5149 = dma.done.wait [#allocation24], 32  }
0x28ea   :  { %5150 = vsyncadd [#allocation24], 4294967264 }
0x28eb   :  { %3854 = vsyncpa [#allocation6], 1 }
0x28ec   :  { %3855 = vsyncpa [#allocation9], 1 }
0x28ed   :  { %3856 = vsyncpa [#allocation12], 1 }
0x28ee   :  { %3857 = vsyncpa [#allocation15], 1 }
0x28ef   :  { %3858 = vsyncpa [#allocation18], 1 }
0x28f0   :  { %3859 = vsyncpa [#allocation21], 1 }
0x28f1   :  { %3860 = vsyncpa [#allocation7], 1 }
0x28f2   :  { %3861 = vsyncpa [#allocation24], 1 }

</bundles_post_ra>
